<compile_context>
chip_gen: v7x
topology: tpu7x:2x2x1
jax: 0.10.0
libtpu: 0.0.40
codegen_flags: <defaults>
</compile_context>

<pallas_src>
import functools
import numpy as np
import jax
import jax.numpy as jnp
from jax import lax
from jax.experimental import pallas as pl
from jax.experimental.pallas import tpu as pltpu

NEG_SLOPE = 0.2


# ----------------------------------------------------------------------------
# Fused Pallas kernels: matmul + bias + leaky-relu (+ residual add)
# ----------------------------------------------------------------------------
def _conv_mm_kernel(a_ref, b_ref, bias_ref, o_ref, *, apply_lrelu):
    r = jnp.dot(a_ref[...], b_ref[...], preferred_element_type=jnp.float32)
    r = r + bias_ref[...]                       # (tm,N) + (1,N) broadcast
    if apply_lrelu:
        r = jnp.where(r >= 0, r, NEG_SLOPE * r)
    o_ref[...] = r.astype(o_ref.dtype)


def _conv_mm_skip_kernel(a_ref, b_ref, bias_ref, skip_ref, o_ref, *,
                         apply_lrelu):
    r = jnp.dot(a_ref[...], b_ref[...], preferred_element_type=jnp.float32)
    r = r + bias_ref[...]
    if apply_lrelu:
        r = jnp.where(r >= 0, r, NEG_SLOPE * r)
    o_ref[...] = (r + skip_ref[...]).astype(o_ref.dtype)


def _round_up(x, m):
    return ((x + m - 1) // m) * m


def _pick_tm(m, cap=256):
    """Largest multiple-of-8 divisor of m not exceeding cap (m % 8 == 0)."""
    t = min(cap, m)
    t -= t % 8
    while t >= 8:
        if m % t == 0:
            return t
        t -= 8
    return 8


def fused_conv_matmul(a, w, bias, skip, apply_lrelu, tm_cap=256):
    """out = maybe_leaky_relu(a @ w + bias) [+ skip].

    a: (M, K) patches, w: (K, N) weights — fed to the MXU in bf16 with f32
    accumulation.  bias: (N,) f32 or None.  skip: (M, N) f32 or None.
    Returns (M, N) f32.
    """
    a = a.astype(jnp.bfloat16)
    w = w.astype(jnp.bfloat16)
    M, K = a.shape
    Kw, N = w.shape
    assert Kw == K

    # Pad K to a multiple of 16 (bf16 packed-sublane friendly); zero columns /
    # rows contribute exactly zero to the accumulation.
    Kp = _round_up(K, 16)
    if Kp != K:
        a = jnp.pad(a, ((0, 0), (0, Kp - K)))
        w = jnp.pad(w, ((0, Kp - K), (0, 0)))

    # Pad N only up to a multiple of 8 (avoids a degenerate N==1 matmul for
    # the final conv; still 16x less traffic than padding to 128).
    Np = _round_up(N, 8)
    if Np != N:
        w = jnp.pad(w, ((0, 0), (0, Np - N)))
        if skip is not None:
            skip = jnp.pad(skip, ((0, 0), (0, Np - N)))

    # Pad M to a multiple of 8 (no-op for the shapes produced by this model).
    Mp = _round_up(M, 8)
    if Mp != M:
        a = jnp.pad(a, ((0, Mp - M), (0, 0)))
        if skip is not None:
            skip = jnp.pad(skip, ((0, Mp - M), (0, 0)))

    if bias is None:
        bias = jnp.zeros((N,), jnp.float32)
    bias2d = bias.astype(jnp.float32).reshape(1, N)
    if Np != N:
        bias2d = jnp.pad(bias2d, ((0, 0), (0, Np - N)))

    tm = _pick_tm(Mp, tm_cap)
    grid = (Mp // tm,)

    in_specs = [
        pl.BlockSpec((tm, Kp), lambda i: (i, 0)),    # patch tile
        pl.BlockSpec((Kp, Np), lambda i: (0, 0)),    # full weight (resident)
        pl.BlockSpec((1, Np), lambda i: (0, 0)),     # bias (resident)
    ]
    args = [a, w, bias2d]
    if skip is not None:
        in_specs.append(pl.BlockSpec((tm, Np), lambda i: (i, 0)))
        args.append(skip.astype(jnp.float32))
        kernel = functools.partial(_conv_mm_skip_kernel,
                                   apply_lrelu=apply_lrelu)
    else:
        kernel = functools.partial(_conv_mm_kernel, apply_lrelu=apply_lrelu)

    out = pl.pallas_call(
        kernel,
        out_shape=jax.ShapeDtypeStruct((Mp, Np), jnp.float32),
        grid_spec=pltpu.PrefetchScalarGridSpec(
            num_scalar_prefetch=0,
            grid=grid,
            in_specs=in_specs,
            out_specs=pl.BlockSpec((tm, Np), lambda i: (i, 0)),
        ),
        compiler_params=pltpu.CompilerParams(
            dimension_semantics=("parallel",)),
    )(*args)

    if Mp != M or Np != N:
        out = out[:M, :N]
    return out


# ----------------------------------------------------------------------------
# Glue: im2col, conv block, bilinear 2x upsample, spectral norm
# ----------------------------------------------------------------------------
def im2col(x_bf16, k, stride, pad):
    """x: NHWC (bf16) -> patches [N*Ho*Wo, k*k*C] (ordering matches HWIO)."""
    N, H, W, C = x_bf16.shape
    xp = jnp.pad(x_bf16, ((0, 0), (pad, pad), (pad, pad), (0, 0)))
    Ho = (H + 2 * pad - k) // stride + 1
    Wo = (W + 2 * pad - k) // stride + 1
    cols = []
    for di in range(k):
        for dj in range(k):
            cols.append(xp[:, di:di + stride * Ho:stride,
                            dj:dj + stride * Wo:stride, :])
    patches = jnp.concatenate(cols, axis=-1)        # [N,Ho,Wo,k*k*C]
    return patches.reshape(N * Ho * Wo, k * k * C), Ho, Wo


def conv_block(x, w_hwio, bias, k, stride, pad, apply_lrelu, skip=None):
    """Conv2d (+bias) -> optional leaky_relu -> optional residual add."""
    N, H, W, C = x.shape
    patches, Ho, Wo = im2col(x.astype(jnp.bfloat16), k, stride, pad)
    Cout = w_hwio.shape[-1]
    wm = w_hwio.reshape(-1, Cout)
    skip_flat = None if skip is None else skip.reshape(-1, Cout)
    out = fused_conv_matmul(patches, wm, bias, skip_flat, apply_lrelu)
    return out.reshape(N, Ho, Wo, Cout)


def upsample2x_bilinear(x):
    """Exact F.interpolate(scale_factor=2, mode='bilinear',
    align_corners=False), NHWC layout, f32."""
    def up1d(x, axis):
        H = x.shape[axis]
        j = jnp.arange(2 * H)
        src = (j + 0.5) / 2.0 - 0.5
        i0 = jnp.floor(src).astype(jnp.int32)
        frac = (src - i0).astype(jnp.float32)
        i0c = jnp.clip(i0, 0, H - 1)
        i1c = jnp.clip(i0 + 1, 0, H - 1)
        x0 = jnp.take(x, i0c, axis=axis)
        x1 = jnp.take(x, i1c, axis=axis)
        shape = [1] * x.ndim
        shape[axis] = 2 * H
        w = frac.reshape(shape)
        return x0 * (1.0 - w) + x1 * w
    return up1d(up1d(x, 1), 2)


def spectral_normalize(w_oihw, key, n_iter=1):
    """Divide weight by an estimate of its largest singular value
    (power iteration, matching torch.nn.utils.spectral_norm semantics)."""
    cout = w_oihw.shape[0]
    wm = w_oihw.reshape(cout, -1).astype(jnp.float32)
    u = jax.random.normal(key, (cout,), jnp.float32)
    u = u / (jnp.linalg.norm(u) + 1e-12)
    v = None
    for _ in range(n_iter):
        v = wm.T @ u
        v = v / (jnp.linalg.norm(v) + 1e-12)
        u = wm @ v
        u = u / (jnp.linalg.norm(u) + 1e-12)
    sigma = u @ (wm @ v)
    return w_oihw / sigma


# ----------------------------------------------------------------------------
# Parameter construction (deterministic, synthetic)
# ----------------------------------------------------------------------------
def init_params(key, num_in_ch=3, num_feat=16):
    nf = num_feat
    specs = [
        ("0", (nf,      num_in_ch, 3, 3), True,  False),
        ("1", (nf * 2,  nf,        4, 4), False, True),
        ("2", (nf * 4,  nf * 2,    4, 4), False, True),
        ("3", (nf * 8,  nf * 4,    4, 4), False, True),
        ("4", (nf * 4,  nf * 8,    3, 3), False, True),
        ("5", (nf * 2,  nf * 4,    3, 3), False, True),
        ("6", (nf,      nf * 2,    3, 3), False, True),
        ("7", (nf,      nf,        3, 3), False, True),
        ("8", (nf,      nf,        3, 3), False, True),
        ("9", (1,       nf,        3, 3), True,  False),
    ]
    params = {}
    keys = jax.random.split(key, 3 * len(specs))
    for idx, (name, shape, has_bias, use_sn) in enumerate(specs):
        cout, cin, kh, kw = shape
        fan_in = cin * kh * kw
        w = jax.random.normal(keys[3 * idx], shape, jnp.float32) * jnp.sqrt(
            2.0 / fan_in)
        if use_sn:
            w = spectral_normalize(w, keys[3 * idx + 1])
        # OIHW -> HWIO, stored bf16 (MXU-native operand dtype).
        params["w" + name] = jnp.transpose(w, (2, 3, 1, 0)).astype(jnp.bfloat16)
        if has_bias:
            params["b" + name] = (
                jax.random.normal(keys[3 * idx + 2], (cout,), jnp.float32)
                * 0.01)
    return params


# ----------------------------------------------------------------------------
# Forward passes
# ----------------------------------------------------------------------------
def discriminator_forward(params, x_nchw):
    """Pallas-backed forward. Input/output NCHW (PyTorch convention)."""
    x = jnp.transpose(x_nchw, (0, 2, 3, 1)).astype(jnp.float32)   # -> NHWC

    x0 = conv_block(x,  params["w0"], params["b0"], 3, 1, 1, True)
    x1 = conv_block(x0, params["w1"], None,         4, 2, 1, True)
    x2 = conv_block(x1, params["w2"], None,         4, 2, 1, True)
    x3 = conv_block(x2, params["w3"], None,         4, 2, 1, True)

    x3 = upsample2x_bilinear(x3)
    x4 = conv_block(x3, params["w4"], None, 3, 1, 1, True, skip=x2)
    x4 = upsample2x_bilinear(x4)
    x5 = conv_block(x4, params["w5"], None, 3, 1, 1, True, skip=x1)
    x5 = upsample2x_bilinear(x5)
    x6 = conv_block(x5, params["w6"], None, 3, 1, 1, True, skip=x0)

    out = conv_block(x6,  params["w7"], None, 3, 1, 1, True)
    out = conv_block(out, params["w8"], None, 3, 1, 1, True)
    out = conv_block(out, params["w9"], params["b9"], 3, 1, 1, False)
    return jnp.transpose(out, (0, 3, 1, 2))                        # -> NCHW


def _ref_conv(x, w_hwio_bf16, bias, stride, pad):
    # Same precision policy as the Pallas path: bf16 operands, f32 accumulate.
    y = lax.conv_general_dilated(
        x.astype(jnp.bfloat16), w_hwio_bf16, (stride, stride),
        [(pad, pad), (pad, pad)],
        dimension_numbers=("NHWC", "HWIO", "NHWC"),
        preferred_element_type=jnp.float32)
    if bias is not None:
        y = y + bias
    return y


def _lrelu(x):
    return jnp.where(x >= 0, x, NEG_SLOPE * x)


def reference_forward(params, x_nchw):
    """Pure-JAX (XLA conv) reference for correctness check."""
    x = jnp.transpose(x_nchw, (0, 2, 3, 1)).astype(jnp.float32)
    x0 = _lrelu(_ref_conv(x,  params["w0"], params["b0"], 1, 1))
    x1 = _lrelu(_ref_conv(x0, params["w1"], None, 2, 1))
    x2 = _lrelu(_ref_conv(x1, params["w2"], None, 2, 1))
    x3 = _lrelu(_ref_conv(x2, params["w3"], None, 2, 1))
    x3 = upsample2x_bilinear(x3)
    x4 = _lrelu(_ref_conv(x3, params["w4"], None, 1, 1)) + x2
    x4 = upsample2x_bilinear(x4)
    x5 = _lrelu(_ref_conv(x4, params["w5"], None, 1, 1)) + x1
    x5 = upsample2x_bilinear(x5)
    x6 = _lrelu(_ref_conv(x5, params["w6"], None, 1, 1)) + x0
    out = _lrelu(_ref_conv(x6,  params["w7"], None, 1, 1))
    out = _lrelu(_ref_conv(out, params["w8"], None, 1, 1))
    out = _ref_conv(out, params["w9"], params["b9"], 1, 1)
    return jnp.transpose(out, (0, 3, 1, 2))


# ----------------------------------------------------------------------------
if __name__ == "__main__":
    key = jax.random.PRNGKey(0)
    k_param, k_input = jax.random.split(key)

    NUM_IN_CH, NUM_FEAT = 3, 16          # small synthetic config
    B, H, W = 2, 16, 16                  # spatial must be divisible by 8

    params = init_params(k_param, NUM_IN_CH, NUM_FEAT)
    x = jax.random.normal(k_input, (B, NUM_IN_CH, H, W), jnp.float32)

    fwd = jax.jit(discriminator_forward)
    out = fwd(params, x)
    jax.block_until_ready(out)

    assert out.shape == (B, 1, H, W), out.shape

    ref = jax.jit(reference_forward)(params, x)
    jax.block_until_ready(ref)
    np.testing.assert_allclose(np.asarray(out), np.asarray(ref),
                               rtol=2e-3, atol=2e-3)

    print("KERNEL_OK")
</pallas_src>

<mosaic_0001>
module attributes {stable_mosaic.version = 11 : i64} {
  func.func @_conv_mm_kernel(%arg0: i32, %arg1: memref<256x32xbf16, #tpu.memory_space<vmem>>, %arg2: memref<32x16xbf16, #tpu.memory_space<vmem>>, %arg3: memref<1x16xf32, #tpu.memory_space<vmem>>, %arg4: memref<256x16xf32, #tpu.memory_space<vmem>>) attributes {dimension_semantics = [#tpu.dimension_semantics<parallel>], iteration_bounds = array<i64: 2>, scalar_prefetch = 0 : i64, scratch_operands = 0 : i64, tpu.core_type = #tpu.core_type<tc>, window_params = [{transform_indices = @transform_0, window_bounds = array<i64: 256, 32>}, {pipeline_mode = #tpu.pipeline_mode<synchronous>, transform_indices = @transform_1, window_bounds = array<i64: 32, 16>}, {pipeline_mode = #tpu.pipeline_mode<synchronous>, transform_indices = @transform_2, window_bounds = array<i64: 1, 16>}, {transform_indices = @transform_3, window_bounds = array<i64: 256, 16>}]} {
    %c0 = arith.constant 0 : index
    %c0_0 = arith.constant 0 : index
    %0 = vector.load %arg1[%c0, %c0_0] : memref<256x32xbf16, #tpu.memory_space<vmem>>, vector<256x32xbf16>
    %c0_1 = arith.constant 0 : index
    %c0_2 = arith.constant 0 : index
    %1 = vector.load %arg2[%c0_1, %c0_2] : memref<32x16xbf16, #tpu.memory_space<vmem>>, vector<32x16xbf16>
    %cst = arith.constant dense<0.000000e+00> : vector<256x16xf32>
    %2 = tpu.matmul %0, %1, %cst {dimension_numbers = #tpu.dot_dimension_numbers<[1], [0], [0], [1], [0, 0, 1, 1], [], []>} : vector<256x32xbf16>, vector<32x16xbf16>, vector<256x16xf32> -> vector<256x16xf32>
    %c0_3 = arith.constant 0 : index
    %c0_4 = arith.constant 0 : index
    %3 = vector.load %arg3[%c0_3, %c0_4] : memref<1x16xf32, #tpu.memory_space<vmem>>, vector<1x16xf32>
    %4 = vector.broadcast %3 : vector<1x16xf32> to vector<256x16xf32>
    %5 = arith.addf %2, %4 : vector<256x16xf32>
    %cst_5 = arith.constant 0.000000e+00 : f32
    %6 = vector.broadcast %cst_5 : f32 to vector<256x16xf32>
    %7 = arith.cmpf oge, %5, %6 : vector<256x16xf32>
    %cst_6 = arith.constant 2.000000e-01 : f32
    %8 = vector.broadcast %cst_6 : f32 to vector<256x16xf32>
    %9 = arith.mulf %8, %5 : vector<256x16xf32>
    %10 = arith.select %7, %5, %9 : vector<256x16xi1>, vector<256x16xf32>
    %c0_7 = arith.constant 0 : index
    %c0_8 = arith.constant 0 : index
    %11 = vector.load %arg4[%c0_7, %c0_8] : memref<256x16xf32, #tpu.memory_space<vmem>>, vector<256x16xf32>
    tpu.vector_store %arg4[%c0_7, %c0_8], %10 {strides = array<i32>} : memref<256x16xf32, #tpu.memory_space<vmem>>, vector<256x16xf32>,
    return
  }
  func.func @transform_0(%arg0: i32) -> (i32, i32) {
    %c0_i32 = arith.constant 0 : i32
    %c0_i32_0 = arith.constant 0 : i32
    return %arg0, %c0_i32 : i32, i32
  }
  func.func @transform_1(%arg0: i32) -> (i32, i32) {
    %c0_i32 = arith.constant 0 : i32
    %c0_i32_0 = arith.constant 0 : i32
    %c0_i32_1 = arith.constant 0 : i32
    return %c0_i32, %c0_i32_0 : i32, i32
  }
  func.func @transform_2(%arg0: i32) -> (i32, i32) {
    %c0_i32 = arith.constant 0 : i32
    %c0_i32_0 = arith.constant 0 : i32
    %c0_i32_1 = arith.constant 0 : i32
    return %c0_i32, %c0_i32_0 : i32, i32
  }
  func.func @transform_3(%arg0: i32) -> (i32, i32) {
    %c0_i32 = arith.constant 0 : i32
    %c0_i32_0 = arith.constant 0 : i32
    return %arg0, %c0_i32 : i32, i32
  }
}

module attributes {stable_mosaic.version = 11 : i64} {
  func.func @_conv_mm_kernel(%arg0: i32, %arg1: memref<128x256xbf16, #tpu.memory_space<vmem>>, %arg2: memref<256x32xbf16, #tpu.memory_space<vmem>>, %arg3: memref<1x32xf32, #tpu.memory_space<vmem>>, %arg4: memref<128x32xf32, #tpu.memory_space<vmem>>) attributes {dimension_semantics = [#tpu.dimension_semantics<parallel>], iteration_bounds = array<i64: 1>, scalar_prefetch = 0 : i64, scratch_operands = 0 : i64, tpu.core_type = #tpu.core_type<tc>, window_params = [{transform_indices = @transform_0, window_bounds = array<i64: 128, 256>}, {pipeline_mode = #tpu.pipeline_mode<synchronous>, transform_indices = @transform_1, window_bounds = array<i64: 256, 32>}, {pipeline_mode = #tpu.pipeline_mode<synchronous>, transform_indices = @transform_2, window_bounds = array<i64: 1, 32>}, {transform_indices = @transform_3, window_bounds = array<i64: 128, 32>}]} {
    %c0 = arith.constant 0 : index
    %c0_0 = arith.constant 0 : index
    %0 = vector.load %arg1[%c0, %c0_0] : memref<128x256xbf16, #tpu.memory_space<vmem>>, vector<128x256xbf16>
    %c0_1 = arith.constant 0 : index
    %c0_2 = arith.constant 0 : index
    %1 = vector.load %arg2[%c0_1, %c0_2] : memref<256x32xbf16, #tpu.memory_space<vmem>>, vector<256x32xbf16>
    %cst = arith.constant dense<0.000000e+00> : vector<128x32xf32>
    %2 = tpu.matmul %0, %1, %cst {dimension_numbers = #tpu.dot_dimension_numbers<[1], [0], [0], [1], [0, 0, 1, 1], [], []>} : vector<128x256xbf16>, vector<256x32xbf16>, vector<128x32xf32> -> vector<128x32xf32>
    %c0_3 = arith.constant 0 : index
    %c0_4 = arith.constant 0 : index
    %3 = vector.load %arg3[%c0_3, %c0_4] : memref<1x32xf32, #tpu.memory_space<vmem>>, vector<1x32xf32>
    %4 = vector.broadcast %3 : vector<1x32xf32> to vector<128x32xf32>
    %5 = arith.addf %2, %4 : vector<128x32xf32>
    %cst_5 = arith.constant 0.000000e+00 : f32
    %6 = vector.broadcast %cst_5 : f32 to vector<128x32xf32>
    %7 = arith.cmpf oge, %5, %6 : vector<128x32xf32>
    %cst_6 = arith.constant 2.000000e-01 : f32
    %8 = vector.broadcast %cst_6 : f32 to vector<128x32xf32>
    %9 = arith.mulf %8, %5 : vector<128x32xf32>
    %10 = arith.select %7, %5, %9 : vector<128x32xi1>, vector<128x32xf32>
    %c0_7 = arith.constant 0 : index
    %c0_8 = arith.constant 0 : index
    %11 = vector.load %arg4[%c0_7, %c0_8] : memref<128x32xf32, #tpu.memory_space<vmem>>, vector<128x32xf32>
    tpu.vector_store %arg4[%c0_7, %c0_8], %10 {strides = array<i32>} : memref<128x32xf32, #tpu.memory_space<vmem>>, vector<128x32xf32>,
    return
  }
  func.func @transform_0(%arg0: i32) -> (i32, i32) {
    %c0_i32 = arith.constant 0 : i32
    %c0_i32_0 = arith.constant 0 : i32
    return %arg0, %c0_i32 : i32, i32
  }
  func.func @transform_1(%arg0: i32) -> (i32, i32) {
    %c0_i32 = arith.constant 0 : i32
    %c0_i32_0 = arith.constant 0 : i32
    %c0_i32_1 = arith.constant 0 : i32
    return %c0_i32, %c0_i32_0 : i32, i32
  }
  func.func @transform_2(%arg0: i32) -> (i32, i32) {
    %c0_i32 = arith.constant 0 : i32
    %c0_i32_0 = arith.constant 0 : i32
    %c0_i32_1 = arith.constant 0 : i32
    return %c0_i32, %c0_i32_0 : i32, i32
  }
  func.func @transform_3(%arg0: i32) -> (i32, i32) {
    %c0_i32 = arith.constant 0 : i32
    %c0_i32_0 = arith.constant 0 : i32
    return %arg0, %c0_i32 : i32, i32
  }
}

module attributes {stable_mosaic.version = 11 : i64} {
  func.func @_conv_mm_kernel(%arg0: i32, %arg1: memref<32x512xbf16, #tpu.memory_space<vmem>>, %arg2: memref<512x64xbf16, #tpu.memory_space<vmem>>, %arg3: memref<1x64xf32, #tpu.memory_space<vmem>>, %arg4: memref<32x64xf32, #tpu.memory_space<vmem>>) attributes {dimension_semantics = [#tpu.dimension_semantics<parallel>], iteration_bounds = array<i64: 1>, scalar_prefetch = 0 : i64, scratch_operands = 0 : i64, tpu.core_type = #tpu.core_type<tc>, window_params = [{transform_indices = @transform_0, window_bounds = array<i64: 32, 512>}, {pipeline_mode = #tpu.pipeline_mode<synchronous>, transform_indices = @transform_1, window_bounds = array<i64: 512, 64>}, {pipeline_mode = #tpu.pipeline_mode<synchronous>, transform_indices = @transform_2, window_bounds = array<i64: 1, 64>}, {transform_indices = @transform_3, window_bounds = array<i64: 32, 64>}]} {
    %c0 = arith.constant 0 : index
    %c0_0 = arith.constant 0 : index
    %0 = vector.load %arg1[%c0, %c0_0] : memref<32x512xbf16, #tpu.memory_space<vmem>>, vector<32x512xbf16>
    %c0_1 = arith.constant 0 : index
    %c0_2 = arith.constant 0 : index
    %1 = vector.load %arg2[%c0_1, %c0_2] : memref<512x64xbf16, #tpu.memory_space<vmem>>, vector<512x64xbf16>
    %cst = arith.constant dense<0.000000e+00> : vector<32x64xf32>
    %2 = tpu.matmul %0, %1, %cst {dimension_numbers = #tpu.dot_dimension_numbers<[1], [0], [0], [1], [0, 0, 1, 1], [], []>} : vector<32x512xbf16>, vector<512x64xbf16>, vector<32x64xf32> -> vector<32x64xf32>
    %c0_3 = arith.constant 0 : index
    %c0_4 = arith.constant 0 : index
    %3 = vector.load %arg3[%c0_3, %c0_4] : memref<1x64xf32, #tpu.memory_space<vmem>>, vector<1x64xf32>
    %4 = vector.broadcast %3 : vector<1x64xf32> to vector<32x64xf32>
    %5 = arith.addf %2, %4 : vector<32x64xf32>
    %cst_5 = arith.constant 0.000000e+00 : f32
    %6 = vector.broadcast %cst_5 : f32 to vector<32x64xf32>
    %7 = arith.cmpf oge, %5, %6 : vector<32x64xf32>
    %cst_6 = arith.constant 2.000000e-01 : f32
    %8 = vector.broadcast %cst_6 : f32 to vector<32x64xf32>
    %9 = arith.mulf %8, %5 : vector<32x64xf32>
    %10 = arith.select %7, %5, %9 : vector<32x64xi1>, vector<32x64xf32>
    %c0_7 = arith.constant 0 : index
    %c0_8 = arith.constant 0 : index
    %11 = vector.load %arg4[%c0_7, %c0_8] : memref<32x64xf32, #tpu.memory_space<vmem>>, vector<32x64xf32>
    tpu.vector_store %arg4[%c0_7, %c0_8], %10 {strides = array<i32>} : memref<32x64xf32, #tpu.memory_space<vmem>>, vector<32x64xf32>,
    return
  }
  func.func @transform_0(%arg0: i32) -> (i32, i32) {
    %c0_i32 = arith.constant 0 : i32
    %c0_i32_0 = arith.constant 0 : i32
    return %arg0, %c0_i32 : i32, i32
  }
  func.func @transform_1(%arg0: i32) -> (i32, i32) {
    %c0_i32 = arith.constant 0 : i32
    %c0_i32_0 = arith.constant 0 : i32
    %c0_i32_1 = arith.constant 0 : i32
    return %c0_i32, %c0_i32_0 : i32, i32
  }
  func.func @transform_2(%arg0: i32) -> (i32, i32) {
    %c0_i32 = arith.constant 0 : i32
    %c0_i32_0 = arith.constant 0 : i32
    %c0_i32_1 = arith.constant 0 : i32
    return %c0_i32, %c0_i32_0 : i32, i32
  }
  func.func @transform_3(%arg0: i32) -> (i32, i32) {
    %c0_i32 = arith.constant 0 : i32
    %c0_i32_0 = arith.constant 0 : i32
    return %arg0, %c0_i32 : i32, i32
  }
}

module attributes {stable_mosaic.version = 11 : i64} {
  func.func @_conv_mm_kernel(%arg0: i32, %arg1: memref<8x1024xbf16, #tpu.memory_space<vmem>>, %arg2: memref<1024x128xbf16, #tpu.memory_space<vmem>>, %arg3: memref<1x128xf32, #tpu.memory_space<vmem>>, %arg4: memref<8x128xf32, #tpu.memory_space<vmem>>) attributes {dimension_semantics = [#tpu.dimension_semantics<parallel>], iteration_bounds = array<i64: 1>, scalar_prefetch = 0 : i64, scratch_operands = 0 : i64, tpu.core_type = #tpu.core_type<tc>, window_params = [{transform_indices = @transform_0, window_bounds = array<i64: 8, 1024>}, {pipeline_mode = #tpu.pipeline_mode<synchronous>, transform_indices = @transform_1, window_bounds = array<i64: 1024, 128>}, {pipeline_mode = #tpu.pipeline_mode<synchronous>, transform_indices = @transform_2, window_bounds = array<i64: 1, 128>}, {transform_indices = @transform_3, window_bounds = array<i64: 8, 128>}]} {
    %c0 = arith.constant 0 : index
    %c0_0 = arith.constant 0 : index
    %0 = vector.load %arg1[%c0, %c0_0] : memref<8x1024xbf16, #tpu.memory_space<vmem>>, vector<8x1024xbf16>
    %c0_1 = arith.constant 0 : index
    %c0_2 = arith.constant 0 : index
    %1 = vector.load %arg2[%c0_1, %c0_2] : memref<1024x128xbf16, #tpu.memory_space<vmem>>, vector<1024x128xbf16>
    %cst = arith.constant dense<0.000000e+00> : vector<8x128xf32>
    %2 = tpu.matmul %0, %1, %cst {dimension_numbers = #tpu.dot_dimension_numbers<[1], [0], [0], [1], [0, 0, 1, 1], [], []>} : vector<8x1024xbf16>, vector<1024x128xbf16>, vector<8x128xf32> -> vector<8x128xf32>
    %c0_3 = arith.constant 0 : index
    %c0_4 = arith.constant 0 : index
    %3 = vector.load %arg3[%c0_3, %c0_4] : memref<1x128xf32, #tpu.memory_space<vmem>>, vector<1x128xf32>
    %4 = vector.broadcast %3 : vector<1x128xf32> to vector<8x128xf32>
    %5 = arith.addf %2, %4 : vector<8x128xf32>
    %cst_5 = arith.constant 0.000000e+00 : f32
    %6 = vector.broadcast %cst_5 : f32 to vector<8x128xf32>
    %7 = arith.cmpf oge, %5, %6 : vector<8x128xf32>
    %cst_6 = arith.constant 2.000000e-01 : f32
    %8 = vector.broadcast %cst_6 : f32 to vector<8x128xf32>
    %9 = arith.mulf %8, %5 : vector<8x128xf32>
    %10 = arith.select %7, %5, %9 : vector<8x128xi1>, vector<8x128xf32>
    %c0_7 = arith.constant 0 : index
    %c0_8 = arith.constant 0 : index
    %11 = vector.load %arg4[%c0_7, %c0_8] : memref<8x128xf32, #tpu.memory_space<vmem>>, vector<8x128xf32>
    tpu.vector_store %arg4[%c0_7, %c0_8], %10 {strides = array<i32>} : memref<8x128xf32, #tpu.memory_space<vmem>>, vector<8x128xf32>,
    return
  }
  func.func @transform_0(%arg0: i32) -> (i32, i32) {
    %c0_i32 = arith.constant 0 : i32
    %c0_i32_0 = arith.constant 0 : i32
    return %arg0, %c0_i32 : i32, i32
  }
  func.func @transform_1(%arg0: i32) -> (i32, i32) {
    %c0_i32 = arith.constant 0 : i32
    %c0_i32_0 = arith.constant 0 : i32
    %c0_i32_1 = arith.constant 0 : i32
    return %c0_i32, %c0_i32_0 : i32, i32
  }
  func.func @transform_2(%arg0: i32) -> (i32, i32) {
    %c0_i32 = arith.constant 0 : i32
    %c0_i32_0 = arith.constant 0 : i32
    %c0_i32_1 = arith.constant 0 : i32
    return %c0_i32, %c0_i32_0 : i32, i32
  }
  func.func @transform_3(%arg0: i32) -> (i32, i32) {
    %c0_i32 = arith.constant 0 : i32
    %c0_i32_0 = arith.constant 0 : i32
    return %arg0, %c0_i32 : i32, i32
  }
}

module attributes {stable_mosaic.version = 11 : i64} {
  func.func @_conv_mm_skip_kernel(%arg0: i32, %arg1: memref<32x1152xbf16, #tpu.memory_space<vmem>>, %arg2: memref<1152x64xbf16, #tpu.memory_space<vmem>>, %arg3: memref<1x64xf32, #tpu.memory_space<vmem>>, %arg4: memref<32x64xf32, #tpu.memory_space<vmem>>, %arg5: memref<32x64xf32, #tpu.memory_space<vmem>>) attributes {dimension_semantics = [#tpu.dimension_semantics<parallel>], iteration_bounds = array<i64: 1>, scalar_prefetch = 0 : i64, scratch_operands = 0 : i64, tpu.core_type = #tpu.core_type<tc>, window_params = [{transform_indices = @transform_0, window_bounds = array<i64: 32, 1152>}, {pipeline_mode = #tpu.pipeline_mode<synchronous>, transform_indices = @transform_1, window_bounds = array<i64: 1152, 64>}, {pipeline_mode = #tpu.pipeline_mode<synchronous>, transform_indices = @transform_2, window_bounds = array<i64: 1, 64>}, {transform_indices = @transform_3, window_bounds = array<i64: 32, 64>}, {transform_indices = @transform_4, window_bounds = array<i64: 32, 64>}]} {
    %c0 = arith.constant 0 : index
    %c0_0 = arith.constant 0 : index
    %0 = vector.load %arg1[%c0, %c0_0] : memref<32x1152xbf16, #tpu.memory_space<vmem>>, vector<32x1152xbf16>
    %c0_1 = arith.constant 0 : index
    %c0_2 = arith.constant 0 : index
    %1 = vector.load %arg2[%c0_1, %c0_2] : memref<1152x64xbf16, #tpu.memory_space<vmem>>, vector<1152x64xbf16>
    %cst = arith.constant dense<0.000000e+00> : vector<32x64xf32>
    %2 = tpu.matmul %0, %1, %cst {dimension_numbers = #tpu.dot_dimension_numbers<[1], [0], [0], [1], [0, 0, 1, 1], [], []>} : vector<32x1152xbf16>, vector<1152x64xbf16>, vector<32x64xf32> -> vector<32x64xf32>
    %c0_3 = arith.constant 0 : index
    %c0_4 = arith.constant 0 : index
    %3 = vector.load %arg3[%c0_3, %c0_4] : memref<1x64xf32, #tpu.memory_space<vmem>>, vector<1x64xf32>
    %4 = vector.broadcast %3 : vector<1x64xf32> to vector<32x64xf32>
    %5 = arith.addf %2, %4 : vector<32x64xf32>
    %cst_5 = arith.constant 0.000000e+00 : f32
    %6 = vector.broadcast %cst_5 : f32 to vector<32x64xf32>
    %7 = arith.cmpf oge, %5, %6 : vector<32x64xf32>
    %cst_6 = arith.constant 2.000000e-01 : f32
    %8 = vector.broadcast %cst_6 : f32 to vector<32x64xf32>
    %9 = arith.mulf %8, %5 : vector<32x64xf32>
    %10 = arith.select %7, %5, %9 : vector<32x64xi1>, vector<32x64xf32>
    %c0_7 = arith.constant 0 : index
    %c0_8 = arith.constant 0 : index
    %11 = vector.load %arg4[%c0_7, %c0_8] : memref<32x64xf32, #tpu.memory_space<vmem>>, vector<32x64xf32>
    %12 = arith.addf %10, %11 : vector<32x64xf32>
    %c0_9 = arith.constant 0 : index
    %c0_10 = arith.constant 0 : index
    %13 = vector.load %arg5[%c0_9, %c0_10] : memref<32x64xf32, #tpu.memory_space<vmem>>, vector<32x64xf32>
    tpu.vector_store %arg5[%c0_9, %c0_10], %12 {strides = array<i32>} : memref<32x64xf32, #tpu.memory_space<vmem>>, vector<32x64xf32>,
    return
  }
  func.func @transform_0(%arg0: i32) -> (i32, i32) {
    %c0_i32 = arith.constant 0 : i32
    %c0_i32_0 = arith.constant 0 : i32
    return %arg0, %c0_i32 : i32, i32
  }
  func.func @transform_1(%arg0: i32) -> (i32, i32) {
    %c0_i32 = arith.constant 0 : i32
    %c0_i32_0 = arith.constant 0 : i32
    %c0_i32_1 = arith.constant 0 : i32
    return %c0_i32, %c0_i32_0 : i32, i32
  }
  func.func @transform_2(%arg0: i32) -> (i32, i32) {
    %c0_i32 = arith.constant 0 : i32
    %c0_i32_0 = arith.constant 0 : i32
    %c0_i32_1 = arith.constant 0 : i32
    return %c0_i32, %c0_i32_0 : i32, i32
  }
  func.func @transform_3(%arg0: i32) -> (i32, i32) {
    %c0_i32 = arith.constant 0 : i32
    %c0_i32_0 = arith.constant 0 : i32
    return %arg0, %c0_i32 : i32, i32
  }
  func.func @transform_4(%arg0: i32) -> (i32, i32) {
    %c0_i32 = arith.constant 0 : i32
    %c0_i32_0 = arith.constant 0 : i32
    return %arg0, %c0_i32 : i32, i32
  }
}

module attributes {stable_mosaic.version = 11 : i64} {
  func.func @_conv_mm_skip_kernel(%arg0: i32, %arg1: memref<128x576xbf16, #tpu.memory_space<vmem>>, %arg2: memref<576x32xbf16, #tpu.memory_space<vmem>>, %arg3: memref<1x32xf32, #tpu.memory_space<vmem>>, %arg4: memref<128x32xf32, #tpu.memory_space<vmem>>, %arg5: memref<128x32xf32, #tpu.memory_space<vmem>>) attributes {dimension_semantics = [#tpu.dimension_semantics<parallel>], iteration_bounds = array<i64: 1>, scalar_prefetch = 0 : i64, scratch_operands = 0 : i64, tpu.core_type = #tpu.core_type<tc>, window_params = [{transform_indices = @transform_0, window_bounds = array<i64: 128, 576>}, {pipeline_mode = #tpu.pipeline_mode<synchronous>, transform_indices = @transform_1, window_bounds = array<i64: 576, 32>}, {pipeline_mode = #tpu.pipeline_mode<synchronous>, transform_indices = @transform_2, window_bounds = array<i64: 1, 32>}, {transform_indices = @transform_3, window_bounds = array<i64: 128, 32>}, {transform_indices = @transform_4, window_bounds = array<i64: 128, 32>}]} {
    %c0 = arith.constant 0 : index
    %c0_0 = arith.constant 0 : index
    %0 = vector.load %arg1[%c0, %c0_0] : memref<128x576xbf16, #tpu.memory_space<vmem>>, vector<128x576xbf16>
    %c0_1 = arith.constant 0 : index
    %c0_2 = arith.constant 0 : index
    %1 = vector.load %arg2[%c0_1, %c0_2] : memref<576x32xbf16, #tpu.memory_space<vmem>>, vector<576x32xbf16>
    %cst = arith.constant dense<0.000000e+00> : vector<128x32xf32>
    %2 = tpu.matmul %0, %1, %cst {dimension_numbers = #tpu.dot_dimension_numbers<[1], [0], [0], [1], [0, 0, 1, 1], [], []>} : vector<128x576xbf16>, vector<576x32xbf16>, vector<128x32xf32> -> vector<128x32xf32>
    %c0_3 = arith.constant 0 : index
    %c0_4 = arith.constant 0 : index
    %3 = vector.load %arg3[%c0_3, %c0_4] : memref<1x32xf32, #tpu.memory_space<vmem>>, vector<1x32xf32>
    %4 = vector.broadcast %3 : vector<1x32xf32> to vector<128x32xf32>
    %5 = arith.addf %2, %4 : vector<128x32xf32>
    %cst_5 = arith.constant 0.000000e+00 : f32
    %6 = vector.broadcast %cst_5 : f32 to vector<128x32xf32>
    %7 = arith.cmpf oge, %5, %6 : vector<128x32xf32>
    %cst_6 = arith.constant 2.000000e-01 : f32
    %8 = vector.broadcast %cst_6 : f32 to vector<128x32xf32>
    %9 = arith.mulf %8, %5 : vector<128x32xf32>
    %10 = arith.select %7, %5, %9 : vector<128x32xi1>, vector<128x32xf32>
    %c0_7 = arith.constant 0 : index
    %c0_8 = arith.constant 0 : index
    %11 = vector.load %arg4[%c0_7, %c0_8] : memref<128x32xf32, #tpu.memory_space<vmem>>, vector<128x32xf32>
    %12 = arith.addf %10, %11 : vector<128x32xf32>
    %c0_9 = arith.constant 0 : index
    %c0_10 = arith.constant 0 : index
    %13 = vector.load %arg5[%c0_9, %c0_10] : memref<128x32xf32, #tpu.memory_space<vmem>>, vector<128x32xf32>
    tpu.vector_store %arg5[%c0_9, %c0_10], %12 {strides = array<i32>} : memref<128x32xf32, #tpu.memory_space<vmem>>, vector<128x32xf32>,
    return
  }
  func.func @transform_0(%arg0: i32) -> (i32, i32) {
    %c0_i32 = arith.constant 0 : i32
    %c0_i32_0 = arith.constant 0 : i32
    return %arg0, %c0_i32 : i32, i32
  }
  func.func @transform_1(%arg0: i32) -> (i32, i32) {
    %c0_i32 = arith.constant 0 : i32
    %c0_i32_0 = arith.constant 0 : i32
    %c0_i32_1 = arith.constant 0 : i32
    return %c0_i32, %c0_i32_0 : i32, i32
  }
  func.func @transform_2(%arg0: i32) -> (i32, i32) {
    %c0_i32 = arith.constant 0 : i32
    %c0_i32_0 = arith.constant 0 : i32
    %c0_i32_1 = arith.constant 0 : i32
    return %c0_i32, %c0_i32_0 : i32, i32
  }
  func.func @transform_3(%arg0: i32) -> (i32, i32) {
    %c0_i32 = arith.constant 0 : i32
    %c0_i32_0 = arith.constant 0 : i32
    return %arg0, %c0_i32 : i32, i32
  }
  func.func @transform_4(%arg0: i32) -> (i32, i32) {
    %c0_i32 = arith.constant 0 : i32
    %c0_i32_0 = arith.constant 0 : i32
    return %arg0, %c0_i32 : i32, i32
  }
}

module attributes {stable_mosaic.version = 11 : i64} {
  func.func @_conv_mm_skip_kernel(%arg0: i32, %arg1: memref<256x288xbf16, #tpu.memory_space<vmem>>, %arg2: memref<288x16xbf16, #tpu.memory_space<vmem>>, %arg3: memref<1x16xf32, #tpu.memory_space<vmem>>, %arg4: memref<256x16xf32, #tpu.memory_space<vmem>>, %arg5: memref<256x16xf32, #tpu.memory_space<vmem>>) attributes {dimension_semantics = [#tpu.dimension_semantics<parallel>], iteration_bounds = array<i64: 2>, scalar_prefetch = 0 : i64, scratch_operands = 0 : i64, tpu.core_type = #tpu.core_type<tc>, window_params = [{transform_indices = @transform_0, window_bounds = array<i64: 256, 288>}, {pipeline_mode = #tpu.pipeline_mode<synchronous>, transform_indices = @transform_1, window_bounds = array<i64: 288, 16>}, {pipeline_mode = #tpu.pipeline_mode<synchronous>, transform_indices = @transform_2, window_bounds = array<i64: 1, 16>}, {transform_indices = @transform_3, window_bounds = array<i64: 256, 16>}, {transform_indices = @transform_4, window_bounds = array<i64: 256, 16>}]} {
    %c0 = arith.constant 0 : index
    %c0_0 = arith.constant 0 : index
    %0 = vector.load %arg1[%c0, %c0_0] : memref<256x288xbf16, #tpu.memory_space<vmem>>, vector<256x288xbf16>
    %c0_1 = arith.constant 0 : index
    %c0_2 = arith.constant 0 : index
    %1 = vector.load %arg2[%c0_1, %c0_2] : memref<288x16xbf16, #tpu.memory_space<vmem>>, vector<288x16xbf16>
    %cst = arith.constant dense<0.000000e+00> : vector<256x16xf32>
    %2 = tpu.matmul %0, %1, %cst {dimension_numbers = #tpu.dot_dimension_numbers<[1], [0], [0], [1], [0, 0, 1, 1], [], []>} : vector<256x288xbf16>, vector<288x16xbf16>, vector<256x16xf32> -> vector<256x16xf32>
    %c0_3 = arith.constant 0 : index
    %c0_4 = arith.constant 0 : index
    %3 = vector.load %arg3[%c0_3, %c0_4] : memref<1x16xf32, #tpu.memory_space<vmem>>, vector<1x16xf32>
    %4 = vector.broadcast %3 : vector<1x16xf32> to vector<256x16xf32>
    %5 = arith.addf %2, %4 : vector<256x16xf32>
    %cst_5 = arith.constant 0.000000e+00 : f32
    %6 = vector.broadcast %cst_5 : f32 to vector<256x16xf32>
    %7 = arith.cmpf oge, %5, %6 : vector<256x16xf32>
    %cst_6 = arith.constant 2.000000e-01 : f32
    %8 = vector.broadcast %cst_6 : f32 to vector<256x16xf32>
    %9 = arith.mulf %8, %5 : vector<256x16xf32>
    %10 = arith.select %7, %5, %9 : vector<256x16xi1>, vector<256x16xf32>
    %c0_7 = arith.constant 0 : index
    %c0_8 = arith.constant 0 : index
    %11 = vector.load %arg4[%c0_7, %c0_8] : memref<256x16xf32, #tpu.memory_space<vmem>>, vector<256x16xf32>
    %12 = arith.addf %10, %11 : vector<256x16xf32>
    %c0_9 = arith.constant 0 : index
    %c0_10 = arith.constant 0 : index
    %13 = vector.load %arg5[%c0_9, %c0_10] : memref<256x16xf32, #tpu.memory_space<vmem>>, vector<256x16xf32>
    tpu.vector_store %arg5[%c0_9, %c0_10], %12 {strides = array<i32>} : memref<256x16xf32, #tpu.memory_space<vmem>>, vector<256x16xf32>,
    return
  }
  func.func @transform_0(%arg0: i32) -> (i32, i32) {
    %c0_i32 = arith.constant 0 : i32
    %c0_i32_0 = arith.constant 0 : i32
    return %arg0, %c0_i32 : i32, i32
  }
  func.func @transform_1(%arg0: i32) -> (i32, i32) {
    %c0_i32 = arith.constant 0 : i32
    %c0_i32_0 = arith.constant 0 : i32
    %c0_i32_1 = arith.constant 0 : i32
    return %c0_i32, %c0_i32_0 : i32, i32
  }
  func.func @transform_2(%arg0: i32) -> (i32, i32) {
    %c0_i32 = arith.constant 0 : i32
    %c0_i32_0 = arith.constant 0 : i32
    %c0_i32_1 = arith.constant 0 : i32
    return %c0_i32, %c0_i32_0 : i32, i32
  }
  func.func @transform_3(%arg0: i32) -> (i32, i32) {
    %c0_i32 = arith.constant 0 : i32
    %c0_i32_0 = arith.constant 0 : i32
    return %arg0, %c0_i32 : i32, i32
  }
  func.func @transform_4(%arg0: i32) -> (i32, i32) {
    %c0_i32 = arith.constant 0 : i32
    %c0_i32_0 = arith.constant 0 : i32
    return %arg0, %c0_i32 : i32, i32
  }
}

module attributes {stable_mosaic.version = 11 : i64} {
  func.func @_conv_mm_kernel(%arg0: i32, %arg1: memref<256x144xbf16, #tpu.memory_space<vmem>>, %arg2: memref<144x16xbf16, #tpu.memory_space<vmem>>, %arg3: memref<1x16xf32, #tpu.memory_space<vmem>>, %arg4: memref<256x16xf32, #tpu.memory_space<vmem>>) attributes {dimension_semantics = [#tpu.dimension_semantics<parallel>], iteration_bounds = array<i64: 2>, scalar_prefetch = 0 : i64, scratch_operands = 0 : i64, tpu.core_type = #tpu.core_type<tc>, window_params = [{transform_indices = @transform_0, window_bounds = array<i64: 256, 144>}, {pipeline_mode = #tpu.pipeline_mode<synchronous>, transform_indices = @transform_1, window_bounds = array<i64: 144, 16>}, {pipeline_mode = #tpu.pipeline_mode<synchronous>, transform_indices = @transform_2, window_bounds = array<i64: 1, 16>}, {transform_indices = @transform_3, window_bounds = array<i64: 256, 16>}]} {
    %c0 = arith.constant 0 : index
    %c0_0 = arith.constant 0 : index
    %0 = vector.load %arg1[%c0, %c0_0] : memref<256x144xbf16, #tpu.memory_space<vmem>>, vector<256x144xbf16>
    %c0_1 = arith.constant 0 : index
    %c0_2 = arith.constant 0 : index
    %1 = vector.load %arg2[%c0_1, %c0_2] : memref<144x16xbf16, #tpu.memory_space<vmem>>, vector<144x16xbf16>
    %cst = arith.constant dense<0.000000e+00> : vector<256x16xf32>
    %2 = tpu.matmul %0, %1, %cst {dimension_numbers = #tpu.dot_dimension_numbers<[1], [0], [0], [1], [0, 0, 1, 1], [], []>} : vector<256x144xbf16>, vector<144x16xbf16>, vector<256x16xf32> -> vector<256x16xf32>
    %c0_3 = arith.constant 0 : index
    %c0_4 = arith.constant 0 : index
    %3 = vector.load %arg3[%c0_3, %c0_4] : memref<1x16xf32, #tpu.memory_space<vmem>>, vector<1x16xf32>
    %4 = vector.broadcast %3 : vector<1x16xf32> to vector<256x16xf32>
    %5 = arith.addf %2, %4 : vector<256x16xf32>
    %cst_5 = arith.constant 0.000000e+00 : f32
    %6 = vector.broadcast %cst_5 : f32 to vector<256x16xf32>
    %7 = arith.cmpf oge, %5, %6 : vector<256x16xf32>
    %cst_6 = arith.constant 2.000000e-01 : f32
    %8 = vector.broadcast %cst_6 : f32 to vector<256x16xf32>
    %9 = arith.mulf %8, %5 : vector<256x16xf32>
    %10 = arith.select %7, %5, %9 : vector<256x16xi1>, vector<256x16xf32>
    %c0_7 = arith.constant 0 : index
    %c0_8 = arith.constant 0 : index
    %11 = vector.load %arg4[%c0_7, %c0_8] : memref<256x16xf32, #tpu.memory_space<vmem>>, vector<256x16xf32>
    tpu.vector_store %arg4[%c0_7, %c0_8], %10 {strides = array<i32>} : memref<256x16xf32, #tpu.memory_space<vmem>>, vector<256x16xf32>,
    return
  }
  func.func @transform_0(%arg0: i32) -> (i32, i32) {
    %c0_i32 = arith.constant 0 : i32
    %c0_i32_0 = arith.constant 0 : i32
    return %arg0, %c0_i32 : i32, i32
  }
  func.func @transform_1(%arg0: i32) -> (i32, i32) {
    %c0_i32 = arith.constant 0 : i32
    %c0_i32_0 = arith.constant 0 : i32
    %c0_i32_1 = arith.constant 0 : i32
    return %c0_i32, %c0_i32_0 : i32, i32
  }
  func.func @transform_2(%arg0: i32) -> (i32, i32) {
    %c0_i32 = arith.constant 0 : i32
    %c0_i32_0 = arith.constant 0 : i32
    %c0_i32_1 = arith.constant 0 : i32
    return %c0_i32, %c0_i32_0 : i32, i32
  }
  func.func @transform_3(%arg0: i32) -> (i32, i32) {
    %c0_i32 = arith.constant 0 : i32
    %c0_i32_0 = arith.constant 0 : i32
    return %arg0, %c0_i32 : i32, i32
  }
}

module attributes {stable_mosaic.version = 11 : i64} {
  func.func @_conv_mm_kernel(%arg0: i32, %arg1: memref<256x144xbf16, #tpu.memory_space<vmem>>, %arg2: memref<144x8xbf16, #tpu.memory_space<vmem>>, %arg3: memref<1x8xf32, #tpu.memory_space<vmem>>, %arg4: memref<256x8xf32, #tpu.memory_space<vmem>>) attributes {dimension_semantics = [#tpu.dimension_semantics<parallel>], iteration_bounds = array<i64: 2>, scalar_prefetch = 0 : i64, scratch_operands = 0 : i64, tpu.core_type = #tpu.core_type<tc>, window_params = [{transform_indices = @transform_0, window_bounds = array<i64: 256, 144>}, {pipeline_mode = #tpu.pipeline_mode<synchronous>, transform_indices = @transform_1, window_bounds = array<i64: 144, 8>}, {pipeline_mode = #tpu.pipeline_mode<synchronous>, transform_indices = @transform_2, window_bounds = array<i64: 1, 8>}, {transform_indices = @transform_3, window_bounds = array<i64: 256, 8>}]} {
    %c0 = arith.constant 0 : index
    %c0_0 = arith.constant 0 : index
    %0 = vector.load %arg1[%c0, %c0_0] : memref<256x144xbf16, #tpu.memory_space<vmem>>, vector<256x144xbf16>
    %c0_1 = arith.constant 0 : index
    %c0_2 = arith.constant 0 : index
    %1 = vector.load %arg2[%c0_1, %c0_2] : memref<144x8xbf16, #tpu.memory_space<vmem>>, vector<144x8xbf16>
    %cst = arith.constant dense<0.000000e+00> : vector<256x8xf32>
    %2 = tpu.matmul %0, %1, %cst {dimension_numbers = #tpu.dot_dimension_numbers<[1], [0], [0], [1], [0, 0, 1, 1], [], []>} : vector<256x144xbf16>, vector<144x8xbf16>, vector<256x8xf32> -> vector<256x8xf32>
    %c0_3 = arith.constant 0 : index
    %c0_4 = arith.constant 0 : index
    %3 = vector.load %arg3[%c0_3, %c0_4] : memref<1x8xf32, #tpu.memory_space<vmem>>, vector<1x8xf32>
    %4 = vector.broadcast %3 : vector<1x8xf32> to vector<256x8xf32>
    %5 = arith.addf %2, %4 : vector<256x8xf32>
    %c0_5 = arith.constant 0 : index
    %c0_6 = arith.constant 0 : index
    %6 = vector.load %arg4[%c0_5, %c0_6] : memref<256x8xf32, #tpu.memory_space<vmem>>, vector<256x8xf32>
    tpu.vector_store %arg4[%c0_5, %c0_6], %5 {strides = array<i32>} : memref<256x8xf32, #tpu.memory_space<vmem>>, vector<256x8xf32>,
    return
  }
  func.func @transform_0(%arg0: i32) -> (i32, i32) {
    %c0_i32 = arith.constant 0 : i32
    %c0_i32_0 = arith.constant 0 : i32
    return %arg0, %c0_i32 : i32, i32
  }
  func.func @transform_1(%arg0: i32) -> (i32, i32) {
    %c0_i32 = arith.constant 0 : i32
    %c0_i32_0 = arith.constant 0 : i32
    %c0_i32_1 = arith.constant 0 : i32
    return %c0_i32, %c0_i32_0 : i32, i32
  }
  func.func @transform_2(%arg0: i32) -> (i32, i32) {
    %c0_i32 = arith.constant 0 : i32
    %c0_i32_0 = arith.constant 0 : i32
    %c0_i32_1 = arith.constant 0 : i32
    return %c0_i32, %c0_i32_0 : i32, i32
  }
  func.func @transform_3(%arg0: i32) -> (i32, i32) {
    %c0_i32 = arith.constant 0 : i32
    %c0_i32_0 = arith.constant 0 : i32
    return %arg0, %c0_i32 : i32, i32
  }
}

</mosaic_0001>

<bundles_post_ra>
// kernel: discriminator_forward.10
= control target key start
LH: loop header
LB: loop body
LE: loop exit
PB: predicated region body
PF: predicated region fallthrough
CT: control target
= control target key end

     0   :  { %s863_s12 = smov 0   ;;  %s1027_s0 = inlined_call_operand.vmem [shape: bf16[512,32], index: 0, kind: input, shape index: {}]   ;;  %s1028_s1 = inlined_call_operand.vmem [shape: bf16[32,16], index: 1, kind: input, shape index: {}]   ;;  %s1029_s2 = inlined_call_operand.vmem [shape: f32[1,16], index: 2, kind: input, shape index: {}]   ;;  %s1030_s3 = inlined_call_operand.vmem [shape: f32[512,16], index: 3, kind: output, shape index: {}]  }
   0x1 LB: > { %s705_s13 = sadd.s32 4294967295, %s841_s12   ;;  %p709_p0 = scmp.ge.s32.totalorder %s841_s12, 1  ;;  %s841_s12 = sphi %s863_s12, %s13_s12  }
   0x2   : > { %p138_p1 = scmp.lt.s32.totalorder %s841_s12, 3 }
   0x4   : > { %p139_p2 = pnand %p709_p0, %p138_p1 }
   0x5   : > { %v817_v0 = vld [vmem:[%s1028_s1] sm:$0xff] (!%p139_p2)   ;;  %s710_s16 = sshll.u32 (!%p139_p2), %s705_s13, 5  ;;  %v818_v1 = vld [vmem:[%s1028_s1 + $0x8] sm:$0xff] (!%p139_p2)   ;;  %vm310_vm0 = vcmask (!%p139_p2), 261120   ;;  %vm616_vm1 = vcmask (!%p139_p2), 130048  }
   0x6   : > { %142 = sbr.rel (%p139_p2) target bundleno = 267 (0x10b), region = 32  ;;  %p163_p3 = scmp.lt.s32.totalorder (!%p139_p2), %s710_s16, 63  ;;  %769 = vmatprep.subr.bf16.mxu0 (!%p139_p2), %v817_v0  ;;  %805 = vmatprep.subr.bf16.mxu1 (!%p139_p2), %v817_v0  ;;  %v920_v18 = vld [vmem:[%s1029_s2] ss:$0 sm:$0xff] (!%p139_p2) }
   0x7   : > { %770 = vmatpush3.bf16.msra.mxu0 (!%p139_p2), %v817_v0  ;;  %807 = vmatpush3.bf16.msra.mxu1 (!%p139_p2), %v817_v0 }
   0x8   : > { %771 = vmatprep.subr.bf16.mxu0 (!%p139_p2), %v818_v1  ;;  %806 = vmatprep.subr.bf16.mxu1 (!%p139_p2), %v818_v1 }
   0xb   : > { %772 = vmatpush3.bf16.msra.mxu0 (!%p139_p2), %v818_v1  ;;  %808 = vmatpush3.bf16.msra.mxu1 (!%p139_p2), %v818_v1 }
   0xd   : > { %s1032_s16 = smov (!%p163_p3, %s710_s16), 63 }
   0xe   : > { %s711_s19 = sshll.u32 %s1032_s16, 2  ;;  %s713_s25 = sshll.u32 %s1032_s16, 3 }
   0xf   : > { %s883_s22 = scalar_lea.vmem %s1027_s0, %s711_s19  ;;  %s929_s28 = scalar_lea.vmem %s1030_s3, %s713_s25 }
  0x10   : > { %v819_v2 = vld [vmem:[%s883_s22] sm:$0xff]   ;;  %v821_v4 = vld [vmem:[%s883_s22 + $0x8] sm:$0xff]   ;;  %v823_v6 = vld [vmem:[%s883_s22 + $0x10] sm:$0xff]  }
  0x11   : > { %v820_v3 = vld [vmem:[%s883_s22 + $0x40] sm:$0xff]   ;;  %773 = vmatprep.mubr.msk.bf16.mxu0 %vm310_vm0, %v819_v2  ;;  %v822_v5 = vld [vmem:[%s883_s22 + $0x48] sm:$0xff]   ;;  %v824_v7 = vld [vmem:[%s883_s22 + $0x50] sm:$0xff]  }
  0x12   : > { %789 = vmatprep.mubr.msk.bf16.mxu1 %vm310_vm0, %v820_v3  ;;  %774 = vmatmul.mubr.msk.bf16.vlgmr.msra.gmra.mrb[0].mxu0 %vm310_vm0, %v821_v4  ;;  %v825_v8 = vld [vmem:[%s883_s22 + $0x18] sm:$0xff]   ;;  %v827_v10 = vld [vmem:[%s883_s22 + $0x20] sm:$0xff]   ;;  %v829_v12 = vld [vmem:[%s883_s22 + $0x28] sm:$0xff]  }
  0x13   : > { %790 = vmatmul.mubr.msk.bf16.vlgmr.msra.gmra.mrb[0].mxu1 %vm310_vm0, %v822_v5  ;;  %777 = vmatprep.mubr.msk.bf16.mxu0 %vm310_vm0, %v823_v6  ;;  %v826_v9 = vld [vmem:[%s883_s22 + $0x58] sm:$0xff]   ;;  %v828_v11 = vld [vmem:[%s883_s22 + $0x60] sm:$0xff]   ;;  %v830_v13 = vld [vmem:[%s883_s22 + $0x68] sm:$0xff]  }
  0x14   : > { %793 = vmatprep.mubr.msk.bf16.mxu1 %vm310_vm0, %v824_v7  ;;  %v831_v14 = vld [vmem:[%s883_s22 + $0x30] sm:$0xff]   ;;  %v833_v16 = vld [vmem:[%s883_s22 + $0x38] sm:$0xff]  }
  0x15   : > { %v832_v15 = vld [vmem:[%s883_s22 + $0x70] sm:$0xff]   ;;  %v834_v17 = vld [vmem:[%s883_s22 + $0x78] sm:$0xff]  }
  0x1a   : > { %778 = vmatmul.mubr.msk.bf16.gmra.mrb[4].mxu0 %vm310_vm0, %v825_v8 }
  0x1b   : > { %794 = vmatmul.mubr.msk.bf16.gmra.mrb[4].mxu1 %vm310_vm0, %v826_v9  ;;  %781 = vmatprep.mubr.msk.bf16.mxu0 %vm310_vm0, %v827_v10 }
  0x1c   : > { %797 = vmatprep.mubr.msk.bf16.mxu1 %vm310_vm0, %v828_v11 }
  0x22   : > { %782 = vmatmul.mubr.msk.bf16.gmra.mrb[8].mxu0 %vm310_vm0, %v829_v12 }
  0x23   : > { %798 = vmatmul.mubr.msk.bf16.gmra.mrb[8].mxu1 %vm310_vm0, %v830_v13  ;;  %785 = vmatprep.mubr.msk.bf16.mxu0 %vm310_vm0, %v831_v14 }
  0x24   : > { %801 = vmatprep.mubr.msk.bf16.mxu1 %vm310_vm0, %v832_v15 }
  0x2a   : > { %786 = vmatmul.mubr.msk.bf16.gmra.mrb[12].mxu0 %vm310_vm0, %v833_v16 }
  0x2b   : > { %802 = vmatmul.mubr.msk.bf16.gmra.mrb[12].mxu1 %vm310_vm0, %v834_v17 }
  0xe5   : > { %v775_v19 = vpop.f32.mrb[0].mxu0 }
  0xe6   : > { %v402_v20 = vadd.f32 %v775_v19, %v920_v18  ;;  %v791_v21 = vpop.f32.mrb[0].mxu1  ;;  %v393_v22 = vpop.f32.mrb[1].mxu0 }
  0xe7   : > { %v466_v23 = vadd.f32 %v791_v21, %v920_v18  ;;  %v394_v24 = vadd.f32 %v920_v18, %v393_v22  ;;  %v457_v25 = vpop.f32.mrb[1].mxu1  ;;  %v776_v26 = vpop.f32.mrb[2].mxu0 }
  0xe8   : > { %vm522_vm2 = vcmp.ge.f32.partialorder %v402_v20, 0.0  ;;  %v554_v27 = vmul.f32 0.2, %v402_v20  ;;  %v458_v28 = vadd.f32 %v920_v18, %v457_v25  ;;  %v405_v29 = vadd.f32 %v776_v26, %v920_v18  ;;  %v792_v30 = vpop.f32.mrb[2].mxu1  ;;  %v396_v31 = vpop.f32.mrb[3].mxu0 }
  0xe9   : > { %vm538_vm3 = vcmp.ge.f32.partialorder %v466_v23, 0.0  ;;  %v570_v32 = vmul.f32 0.2, %v466_v23  ;;  %vm520_vm4 = vcmp.ge.f32.partialorder %v394_v24, 0.0  ;;  %v552_v33 = vmul.f32 0.2, %v394_v24 }
  0xea   : > { %v586_v34 = vsel %vm522_vm2, %v402_v20, %v554_v27  ;;  %vm536_vm5 = vcmp.ge.f32.partialorder %v458_v28, 0.0  ;;  %v568_v35 = vmul.f32 0.2, %v458_v28  ;;  %vm523_vm6 = vcmp.ge.f32.partialorder %v405_v29, 0.0  ;;  %v460_v36 = vpop.f32.mrb[3].mxu1 }
  0xeb   : > { %619 = vst.msk [vmem:[%s929_s28 + $0x10] sm:$0xff] %vm616_vm1, %v586_v34  ;;  %v602_v37 = vsel %vm538_vm3, %v466_v23, %v570_v32  ;;  %v584_v38 = vsel %vm520_vm4, %v394_v24, %v552_v33  ;;  %v555_v39 = vmul.f32 0.2, %v405_v29  ;;  %v469_v40 = vadd.f32 %v792_v30, %v920_v18 }
  0xec   : > { %635 = vst.msk [vmem:[%s929_s28 + $0x90] sm:$0xff] %vm616_vm1, %v602_v37  ;;  %617 = vst.msk [vmem:[%s929_s28] sm:$0xff] %vm616_vm1, %v584_v38  ;;  %v600_v41 = vsel %vm536_vm5, %v458_v28, %v568_v35  ;;  %v397_v42 = vadd.f32 %v920_v18, %v396_v31  ;;  %v461_v43 = vadd.f32 %v920_v18, %v460_v36 }
  0xed   : > { %633 = vst.msk [vmem:[%s929_s28 + $0x80] sm:$0xff] %vm616_vm1, %v600_v41  ;;  %v587_v44 = vsel %vm523_vm6, %v405_v29, %v555_v39  ;;  %vm539_vm7 = vcmp.ge.f32.partialorder %v469_v40, 0.0  ;;  %v571_v45 = vmul.f32 0.2, %v469_v40  ;;  %v779_v46 = vpop.f32.mrb[4].mxu0 }
  0xee   : > { %620 = vst.msk [vmem:[%s929_s28 + $0x18] sm:$0xff] %vm616_vm1, %v587_v44  ;;  %vm521_vm8 = vcmp.ge.f32.partialorder %v397_v42, 0.0  ;;  %v553_v47 = vmul.f32 0.2, %v397_v42  ;;  %vm537_vm9 = vcmp.ge.f32.partialorder %v461_v43, 0.0  ;;  %v418_v50 = vadd.f32 %v779_v46, %v920_v18  ;;  %v795_v51 = vpop.f32.mrb[4].mxu1 }
  0xef   : > { %v569_v48 = vmul.f32 0.2, %v461_v43  ;;  %v603_v49 = vsel %vm539_vm7, %v469_v40, %v571_v45  ;;  %v409_v52 = vpop.f32.mrb[5].mxu0  ;;  %v482_v55 = vadd.f32 %v795_v51, %v920_v18  ;;  %v473_v57 = vpop.f32.mrb[5].mxu1 }
  0xf0   : > { %636 = vst.msk [vmem:[%s929_s28 + $0x98] sm:$0xff] %vm616_vm1, %v603_v49  ;;  %v585_v53 = vsel %vm521_vm8, %v397_v42, %v553_v47  ;;  %v410_v56 = vadd.f32 %v920_v18, %v409_v52  ;;  %v780_v58 = vpop.f32.mrb[6].mxu0  ;;  %vm526_vm10 = vcmp.ge.f32.partialorder %v418_v50, 0.0  ;;  %v558_v59 = vmul.f32 0.2, %v418_v50  ;;  %v796_v62 = vpop.f32.mrb[6].mxu1 }
  0xf1   : > { %v601_v54 = vsel %vm537_vm9, %v461_v43, %v569_v48  ;;  %618 = vst.msk [vmem:[%s929_s28 + $0x8] sm:$0xff] %vm616_vm1, %v585_v53  ;;  %v474_v60 = vadd.f32 %v920_v18, %v473_v57  ;;  %v421_v61 = vadd.f32 %v780_v58, %v920_v18  ;;  %v412_v63 = vpop.f32.mrb[7].mxu0  ;;  %vm542_vm11 = vcmp.ge.f32.partialorder %v482_v55, 0.0  ;;  %v476_v4 = vpop.f32.mrb[7].mxu1 }
  0xf2   : > { %634 = vst.msk [vmem:[%s929_s28 + $0x88] sm:$0xff] %vm616_vm1, %v601_v54  ;;  %v574_v0 = vmul.f32 0.2, %v482_v55  ;;  %vm524_vm12 = vcmp.ge.f32.partialorder %v410_v56, 0.0  ;;  %v556_v1 = vmul.f32 0.2, %v410_v56  ;;  %v590_v2 = vsel %vm526_vm10, %v418_v50, %v558_v59 }
  0xf3   : > { %vm540_vm13 = vcmp.ge.f32.partialorder %v474_v60, 0.0  ;;  %v572_v3 = vmul.f32 0.2, %v474_v60  ;;  %vm527_vm14 = vcmp.ge.f32.partialorder %v421_v61, 0.0  ;;  %623 = vst.msk [vmem:[%s929_s28 + $0x30] sm:$0xff] %vm616_vm1, %v590_v2  ;;  %v485_v8 = vadd.f32 %v796_v62, %v920_v18 }
  0xf4   : > { %v606_v5 = vsel %vm542_vm11, %v482_v55, %v574_v0  ;;  %v588_v6 = vsel %vm524_vm12, %v410_v56, %v556_v1  ;;  %v559_v7 = vmul.f32 0.2, %v421_v61  ;;  %v413_v10 = vadd.f32 %v920_v18, %v412_v63 }
  0xf5   : > { %639 = vst.msk [vmem:[%s929_s28 + $0xb0] sm:$0xff] %vm616_vm1, %v606_v5  ;;  %621 = vst.msk [vmem:[%s929_s28 + $0x20] sm:$0xff] %vm616_vm1, %v588_v6  ;;  %v604_v9 = vsel %vm540_vm13, %v474_v60, %v572_v3  ;;  %v477_v11 = vadd.f32 %v920_v18, %v476_v4  ;;  %v783_v12 = vpop.f32.mrb[8].mxu0  ;;  %vm543_vm15 = vcmp.ge.f32.partialorder %v485_v8, 0.0  ;;  %v575_v14 = vmul.f32 0.2, %v485_v8 }
  0xf6   : > { %637 = vst.msk [vmem:[%s929_s28 + $0xa0] sm:$0xff] %vm616_vm1, %v604_v9  ;;  %v591_v13 = vsel %vm527_vm14, %v421_v61, %v559_v7  ;;  %v434_v15 = vadd.f32 %v783_v12, %v920_v18  ;;  %v799_v16 = vpop.f32.mrb[8].mxu1  ;;  %v425_v17 = vpop.f32.mrb[9].mxu0  ;;  %vm525_vm0 = vcmp.ge.f32.partialorder %v413_v10, 0.0  ;;  %v557_v19 = vmul.f32 0.2, %v413_v10 }
  0xf7   : > { %624 = vst.msk [vmem:[%s929_s28 + $0x38] sm:$0xff] %vm616_vm1, %v591_v13  ;;  %vm541_vm2 = vcmp.ge.f32.partialorder %v477_v11, 0.0  ;;  %v573_v20 = vmul.f32 0.2, %v477_v11  ;;  %v607_v21 = vsel %vm543_vm15, %v485_v8, %v575_v14  ;;  %v498_v23 = vadd.f32 %v799_v16, %v920_v18  ;;  %v489_v24 = vpop.f32.mrb[9].mxu1  ;;  %v784_v25 = vpop.f32.mrb[10].mxu0 }
  0xf8   : > { %vm530_vm3 = vcmp.ge.f32.partialorder %v434_v15, 0.0  ;;  %v562_v22 = vmul.f32 0.2, %v434_v15  ;;  %640 = vst.msk [vmem:[%s929_s28 + $0xb8] sm:$0xff] %vm616_vm1, %v607_v21  ;;  %v589_v26 = vsel %vm525_vm0, %v413_v10, %v557_v19  ;;  %v426_v28 = vadd.f32 %v920_v18, %v425_v17  ;;  %v800_v30 = vpop.f32.mrb[10].mxu1  ;;  %v428_v31 = vpop.f32.mrb[11].mxu0 }
  0xf9   : > { %v605_v27 = vsel %vm541_vm2, %v477_v11, %v573_v20  ;;  %v490_v29 = vadd.f32 %v920_v18, %v489_v24  ;;  %622 = vst.msk [vmem:[%s929_s28 + $0x28] sm:$0xff] %vm616_vm1, %v589_v26  ;;  %vm546_vm4 = vcmp.ge.f32.partialorder %v498_v23, 0.0  ;;  %v578_v33 = vmul.f32 0.2, %v498_v23  ;;  %v492_v35 = vpop.f32.mrb[11].mxu1 }
  0xfa   : > { %638 = vst.msk [vmem:[%s929_s28 + $0xa8] sm:$0xff] %vm616_vm1, %v605_v27  ;;  %v594_v32 = vsel %vm530_vm3, %v434_v15, %v562_v22  ;;  %v437_v34 = vadd.f32 %v784_v25, %v920_v18  ;;  %vm528_vm5 = vcmp.ge.f32.partialorder %v426_v28, 0.0  ;;  %v560_v36 = vmul.f32 0.2, %v426_v28 }
  0xfb   : > { %627 = vst.msk [vmem:[%s929_s28 + $0x50] sm:$0xff] %vm616_vm1, %v594_v32  ;;  %vm544_vm6 = vcmp.ge.f32.partialorder %v490_v29, 0.0  ;;  %v576_v37 = vmul.f32 0.2, %v490_v29  ;;  %v610_v38 = vsel %vm546_vm4, %v498_v23, %v578_v33  ;;  %v501_v40 = vadd.f32 %v800_v30, %v920_v18 }
  0xfc   : > { %vm531_vm7 = vcmp.ge.f32.partialorder %v437_v34, 0.0  ;;  %v563_v39 = vmul.f32 0.2, %v437_v34  ;;  %643 = vst.msk [vmem:[%s929_s28 + $0xd0] sm:$0xff] %vm616_vm1, %v610_v38  ;;  %v592_v41 = vsel %vm528_vm5, %v426_v28, %v560_v36  ;;  %v429_v43 = vadd.f32 %v920_v18, %v428_v31 }
  0xfd   : > { %v608_v42 = vsel %vm544_vm6, %v490_v29, %v576_v37  ;;  %v493_v44 = vadd.f32 %v920_v18, %v492_v35  ;;  %v787_v45 = vpop.f32.mrb[12].mxu0  ;;  %625 = vst.msk [vmem:[%s929_s28 + $0x40] sm:$0xff] %vm616_vm1, %v592_v41  ;;  %vm547_vm8 = vcmp.ge.f32.partialorder %v501_v40, 0.0  ;;  %v579_v47 = vmul.f32 0.2, %v501_v40 }
  0xfe   : > { %641 = vst.msk [vmem:[%s929_s28 + $0xc0] sm:$0xff] %vm616_vm1, %v608_v42  ;;  %v595_v46 = vsel %vm531_vm7, %v437_v34, %v563_v39  ;;  %v450_v48 = vadd.f32 %v787_v45, %v920_v18  ;;  %v803_v49 = vpop.f32.mrb[12].mxu1  ;;  %v441_v50 = vpop.f32.mrb[13].mxu0  ;;  %vm529_vm9 = vcmp.ge.f32.partialorder %v429_v43, 0.0  ;;  %v561_v51 = vmul.f32 0.2, %v429_v43 }
  0xff   : > { %628 = vst.msk [vmem:[%s929_s28 + $0x58] sm:$0xff] %vm616_vm1, %v595_v46  ;;  %vm545_vm10 = vcmp.ge.f32.partialorder %v493_v44, 0.0  ;;  %v577_v52 = vmul.f32 0.2, %v493_v44  ;;  %v611_v53 = vsel %vm547_vm8, %v501_v40, %v579_v47  ;;  %v514_v55 = vadd.f32 %v803_v49, %v920_v18  ;;  %v505_v56 = vpop.f32.mrb[13].mxu1  ;;  %v788_v57 = vpop.f32.mrb[14].mxu0 }
 0x100   : > { %vm534_vm11 = vcmp.ge.f32.partialorder %v450_v48, 0.0  ;;  %v566_v54 = vmul.f32 0.2, %v450_v48  ;;  %644 = vst.msk [vmem:[%s929_s28 + $0xd8] sm:$0xff] %vm616_vm1, %v611_v53  ;;  %v593_v58 = vsel %vm529_vm9, %v429_v43, %v561_v51  ;;  %v442_v60 = vadd.f32 %v920_v18, %v441_v50  ;;  %v804_v62 = vpop.f32.mrb[14].mxu1  ;;  %v444_v63 = vpop.f32.mrb[15].mxu0 }
 0x101   : > { %v609_v59 = vsel %vm545_vm10, %v493_v44, %v577_v52  ;;  %v506_v61 = vadd.f32 %v920_v18, %v505_v56  ;;  %626 = vst.msk [vmem:[%s929_s28 + $0x48] sm:$0xff] %vm616_vm1, %v593_v58  ;;  %vm550_vm12 = vcmp.ge.f32.partialorder %v514_v55, 0.0  ;;  %v582_v1 = vmul.f32 0.2, %v514_v55  ;;  %v508_v3 = vpop.f32.mrb[15].mxu1 }
 0x102   : > { %642 = vst.msk [vmem:[%s929_s28 + $0xc8] sm:$0xff] %vm616_vm1, %v609_v59  ;;  %v598_v0 = vsel %vm534_vm11, %v450_v48, %v566_v54  ;;  %v453_v2 = vadd.f32 %v788_v57, %v920_v18  ;;  %vm532_vm13 = vcmp.ge.f32.partialorder %v442_v60, 0.0  ;;  %v564_v4 = vmul.f32 0.2, %v442_v60 }
 0x103   : > { %631 = vst.msk [vmem:[%s929_s28 + $0x70] sm:$0xff] %vm616_vm1, %v598_v0  ;;  %vm548_vm14 = vcmp.ge.f32.partialorder %v506_v61, 0.0  ;;  %v580_v5 = vmul.f32 0.2, %v506_v61  ;;  %v614_v6 = vsel %vm550_vm12, %v514_v55, %v582_v1  ;;  %v517_v8 = vadd.f32 %v804_v62, %v920_v18 }
 0x104   : > { %vm535_vm15 = vcmp.ge.f32.partialorder %v453_v2, 0.0  ;;  %v567_v7 = vmul.f32 0.2, %v453_v2  ;;  %647 = vst.msk [vmem:[%s929_s28 + $0xf0] sm:$0xff] %vm616_vm1, %v614_v6  ;;  %v596_v9 = vsel %vm532_vm13, %v442_v60, %v564_v4  ;;  %v445_v11 = vadd.f32 %v920_v18, %v444_v63 }
 0x105   : > { %v612_v10 = vsel %vm548_vm14, %v506_v61, %v580_v5  ;;  %v509_v12 = vadd.f32 %v920_v18, %v508_v3  ;;  %629 = vst.msk [vmem:[%s929_s28 + $0x60] sm:$0xff] %vm616_vm1, %v596_v9  ;;  %vm551_vm0 = vcmp.ge.f32.partialorder %v517_v8, 0.0  ;;  %v583_v14 = vmul.f32 0.2, %v517_v8 }
 0x106   : > { %645 = vst.msk [vmem:[%s929_s28 + $0xe0] sm:$0xff] %vm616_vm1, %v612_v10  ;;  %v599_v13 = vsel %vm535_vm15, %v453_v2, %v567_v7  ;;  %vm533_vm2 = vcmp.ge.f32.partialorder %v445_v11, 0.0  ;;  %v565_v15 = vmul.f32 0.2, %v445_v11 }
 0x107   : > { %632 = vst.msk [vmem:[%s929_s28 + $0x78] sm:$0xff] %vm616_vm1, %v599_v13  ;;  %vm549_vm3 = vcmp.ge.f32.partialorder %v509_v12, 0.0  ;;  %v581_v16 = vmul.f32 0.2, %v509_v12  ;;  %v615_v17 = vsel %vm551_vm0, %v517_v8, %v583_v14 }
 0x108   : > { %648 = vst.msk [vmem:[%s929_s28 + $0xf8] sm:$0xff] %vm616_vm1, %v615_v17  ;;  %v597_v19 = vsel %vm533_vm2, %v445_v11, %v565_v15 }
 0x109   : > { %v613_v20 = vsel %vm549_vm3, %v509_v12, %v581_v16  ;;  %630 = vst.msk [vmem:[%s929_s28 + $0x68] sm:$0xff] %vm616_vm1, %v597_v19 }
 0x10a   : > { %646 = vst.msk [vmem:[%s929_s28 + $0xe8] sm:$0xff] %vm616_vm1, %v613_v20 }
 0x10b PF: > { %s13_s12 = sadd.s32 1, %s841_s12  }
 0x10c   : > { %p10_p4 = scmp.ge.s32.totalorder %s13_s12, 4  }
 0x10e   :  { %12 = sbr.rel (!%p10_p4) target bundleno = 1 (0x1), region = 62 }

// kernel: discriminator_forward.11
= control target key start
LH: loop header
LB: loop body
LE: loop exit
PB: predicated region body
PF: predicated region fallthrough
CT: control target
= control target key end

     0   :  { %vm391_vm0 = vcmask 261120   ;;  %s766_s1 = inlined_call_operand.vmem [shape: bf16[256,32], index: 1, kind: input, shape index: {}]   ;;  %s767_s0 = inlined_call_operand.vmem [shape: bf16[128,256], index: 0, kind: input, shape index: {}]   ;;  %s768_s2 = inlined_call_operand.vmem [shape: f32[1,32], index: 2, kind: input, shape index: {}]   ;;  %s769_s3 = inlined_call_operand.vmem [shape: f32[128,32], index: 3, kind: output, shape index: {}]  }
   0x1   :  { %v525_v0 = vld [vmem:[%s766_s1 + $0x40] sm:$0xff]   ;;  %v527_v2 = vld [vmem:[%s766_s1 + $0x48] sm:$0xff]   ;;  %v529_v4 = vld [vmem:[%s766_s1 + $0x50] sm:$0xff]  }
   0x2   :  { %v526_v1 = vld [vmem:[%s766_s1] sm:$0xff]   ;;  %445 = vmatprep.subr.bf16.mxu0 %v525_v0  ;;  %509 = vmatprep.subr.bf16.mxu1 %v525_v0  ;;  %v528_v3 = vld [vmem:[%s766_s1 + $0x8] sm:$0xff]   ;;  %v530_v5 = vld [vmem:[%s766_s1 + $0x10] sm:$0xff]  }
   0x3   :  { %446 = vmatpush3.bf16.msra.mxu0 %v526_v1  ;;  %517 = vmatpush3.bf16.msra.mxu1 %v526_v1  ;;  %v531_v6 = vld [vmem:[%s766_s1 + $0x58] sm:$0xff]   ;;  %v533_v8 = vld [vmem:[%s766_s1 + $0x60] sm:$0xff]   ;;  %v535_v10 = vld [vmem:[%s766_s1 + $0x68] sm:$0xff]  }
   0x4   :  { %447 = vmatprep.subr.bf16.mxu0 %v527_v2  ;;  %510 = vmatprep.subr.bf16.mxu1 %v527_v2  ;;  %v532_v7 = vld [vmem:[%s766_s1 + $0x18] sm:$0xff]   ;;  %v534_v9 = vld [vmem:[%s766_s1 + $0x20] sm:$0xff]   ;;  %v536_v13 = vld [vmem:[%s766_s1 + $0x28] sm:$0xff]  }
   0x5   :  { %v543_v11 = vld [vmem:[%s767_s0 + $0x4] ss:$8 sps:$4 sm:$0xff]   ;;  %v537_v14 = vld [vmem:[%s766_s1 + $0x70] sm:$0xff]   ;;  %v539_v16 = vld [vmem:[%s766_s1 + $0x78] sm:$0xff]  }
   0x6   :  { %v546_v12 = vld [vmem:[%s767_s0 + $0x44] ss:$8 sps:$4 sm:$0xff]   ;;  %278 = vmatprep.mubr.bf16.mxu0 %v543_v11  ;;  %v538_v15 = vld [vmem:[%s766_s1 + $0x30] sm:$0xff]   ;;  %v540_v17 = vld [vmem:[%s766_s1 + $0x38] sm:$0xff]  }
   0x7   :  { %448 = vmatpush3.bf16.msra.mxu0 %v528_v3  ;;  %518 = vmatpush3.bf16.msra.mxu1 %v528_v3  ;;  %v541_v18 = vld [vmem:[%s767_s0] ss:$8 sps:$4 sm:$0xff]   ;;  %v547_v20 = vld [vmem:[%s767_s0 + $0x14] ss:$8 sps:$4 sm:$0xff]   ;;  %v551_v22 = vld [vmem:[%s767_s0 + $0x10] ss:$8 sps:$4 sm:$0xff]  }
   0x8   :  { %449 = vmatprep.subr.bf16.mxu0 %v529_v4  ;;  %511 = vmatprep.subr.bf16.mxu1 %v529_v4  ;;  %v544_v19 = vld [vmem:[%s767_s0 + $0x40] ss:$8 sps:$4 sm:$0xff]   ;;  %v549_v21 = vld [vmem:[%s767_s0 + $0x54] ss:$8 sps:$4 sm:$0xff]   ;;  %v552_v23 = vld [vmem:[%s767_s0 + $0x50] ss:$8 sps:$4 sm:$0xff]  }
   0x9   :  { %310 = vmatprep.mubr.bf16.mxu1 %v546_v12  ;;  %v553_v24 = vld [vmem:[%s767_s0 + $0x24] ss:$8 sps:$4 sm:$0xff]   ;;  %v557_v26 = vld [vmem:[%s767_s0 + $0x20] ss:$8 sps:$4 sm:$0xff]   ;;  %v559_v28 = vld [vmem:[%s767_s0 + $0x34] ss:$8 sps:$4 sm:$0xff]  }
   0xa   :  { %v555_v25 = vld [vmem:[%s767_s0 + $0x64] ss:$8 sps:$4 sm:$0xff]   ;;  %v558_v27 = vld [vmem:[%s767_s0 + $0x60] ss:$8 sps:$4 sm:$0xff]   ;;  %v561_v29 = vld [vmem:[%s767_s0 + $0x74] ss:$8 sps:$4 sm:$0xff]  }
   0xb   :  { %450 = vmatpush3.bf16.msra.mxu0 %v530_v5  ;;  %519 = vmatpush3.bf16.msra.mxu1 %v530_v5  ;;  %v563_v30 = vld [vmem:[%s767_s0 + $0x30] ss:$8 sps:$4 sm:$0xff]   ;;  %v684_v34 = vld [vmem:[%s768_s2] ss:$0 sm:$0xff] }
   0xc   :  { %451 = vmatprep.subr.bf16.mxu0 %v531_v6  ;;  %512 = vmatprep.subr.bf16.mxu1 %v531_v6  ;;  %v564_v31 = vld [vmem:[%s767_s0 + $0x70] ss:$8 sps:$4 sm:$0xff]  }
   0xf   :  { %452 = vmatpush3.bf16.msra.mxu0 %v532_v7  ;;  %520 = vmatpush3.bf16.msra.mxu1 %v532_v7 }
  0x10   :  { %453 = vmatprep.subr.bf16.mxu0 %v533_v8  ;;  %513 = vmatprep.subr.bf16.mxu1 %v533_v8 }
  0x13   :  { %454 = vmatpush3.bf16.msra.mxu0 %v534_v9  ;;  %521 = vmatpush3.bf16.msra.mxu1 %v534_v9 }
  0x14   :  { %455 = vmatprep.subr.bf16.mxu0 %v535_v10  ;;  %514 = vmatprep.subr.bf16.mxu1 %v535_v10 }
  0x17   :  { %456 = vmatpush3.bf16.msra.mxu0 %v536_v13  ;;  %522 = vmatpush3.bf16.msra.mxu1 %v536_v13 }
  0x18   :  { %457 = vmatprep.subr.bf16.mxu0 %v537_v14  ;;  %515 = vmatprep.subr.bf16.mxu1 %v537_v14 }
  0x1b   :  { %458 = vmatpush3.bf16.msra.mxu0 %v538_v15  ;;  %523 = vmatpush3.bf16.msra.mxu1 %v538_v15 }
  0x1c   :  { %459 = vmatprep.subr.bf16.mxu0 %v539_v16  ;;  %516 = vmatprep.subr.bf16.mxu1 %v539_v16 }
  0x1f   :  { %460 = vmatpush3.bf16.msra.mxu0 %v540_v17  ;;  %524 = vmatpush3.bf16.msra.mxu1 %v540_v17 }
  0x22   :  { %279 = vmatmul.mubr.bf16.vlgmr.msra.gmra.mrb[0].mxu0 %v541_v18  ;;  %311 = vmatmul.mubr.bf16.vlgmr.msra.gmra.mrb[0].mxu1 %v544_v19 }
  0x23   :  { %286 = vmatprep.mubr.bf16.mxu0 %v547_v20  ;;  %318 = vmatprep.mubr.bf16.mxu1 %v549_v21 }
  0x2a   :  { %287 = vmatmul.mubr.bf16.gmra.mrb[4].mxu0 %v551_v22  ;;  %319 = vmatmul.mubr.bf16.gmra.mrb[4].mxu1 %v552_v23 }
  0x2b   :  { %294 = vmatprep.mubr.bf16.mxu0 %v553_v24  ;;  %326 = vmatprep.mubr.bf16.mxu1 %v555_v25 }
  0x32   :  { %295 = vmatmul.mubr.bf16.gmra.mrb[8].mxu0 %v557_v26  ;;  %327 = vmatmul.mubr.bf16.gmra.mrb[8].mxu1 %v558_v27 }
  0x33   :  { %302 = vmatprep.mubr.bf16.mxu0 %v559_v28  ;;  %334 = vmatprep.mubr.bf16.mxu1 %v561_v29 }
  0x3a   :  { %303 = vmatmul.mubr.bf16.gmra.mrb[12].mxu0 %v563_v30  ;;  %335 = vmatmul.mubr.bf16.gmra.mrb[12].mxu1 %v564_v31 }
  0xf5   :  { %v461_v32 = vpop.f32.mrb[0].mxu0  ;;  %v485_v33 = vpop.f32.mrb[0].mxu1 }
  0xf6   :  { %v462_v35 = vpop.f32.mrb[1].mxu0  ;;  %v486_v36 = vpop.f32.mrb[1].mxu1 }
  0xf7   :  { %v463_v37 = vadd.f32 %v462_v35, %v461_v32  ;;  %v487_v38 = vadd.f32 %v486_v36, %v485_v33  ;;  %v464_v39 = vpop.f32.mrb[2].mxu0  ;;  %v488_v40 = vpop.f32.mrb[2].mxu1 }
  0xf8   :  { %v465_v41 = vpop.f32.mrb[3].mxu0  ;;  %v489_v42 = vpop.f32.mrb[3].mxu1 }
  0xf9   :  { %v281_v43 = vadd.f32 %v463_v37, %v684_v34  ;;  %v313_v44 = vadd.f32 %v487_v38, %v684_v34  ;;  %v466_v45 = vadd.f32 %v465_v41, %v464_v39  ;;  %v490_v46 = vadd.f32 %v489_v42, %v488_v40 }
  0xfb   :  { %vm343_vm1 = vcmp.ge.f32.partialorder %v281_v43, 0.0  ;;  %v359_v47 = vmul.f32 0.2, %v281_v43  ;;  %vm351_vm2 = vcmp.ge.f32.partialorder %v313_v44, 0.0  ;;  %v367_v48 = vmul.f32 0.2, %v313_v44 }
  0xfc   :  { %v284_v49 = vadd.f32 %v466_v45, %v684_v34  ;;  %v316_v50 = vadd.f32 %v490_v46, %v684_v34 }
  0xfd   :  { %v375_v51 = vsel %vm343_vm1, %v281_v43, %v359_v47  ;;  %v383_v52 = vsel %vm351_vm2, %v313_v44, %v367_v48  ;;  %v467_v53 = vpop.f32.mrb[4].mxu0  ;;  %v491_v54 = vpop.f32.mrb[4].mxu1 }
  0xfe   :  { %392 = vst.msk [vmem:[%s769_s3] sm:$0xff] %vm391_vm0, %v375_v51  ;;  %400 = vst.msk [vmem:[%s769_s3 + $0x40] sm:$0xff] %vm391_vm0, %v383_v52  ;;  %vm344_vm3 = vcmp.ge.f32.partialorder %v284_v49, 0.0  ;;  %v360_v55 = vmul.f32 0.2, %v284_v49  ;;  %vm352_vm4 = vcmp.ge.f32.partialorder %v316_v50, 0.0 }
  0xff   :  { %v368_v56 = vmul.f32 0.2, %v316_v50  ;;  %v468_v57 = vpop.f32.mrb[5].mxu0  ;;  %v492_v58 = vpop.f32.mrb[5].mxu1 }
 0x100   :  { %v376_v59 = vsel %vm344_vm3, %v284_v49, %v360_v55  ;;  %v469_v61 = vadd.f32 %v468_v57, %v467_v53  ;;  %v493_v62 = vadd.f32 %v492_v58, %v491_v54  ;;  %v470_v63 = vpop.f32.mrb[6].mxu0  ;;  %v494_v0 = vpop.f32.mrb[6].mxu1 }
 0x101   :  { %v384_v60 = vsel %vm352_vm4, %v316_v50, %v368_v56  ;;  %393 = vst.msk [vmem:[%s769_s3 + $0x8] sm:$0xff] %vm391_vm0, %v376_v59  ;;  %v471_v1 = vpop.f32.mrb[7].mxu0  ;;  %v495_v2 = vpop.f32.mrb[7].mxu1 }
 0x102   :  { %401 = vst.msk [vmem:[%s769_s3 + $0x48] sm:$0xff] %vm391_vm0, %v384_v60  ;;  %v289_v3 = vadd.f32 %v469_v61, %v684_v34  ;;  %v321_v4 = vadd.f32 %v493_v62, %v684_v34  ;;  %v472_v5 = vadd.f32 %v471_v1, %v470_v63  ;;  %v496_v6 = vadd.f32 %v495_v2, %v494_v0 }
 0x104   :  { %vm345_vm5 = vcmp.ge.f32.partialorder %v289_v3, 0.0  ;;  %v361_v7 = vmul.f32 0.2, %v289_v3  ;;  %vm353_vm6 = vcmp.ge.f32.partialorder %v321_v4, 0.0  ;;  %v369_v8 = vmul.f32 0.2, %v321_v4 }
 0x105   :  { %v292_v9 = vadd.f32 %v472_v5, %v684_v34  ;;  %v324_v10 = vadd.f32 %v496_v6, %v684_v34  ;;  %v473_v11 = vpop.f32.mrb[8].mxu0  ;;  %v497_v12 = vpop.f32.mrb[8].mxu1 }
 0x106   :  { %v377_v13 = vsel %vm345_vm5, %v289_v3, %v361_v7  ;;  %v385_v14 = vsel %vm353_vm6, %v321_v4, %v369_v8  ;;  %v474_v15 = vpop.f32.mrb[9].mxu0  ;;  %v498_v16 = vpop.f32.mrb[9].mxu1 }
 0x107   :  { %394 = vst.msk [vmem:[%s769_s3 + $0x10] sm:$0xff] %vm391_vm0, %v377_v13  ;;  %402 = vst.msk [vmem:[%s769_s3 + $0x50] sm:$0xff] %vm391_vm0, %v385_v14  ;;  %vm346_vm7 = vcmp.ge.f32.partialorder %v292_v9, 0.0  ;;  %v362_v17 = vmul.f32 0.2, %v292_v9  ;;  %vm354_vm8 = vcmp.ge.f32.partialorder %v324_v10, 0.0  ;;  %v475_v19 = vadd.f32 %v474_v15, %v473_v11 }
 0x108   :  { %v370_v18 = vmul.f32 0.2, %v324_v10  ;;  %v499_v20 = vadd.f32 %v498_v16, %v497_v12  ;;  %v476_v21 = vpop.f32.mrb[10].mxu0  ;;  %v500_v22 = vpop.f32.mrb[10].mxu1 }
 0x109   :  { %v378_v23 = vsel %vm346_vm7, %v292_v9, %v362_v17  ;;  %v477_v25 = vpop.f32.mrb[11].mxu0  ;;  %v501_v26 = vpop.f32.mrb[11].mxu1  ;;  %v297_v27 = vadd.f32 %v475_v19, %v684_v34 }
 0x10a   :  { %v386_v24 = vsel %vm354_vm8, %v324_v10, %v370_v18  ;;  %395 = vst.msk [vmem:[%s769_s3 + $0x18] sm:$0xff] %vm391_vm0, %v378_v23  ;;  %v329_v28 = vadd.f32 %v499_v20, %v684_v34  ;;  %v478_v29 = vadd.f32 %v477_v25, %v476_v21  ;;  %v502_v30 = vadd.f32 %v501_v26, %v500_v22 }
 0x10b   :  { %403 = vst.msk [vmem:[%s769_s3 + $0x58] sm:$0xff] %vm391_vm0, %v386_v24  ;;  %vm347_vm9 = vcmp.ge.f32.partialorder %v297_v27, 0.0  ;;  %v363_v31 = vmul.f32 0.2, %v297_v27 }
 0x10c   :  { %vm355_vm10 = vcmp.ge.f32.partialorder %v329_v28, 0.0  ;;  %v371_v32 = vmul.f32 0.2, %v329_v28  ;;  %v300_v33 = vadd.f32 %v478_v29, %v684_v34  ;;  %v332_v35 = vadd.f32 %v502_v30, %v684_v34 }
 0x10d   :  { %v479_v36 = vpop.f32.mrb[12].mxu0  ;;  %v503_v37 = vpop.f32.mrb[12].mxu1  ;;  %v379_v38 = vsel %vm347_vm9, %v297_v27, %v363_v31 }
 0x10e   :  { %v387_v39 = vsel %vm355_vm10, %v329_v28, %v371_v32  ;;  %v480_v40 = vpop.f32.mrb[13].mxu0  ;;  %v504_v41 = vpop.f32.mrb[13].mxu1  ;;  %396 = vst.msk [vmem:[%s769_s3 + $0x20] sm:$0xff] %vm391_vm0, %v379_v38  ;;  %vm348_vm11 = vcmp.ge.f32.partialorder %v300_v33, 0.0  ;;  %v364_v42 = vmul.f32 0.2, %v300_v33 }
 0x10f   :  { %404 = vst.msk [vmem:[%s769_s3 + $0x60] sm:$0xff] %vm391_vm0, %v387_v39  ;;  %vm356_vm12 = vcmp.ge.f32.partialorder %v332_v35, 0.0  ;;  %v372_v43 = vmul.f32 0.2, %v332_v35  ;;  %v481_v44 = vadd.f32 %v480_v40, %v479_v36  ;;  %v505_v45 = vadd.f32 %v504_v41, %v503_v37  ;;  %v482_v46 = vpop.f32.mrb[14].mxu0  ;;  %v506_v47 = vpop.f32.mrb[14].mxu1 }
 0x110   :  { %v380_v48 = vsel %vm348_vm11, %v300_v33, %v364_v42  ;;  %v483_v50 = vpop.f32.mrb[15].mxu0  ;;  %v507_v51 = vpop.f32.mrb[15].mxu1 }
 0x111   :  { %v388_v49 = vsel %vm356_vm12, %v332_v35, %v372_v43  ;;  %397 = vst.msk [vmem:[%s769_s3 + $0x28] sm:$0xff] %vm391_vm0, %v380_v48  ;;  %v305_v52 = vadd.f32 %v481_v44, %v684_v34  ;;  %v337_v53 = vadd.f32 %v505_v45, %v684_v34  ;;  %v484_v54 = vadd.f32 %v483_v50, %v482_v46 }
 0x112   :  { %405 = vst.msk [vmem:[%s769_s3 + $0x68] sm:$0xff] %vm391_vm0, %v388_v49  ;;  %v508_v55 = vadd.f32 %v507_v51, %v506_v47 }
 0x113   :  { %vm349_vm13 = vcmp.ge.f32.partialorder %v305_v52, 0.0  ;;  %v365_v56 = vmul.f32 0.2, %v305_v52  ;;  %vm357_vm14 = vcmp.ge.f32.partialorder %v337_v53, 0.0  ;;  %v373_v57 = vmul.f32 0.2, %v337_v53 }
 0x114   :  { %v308_v58 = vadd.f32 %v484_v54, %v684_v34  ;;  %v340_v59 = vadd.f32 %v508_v55, %v684_v34 }
 0x115   :  { %v381_v60 = vsel %vm349_vm13, %v305_v52, %v365_v56  ;;  %v389_v61 = vsel %vm357_vm14, %v337_v53, %v373_v57 }
 0x116   :  { %398 = vst.msk [vmem:[%s769_s3 + $0x30] sm:$0xff] %vm391_vm0, %v381_v60  ;;  %406 = vst.msk [vmem:[%s769_s3 + $0x70] sm:$0xff] %vm391_vm0, %v389_v61  ;;  %vm350_vm15 = vcmp.ge.f32.partialorder %v308_v58, 0.0  ;;  %v366_v62 = vmul.f32 0.2, %v308_v58  ;;  %vm358_vm1 = vcmp.ge.f32.partialorder %v340_v59, 0.0 }
 0x117   :  { %v374_v63 = vmul.f32 0.2, %v340_v59 }
 0x118   :  { %v382_v0 = vsel %vm350_vm15, %v308_v58, %v366_v62 }
 0x119   :  { %v390_v1 = vsel %vm358_vm1, %v340_v59, %v374_v63  ;;  %399 = vst.msk [vmem:[%s769_s3 + $0x38] sm:$0xff] %vm391_vm0, %v382_v0 }
 0x11a   :  { %407 = vst.msk [vmem:[%s769_s3 + $0x78] sm:$0xff] %vm391_vm0, %v390_v1 }

// kernel: discriminator_forward.12
= control target key start
LH: loop header
LB: loop body
LE: loop exit
PB: predicated region body
PF: predicated region fallthrough
CT: control target
= control target key end

     0   :  { %vm436_vm1 = vcmask 523264   ;;  %s745_s1 = inlined_call_operand.vmem [shape: bf16[512,64], index: 1, kind: input, shape index: {}]   ;;  %s746_s0 = inlined_call_operand.vmem [shape: bf16[32,512], index: 0, kind: input, shape index: {}]   ;;  %s747_s2 = inlined_call_operand.vmem [shape: f32[1,64], index: 2, kind: input, shape index: {}]   ;;  %s748_s3 = inlined_call_operand.vmem [shape: f32[32,64], index: 3, kind: output, shape index: {}]  }
   0x1   :  { %v542_v0 = vld [vmem:[%s745_s1 + $0x40] sm:$0xff]   ;;  %v546_v4 = vld [vmem:[%s745_s1 + $0x48] sm:$0xff]   ;;  %v550_v8 = vld [vmem:[%s745_s1 + $0x50] sm:$0xff]  }
   0x2   :  { %v543_v1 = vld [vmem:[%s745_s1 + $0xc0] sm:$0xff]   ;;  %486 = vmatprep.subr.bf16.mxu0 %v542_v0  ;;  %v547_v5 = vld [vmem:[%s745_s1 + $0xc8] sm:$0xff]   ;;  %v551_v9 = vld [vmem:[%s745_s1 + $0xd0] sm:$0xff]  }
   0x3   :  { %v544_v2 = vld [vmem:[%s745_s1] sm:$0xff]   ;;  %514 = vmatprep.subr.bf16.mxu1 %v543_v1  ;;  %v548_v6 = vld [vmem:[%s745_s1 + $0x8] sm:$0xff]   ;;  %v552_v10 = vld [vmem:[%s745_s1 + $0x10] sm:$0xff]  }
   0x4   :  { %v545_v3 = vld [vmem:[%s745_s1 + $0x80] sm:$0xff]   ;;  %487 = vmatpush3.bf16.msra.mxu0 %v544_v2  ;;  %v549_v7 = vld [vmem:[%s745_s1 + $0x88] sm:$0xff]   ;;  %v553_v11 = vld [vmem:[%s745_s1 + $0x90] sm:$0xff]  }
   0x5   :  { %515 = vmatpush3.bf16.msra.mxu1 %v545_v3  ;;  %488 = vmatprep.subr.bf16.mxu0 %v546_v4  ;;  %v554_v12 = vld [vmem:[%s745_s1 + $0x58] sm:$0xff]   ;;  %v558_v16 = vld [vmem:[%s745_s1 + $0x60] sm:$0xff]   ;;  %v562_v20 = vld [vmem:[%s745_s1 + $0x68] sm:$0xff]  }
   0x6   :  { %516 = vmatprep.subr.bf16.mxu1 %v547_v5  ;;  %v555_v13 = vld [vmem:[%s745_s1 + $0xd8] sm:$0xff]   ;;  %v559_v17 = vld [vmem:[%s745_s1 + $0xe0] sm:$0xff]   ;;  %v563_v21 = vld [vmem:[%s745_s1 + $0xe8] sm:$0xff]  }
   0x7   :  { %v556_v14 = vld [vmem:[%s745_s1 + $0x18] sm:$0xff]   ;;  %v560_v18 = vld [vmem:[%s745_s1 + $0x20] sm:$0xff]   ;;  %v564_v22 = vld [vmem:[%s745_s1 + $0x28] sm:$0xff]  }
   0x8   :  { %489 = vmatpush3.bf16.msra.mxu0 %v548_v6  ;;  %v557_v15 = vld [vmem:[%s745_s1 + $0x98] sm:$0xff]   ;;  %v561_v19 = vld [vmem:[%s745_s1 + $0xa0] sm:$0xff]   ;;  %v565_v23 = vld [vmem:[%s745_s1 + $0xa8] sm:$0xff]  }
   0x9   :  { %517 = vmatpush3.bf16.msra.mxu1 %v549_v7  ;;  %490 = vmatprep.subr.bf16.mxu0 %v550_v8  ;;  %v566_v24 = vld [vmem:[%s745_s1 + $0x70] sm:$0xff]   ;;  %v570_v28 = vld [vmem:[%s745_s1 + $0x78] sm:$0xff]   ;;  %v445_v42 = vld [vmem:[%s747_s2] ss:$0 sm:$0xff] }
   0xa   :  { %518 = vmatprep.subr.bf16.mxu1 %v551_v9  ;;  %v567_v25 = vld [vmem:[%s745_s1 + $0xf0] sm:$0xff]   ;;  %v571_v29 = vld [vmem:[%s745_s1 + $0xf8] sm:$0xff]  }
   0xb   :  { %v568_v26 = vld [vmem:[%s745_s1 + $0x30] sm:$0xff]   ;;  %v572_v30 = vld [vmem:[%s745_s1 + $0x38] sm:$0xff]  }
   0xc   :  { %491 = vmatpush3.bf16.msra.mxu0 %v552_v10  ;;  %v569_v27 = vld [vmem:[%s745_s1 + $0xb0] sm:$0xff]   ;;  %v573_v31 = vld [vmem:[%s745_s1 + $0xb8] sm:$0xff]  }
   0xd   :  { %519 = vmatpush3.bf16.msra.mxu1 %v553_v11  ;;  %492 = vmatprep.subr.bf16.mxu0 %v554_v12  ;;  %v574_v32 = vld [vmem:[%s746_s0] ss:$16 sps:$4 sm:$0xff]   ;;  %v576_v33 = vld [vmem:[%s746_s0 + $0x4] ss:$16 sps:$4 sm:$0xff]   ;;  %v577_v34 = vld [vmem:[%s746_s0 + $0x8] ss:$16 sps:$4 sm:$0xff]  }
   0xe   :  { %520 = vmatprep.subr.bf16.mxu1 %v555_v13  ;;  %v579_v35 = vld [vmem:[%s746_s0 + $0xc] ss:$16 sps:$4 sm:$0xff]   ;;  %358 = vmatprep.mubr.bf16.mxu0 %v576_v33  ;;  %v580_v36 = vld [vmem:[%s746_s0 + $0x24] ss:$16 sps:$4 sm:$0xff]   ;;  %v584_v38 = vld [vmem:[%s746_s0 + $0x20] ss:$16 sps:$4 sm:$0xff]  }
   0xf   :  { %407 = vmatprep.mubr.bf16.mxu1 %v579_v35  ;;  %v582_v37 = vld [vmem:[%s746_s0 + $0x2c] ss:$16 sps:$4 sm:$0xff]   ;;  %v585_v39 = vld [vmem:[%s746_s0 + $0x28] ss:$16 sps:$4 sm:$0xff]  }
  0x10   :  { %493 = vmatpush3.bf16.msra.mxu0 %v556_v14 }
  0x11   :  { %521 = vmatpush3.bf16.msra.mxu1 %v557_v15  ;;  %494 = vmatprep.subr.bf16.mxu0 %v558_v16 }
  0x12   :  { %522 = vmatprep.subr.bf16.mxu1 %v559_v17 }
  0x14   :  { %495 = vmatpush3.bf16.msra.mxu0 %v560_v18 }
  0x15   :  { %523 = vmatpush3.bf16.msra.mxu1 %v561_v19  ;;  %496 = vmatprep.subr.bf16.mxu0 %v562_v20 }
  0x16   :  { %524 = vmatprep.subr.bf16.mxu1 %v563_v21 }
  0x18   :  { %497 = vmatpush3.bf16.msra.mxu0 %v564_v22 }
  0x19   :  { %525 = vmatpush3.bf16.msra.mxu1 %v565_v23  ;;  %498 = vmatprep.subr.bf16.mxu0 %v566_v24 }
  0x1a   :  { %526 = vmatprep.subr.bf16.mxu1 %v567_v25 }
  0x1c   :  { %499 = vmatpush3.bf16.msra.mxu0 %v568_v26 }
  0x1d   :  { %527 = vmatpush3.bf16.msra.mxu1 %v569_v27  ;;  %500 = vmatprep.subr.bf16.mxu0 %v570_v28 }
  0x1e   :  { %528 = vmatprep.subr.bf16.mxu1 %v571_v29 }
  0x20   :  { %501 = vmatpush3.bf16.msra.mxu0 %v572_v30 }
  0x21   :  { %529 = vmatpush3.bf16.msra.mxu1 %v573_v31 }
  0x23   :  { %359 = vmatmul.mubr.bf16.vlgmr.msra.gmra.mrb[0].mxu0 %v574_v32 }
  0x24   :  { %408 = vmatmul.mubr.bf16.vlgmr.msra.gmra.mrb[0].mxu1 %v577_v34  ;;  %366 = vmatprep.mubr.bf16.mxu0 %v580_v36 }
  0x25   :  { %415 = vmatprep.mubr.bf16.mxu1 %v582_v37 }
  0x2b   :  { %367 = vmatmul.mubr.bf16.gmra.mrb[4].mxu0 %v584_v38 }
  0x2c   :  { %416 = vmatmul.mubr.bf16.gmra.mrb[4].mxu1 %v585_v39 }
  0xf6   :  { %v502_v40 = vpop.f32.mrb[0].mxu0 }
  0xf7   :  { %v530_v41 = vpop.f32.mrb[0].mxu1  ;;  %v503_v43 = vpop.f32.mrb[1].mxu0 }
  0xf8   :  { %v504_v44 = vadd.f32 %v503_v43, %v502_v40  ;;  %v531_v45 = vpop.f32.mrb[1].mxu1  ;;  %v505_v46 = vpop.f32.mrb[2].mxu0 }
  0xf9   :  { %v532_v47 = vadd.f32 %v531_v45, %v530_v41  ;;  %v533_v48 = vpop.f32.mrb[2].mxu1  ;;  %v506_v49 = vpop.f32.mrb[3].mxu0 }
  0xfa   :  { %v361_v50 = vadd.f32 %v504_v44, %v445_v42  ;;  %v507_v51 = vadd.f32 %v506_v49, %v505_v46  ;;  %v534_v52 = vpop.f32.mrb[3].mxu1 }
  0xfb   :  { %v535_v53 = vadd.f32 %v534_v52, %v533_v48 }
  0xfc   :  { %v410_v54 = vadd.f32 %v532_v47, %v361_v50  ;;  %v364_v55 = vadd.f32 %v507_v51, %v445_v42 }
  0xfe   :  { %vm424_vm0 = vcmp.ge.f32.partialorder %v410_v54, 0.0  ;;  %v428_v56 = vmul.f32 0.2, %v410_v54  ;;  %v413_v57 = vadd.f32 %v535_v53, %v364_v55  ;;  %v508_v58 = vpop.f32.mrb[4].mxu0 }
  0xff   :  { %v536_v59 = vpop.f32.mrb[4].mxu1  ;;  %v509_v60 = vpop.f32.mrb[5].mxu0 }
 0x100   :  { %v432_v61 = vsel %vm424_vm0, %v410_v54, %v428_v56  ;;  %vm425_vm2 = vcmp.ge.f32.partialorder %v413_v57, 0.0  ;;  %v429_v62 = vmul.f32 0.2, %v413_v57  ;;  %v510_v63 = vadd.f32 %v509_v60, %v508_v58  ;;  %v537_v0 = vpop.f32.mrb[5].mxu1  ;;  %v511_v1 = vpop.f32.mrb[6].mxu0 }
 0x101   :  { %437 = vst.msk [vmem:[%s748_s3] sm:$0xff] %vm436_vm1, %v432_v61  ;;  %v538_v2 = vadd.f32 %v537_v0, %v536_v59  ;;  %v539_v3 = vpop.f32.mrb[6].mxu1  ;;  %v512_v4 = vpop.f32.mrb[7].mxu0 }
 0x102   :  { %v433_v5 = vsel %vm425_vm2, %v413_v57, %v429_v62  ;;  %v369_v6 = vadd.f32 %v510_v63, %v445_v42  ;;  %v513_v7 = vadd.f32 %v512_v4, %v511_v1  ;;  %v540_v8 = vpop.f32.mrb[7].mxu1 }
 0x103   :  { %438 = vst.msk [vmem:[%s748_s3 + $0x8] sm:$0xff] %vm436_vm1, %v433_v5  ;;  %v541_v9 = vadd.f32 %v540_v8, %v539_v3 }
 0x104   :  { %v418_v10 = vadd.f32 %v538_v2, %v369_v6  ;;  %v372_v11 = vadd.f32 %v513_v7, %v445_v42 }
 0x106   :  { %vm426_vm3 = vcmp.ge.f32.partialorder %v418_v10, 0.0  ;;  %v430_v12 = vmul.f32 0.2, %v418_v10  ;;  %v421_v13 = vadd.f32 %v541_v9, %v372_v11 }
 0x108   :  { %v434_v14 = vsel %vm426_vm3, %v418_v10, %v430_v12  ;;  %vm427_vm4 = vcmp.ge.f32.partialorder %v421_v13, 0.0  ;;  %v431_v15 = vmul.f32 0.2, %v421_v13 }
 0x109   :  { %439 = vst.msk [vmem:[%s748_s3 + $0x10] sm:$0xff] %vm436_vm1, %v434_v14 }
 0x10a   :  { %v435_v16 = vsel %vm427_vm4, %v421_v13, %v431_v15 }
 0x10b   :  { %440 = vst.msk [vmem:[%s748_s3 + $0x18] sm:$0xff] %vm436_vm1, %v435_v16 }

// kernel: discriminator_forward.13
= control target key start
LH: loop header
LB: loop body
LE: loop exit
PB: predicated region body
PF: predicated region fallthrough
CT: control target
= control target key end

     0   :  { %s1197_s1 = inlined_call_operand.vmem [shape: bf16[1024,128], index: 1, kind: input, shape index: {}]   ;;  %s1198_s0 = inlined_call_operand.vmem [shape: bf16[8,1024], index: 0, kind: input, shape index: {}]   ;;  %s1199_s2 = inlined_call_operand.vmem [shape: f32[1,128], index: 2, kind: input, shape index: {}]   ;;  %s1200_s3 = inlined_call_operand.vmem [shape: f32[8,128], index: 3, kind: output, shape index: {}]  }
   0x1   :  { %v895_v0 = vld [vmem:[%s1197_s1 + $0x40] sm:$0xff]   ;;  %v899_v4 = vld [vmem:[%s1197_s1 + $0x48] sm:$0xff]   ;;  %v903_v8 = vld [vmem:[%s1197_s1 + $0x50] sm:$0xff]  }
   0x2   :  { %v896_v1 = vld [vmem:[%s1197_s1 + $0xc0] sm:$0xff]   ;;  %807 = vmatprep.subr.bf16.mxu0 %v895_v0  ;;  %v900_v5 = vld [vmem:[%s1197_s1 + $0xc8] sm:$0xff]   ;;  %v904_v9 = vld [vmem:[%s1197_s1 + $0xd0] sm:$0xff]  }
   0x3   :  { %v897_v2 = vld [vmem:[%s1197_s1] sm:$0xff]   ;;  %829 = vmatprep.subr.bf16.mxu1 %v896_v1  ;;  %v901_v6 = vld [vmem:[%s1197_s1 + $0x8] sm:$0xff]   ;;  %v905_v10 = vld [vmem:[%s1197_s1 + $0x10] sm:$0xff]  }
   0x4   :  { %v898_v3 = vld [vmem:[%s1197_s1 + $0x80] sm:$0xff]   ;;  %808 = vmatpush3.bf16.msra.mxu0 %v897_v2  ;;  %v902_v7 = vld [vmem:[%s1197_s1 + $0x88] sm:$0xff]   ;;  %v906_v11 = vld [vmem:[%s1197_s1 + $0x90] sm:$0xff]  }
   0x5   :  { %830 = vmatpush3.bf16.msra.mxu1 %v898_v3  ;;  %809 = vmatprep.subr.bf16.mxu0 %v899_v4  ;;  %v907_v12 = vld [vmem:[%s1197_s1 + $0x58] sm:$0xff]   ;;  %v911_v16 = vld [vmem:[%s1197_s1 + $0x60] sm:$0xff]   ;;  %v915_v20 = vld [vmem:[%s1197_s1 + $0x68] sm:$0xff]  }
   0x6   :  { %831 = vmatprep.subr.bf16.mxu1 %v900_v5  ;;  %v908_v13 = vld [vmem:[%s1197_s1 + $0xd8] sm:$0xff]   ;;  %v912_v17 = vld [vmem:[%s1197_s1 + $0xe0] sm:$0xff]   ;;  %v916_v21 = vld [vmem:[%s1197_s1 + $0xe8] sm:$0xff]  }
   0x7   :  { %v909_v14 = vld [vmem:[%s1197_s1 + $0x18] sm:$0xff]   ;;  %v913_v18 = vld [vmem:[%s1197_s1 + $0x20] sm:$0xff]   ;;  %v917_v22 = vld [vmem:[%s1197_s1 + $0x28] sm:$0xff]  }
   0x8   :  { %810 = vmatpush3.bf16.msra.mxu0 %v901_v6  ;;  %v910_v15 = vld [vmem:[%s1197_s1 + $0x98] sm:$0xff]   ;;  %v914_v19 = vld [vmem:[%s1197_s1 + $0xa0] sm:$0xff]   ;;  %v918_v23 = vld [vmem:[%s1197_s1 + $0xa8] sm:$0xff]  }
   0x9   :  { %832 = vmatpush3.bf16.msra.mxu1 %v902_v7  ;;  %811 = vmatprep.subr.bf16.mxu0 %v903_v8  ;;  %v919_v24 = vld [vmem:[%s1197_s1 + $0x70] sm:$0xff]   ;;  %v923_v28 = vld [vmem:[%s1197_s1 + $0x78] sm:$0xff]   ;;  %v15_v32 = vld [vmem:[%s1198_s0] sm:$0xff] }
   0xa   :  { %833 = vmatprep.subr.bf16.mxu1 %v904_v9  ;;  %v920_v25 = vld [vmem:[%s1197_s1 + $0xf0] sm:$0xff]   ;;  %v924_v29 = vld [vmem:[%s1197_s1 + $0xf8] sm:$0xff]   ;;  %v16_v33 = vld [vmem:[%s1198_s0 + $0x8] sm:$0xff]  ;;  %v735_v34 = vcombine.low %v15_v32, %v15_v32  ;;  %v736_v35 = vcombine.high %v15_v32, %v15_v32 }
   0xb   :  { %v921_v26 = vld [vmem:[%s1197_s1 + $0x30] sm:$0xff]   ;;  %v925_v30 = vld [vmem:[%s1197_s1 + $0x38] sm:$0xff]   ;;  %v737_v36 = vcombine.low %v16_v33, %v16_v33  ;;  %v738_v37 = vcombine.high %v16_v33, %v16_v33  ;;  %v931_v38 = vld [vmem:[%s1197_s1 + $0x140] sm:$0xff]  }
   0xc   :  { %812 = vmatpush3.bf16.msra.mxu0 %v905_v10  ;;  %v922_v27 = vld [vmem:[%s1197_s1 + $0xb0] sm:$0xff]   ;;  %v926_v31 = vld [vmem:[%s1197_s1 + $0xb8] sm:$0xff]   ;;  %v932_v39 = vld [vmem:[%s1197_s1 + $0x1c0] sm:$0xff]   ;;  %598 = vmatprep.mubr.bf16.mxu0 %v736_v35 }
   0xd   :  { %834 = vmatpush3.bf16.msra.mxu1 %v906_v11  ;;  %813 = vmatprep.subr.bf16.mxu0 %v907_v12  ;;  %v933_v40 = vld [vmem:[%s1197_s1 + $0x100] sm:$0xff]   ;;  %v935_v42 = vld [vmem:[%s1197_s1 + $0x148] sm:$0xff]   ;;  %v939_v46 = vld [vmem:[%s1197_s1 + $0x150] sm:$0xff]  }
   0xe   :  { %835 = vmatprep.subr.bf16.mxu1 %v908_v13  ;;  %638 = vmatprep.mubr.bf16.mxu1 %v738_v37  ;;  %v934_v41 = vld [vmem:[%s1197_s1 + $0x180] sm:$0xff]   ;;  %v936_v43 = vld [vmem:[%s1197_s1 + $0x1c8] sm:$0xff]   ;;  %v940_v47 = vld [vmem:[%s1197_s1 + $0x1d0] sm:$0xff]  }
   0xf   :  { %v937_v44 = vld [vmem:[%s1197_s1 + $0x108] sm:$0xff]   ;;  %v941_v48 = vld [vmem:[%s1197_s1 + $0x110] sm:$0xff]   ;;  %v943_v50 = vld [vmem:[%s1197_s1 + $0x158] sm:$0xff]  }
  0x10   :  { %814 = vmatpush3.bf16.msra.mxu0 %v909_v14  ;;  %v938_v45 = vld [vmem:[%s1197_s1 + $0x188] sm:$0xff]   ;;  %v942_v49 = vld [vmem:[%s1197_s1 + $0x190] sm:$0xff]   ;;  %v944_v51 = vld [vmem:[%s1197_s1 + $0x1d8] sm:$0xff]  }
  0x11   :  { %836 = vmatpush3.bf16.msra.mxu1 %v910_v15  ;;  %815 = vmatprep.subr.bf16.mxu0 %v911_v16  ;;  %v945_v52 = vld [vmem:[%s1197_s1 + $0x118] sm:$0xff]   ;;  %v947_v54 = vld [vmem:[%s1197_s1 + $0x160] sm:$0xff]   ;;  %v951_v58 = vld [vmem:[%s1197_s1 + $0x168] sm:$0xff]  }
  0x12   :  { %837 = vmatprep.subr.bf16.mxu1 %v912_v17  ;;  %v946_v53 = vld [vmem:[%s1197_s1 + $0x198] sm:$0xff]   ;;  %v948_v55 = vld [vmem:[%s1197_s1 + $0x1e0] sm:$0xff]   ;;  %v952_v59 = vld [vmem:[%s1197_s1 + $0x1e8] sm:$0xff]  }
  0x13   :  { %v949_v56 = vld [vmem:[%s1197_s1 + $0x120] sm:$0xff]   ;;  %v953_v60 = vld [vmem:[%s1197_s1 + $0x128] sm:$0xff]   ;;  %v955_v62 = vld [vmem:[%s1197_s1 + $0x170] sm:$0xff]  }
  0x14   :  { %816 = vmatpush3.bf16.msra.mxu0 %v913_v18  ;;  %v950_v57 = vld [vmem:[%s1197_s1 + $0x1a0] sm:$0xff]   ;;  %v954_v61 = vld [vmem:[%s1197_s1 + $0x1a8] sm:$0xff]   ;;  %v956_v63 = vld [vmem:[%s1197_s1 + $0x1f0] sm:$0xff]  }
  0x15   :  { %838 = vmatpush3.bf16.msra.mxu1 %v914_v19  ;;  %817 = vmatprep.subr.bf16.mxu0 %v915_v20  ;;  %v957_v0 = vld [vmem:[%s1197_s1 + $0x130] sm:$0xff]   ;;  %v959_v2 = vld [vmem:[%s1197_s1 + $0x178] sm:$0xff]   ;;  %v734_v14 = vld [vmem:[%s1199_s2] ss:$0 sm:$0xff] }
  0x16   :  { %839 = vmatprep.subr.bf16.mxu1 %v916_v21  ;;  %v958_v1 = vld [vmem:[%s1197_s1 + $0x1b0] sm:$0xff]   ;;  %v960_v3 = vld [vmem:[%s1197_s1 + $0x1f8] sm:$0xff]  }
  0x17   :  { %v961_v4 = vld [vmem:[%s1197_s1 + $0x138] sm:$0xff]   ;;  %v17_v6 = vld [vmem:[%s1198_s0 + $0x10] sm:$0xff] }
  0x18   :  { %818 = vmatpush3.bf16.msra.mxu0 %v917_v22  ;;  %v962_v5 = vld [vmem:[%s1197_s1 + $0x1b8] sm:$0xff]   ;;  %v739_v7 = vcombine.low %v17_v6, %v17_v6  ;;  %v740_v8 = vcombine.high %v17_v6, %v17_v6 }
  0x19   :  { %840 = vmatpush3.bf16.msra.mxu1 %v918_v23  ;;  %819 = vmatprep.subr.bf16.mxu0 %v919_v24  ;;  %v18_v9 = vld [vmem:[%s1198_s0 + $0x18] sm:$0xff] }
  0x1a   :  { %841 = vmatprep.subr.bf16.mxu1 %v920_v25  ;;  %v741_v10 = vcombine.low %v18_v9, %v18_v9  ;;  %v742_v11 = vcombine.high %v18_v9, %v18_v9 }
  0x1c   :  { %820 = vmatpush3.bf16.msra.mxu0 %v921_v26 }
  0x1d   :  { %842 = vmatpush3.bf16.msra.mxu1 %v922_v27  ;;  %821 = vmatprep.subr.bf16.mxu0 %v923_v28 }
  0x1e   :  { %843 = vmatprep.subr.bf16.mxu1 %v924_v29 }
  0x20   :  { %822 = vmatpush3.bf16.msra.mxu0 %v925_v30 }
  0x21   :  { %844 = vmatpush3.bf16.msra.mxu1 %v926_v31  ;;  %851 = vmatprep.subr.bf16.mxu0 %v931_v38 }
  0x22   :  { %873 = vmatprep.subr.bf16.mxu1 %v932_v39 }
  0x23   :  { %599 = vmatmul.mubr.bf16.vlgmr.msra.gmra.mrb[0].mxu0 %v735_v34 }
  0x24   :  { %639 = vmatmul.mubr.bf16.vlgmr.msra.gmra.mrb[0].mxu1 %v737_v36  ;;  %852 = vmatpush3.bf16.msra.mxu0 %v933_v40 }
  0x25   :  { %874 = vmatpush3.bf16.msra.mxu1 %v934_v41  ;;  %853 = vmatprep.subr.bf16.mxu0 %v935_v42 }
  0x26   :  { %875 = vmatprep.subr.bf16.mxu1 %v936_v43  ;;  %678 = vmatprep.mubr.bf16.mxu0 %v740_v8 }
  0x27   :  { %718 = vmatprep.mubr.bf16.mxu1 %v742_v11 }
  0x28   :  { %854 = vmatpush3.bf16.msra.mxu0 %v937_v44 }
  0x29   :  { %876 = vmatpush3.bf16.msra.mxu1 %v938_v45  ;;  %855 = vmatprep.subr.bf16.mxu0 %v939_v46 }
  0x2a   :  { %877 = vmatprep.subr.bf16.mxu1 %v940_v47 }
  0x2c   :  { %856 = vmatpush3.bf16.msra.mxu0 %v941_v48 }
  0x2d   :  { %878 = vmatpush3.bf16.msra.mxu1 %v942_v49  ;;  %857 = vmatprep.subr.bf16.mxu0 %v943_v50 }
  0x2e   :  { %879 = vmatprep.subr.bf16.mxu1 %v944_v51 }
  0x30   :  { %858 = vmatpush3.bf16.msra.mxu0 %v945_v52 }
  0x31   :  { %880 = vmatpush3.bf16.msra.mxu1 %v946_v53  ;;  %859 = vmatprep.subr.bf16.mxu0 %v947_v54 }
  0x32   :  { %881 = vmatprep.subr.bf16.mxu1 %v948_v55 }
  0x34   :  { %860 = vmatpush3.bf16.msra.mxu0 %v949_v56 }
  0x35   :  { %882 = vmatpush3.bf16.msra.mxu1 %v950_v57  ;;  %861 = vmatprep.subr.bf16.mxu0 %v951_v58 }
  0x36   :  { %883 = vmatprep.subr.bf16.mxu1 %v952_v59 }
  0x38   :  { %862 = vmatpush3.bf16.msra.mxu0 %v953_v60 }
  0x39   :  { %884 = vmatpush3.bf16.msra.mxu1 %v954_v61  ;;  %863 = vmatprep.subr.bf16.mxu0 %v955_v62 }
  0x3a   :  { %885 = vmatprep.subr.bf16.mxu1 %v956_v63 }
  0x3c   :  { %864 = vmatpush3.bf16.msra.mxu0 %v957_v0 }
  0x3d   :  { %886 = vmatpush3.bf16.msra.mxu1 %v958_v1  ;;  %865 = vmatprep.subr.bf16.mxu0 %v959_v2 }
  0x3e   :  { %887 = vmatprep.subr.bf16.mxu1 %v960_v3 }
  0x40   :  { %866 = vmatpush3.bf16.msra.mxu0 %v961_v4 }
  0x41   :  { %888 = vmatpush3.bf16.msra.mxu1 %v962_v5 }
  0x43   :  { %679 = vmatmul.mubr.bf16.vlgmr.msra.gmra.mrb[4].mxu0 %v739_v7 }
  0x44   :  { %719 = vmatmul.mubr.bf16.vlgmr.msra.gmra.mrb[4].mxu1 %v741_v10 }
  0xf6   :  { %v823_v12 = vpop.f32.mrb[0].mxu0 }
  0xf7   :  { %v845_v13 = vpop.f32.mrb[0].mxu1  ;;  %v824_v15 = vpop.f32.mrb[1].mxu0 }
  0xf8   :  { %v846_v16 = vpop.f32.mrb[1].mxu1  ;;  %v825_v17 = vadd.f32 %v824_v15, %v823_v12  ;;  %v826_v19 = vpop.f32.mrb[2].mxu0 }
  0xf9   :  { %v847_v18 = vadd.f32 %v846_v16, %v845_v13  ;;  %v848_v20 = vpop.f32.mrb[2].mxu1  ;;  %v827_v21 = vpop.f32.mrb[3].mxu0 }
  0xfa   :  { %v849_v22 = vpop.f32.mrb[3].mxu1  ;;  %v601_v23 = vadd.f32 %v825_v17, %v734_v14 }
  0xfc   :  { %v641_v24 = vadd.f32 %v847_v18, %v601_v23 }
 0x116   :  { %v867_v25 = vpop.f32.mrb[4].mxu0 }
 0x117   :  { %v889_v26 = vpop.f32.mrb[4].mxu1  ;;  %v868_v27 = vpop.f32.mrb[5].mxu0 }
 0x118   :  { %v890_v28 = vpop.f32.mrb[5].mxu1  ;;  %v869_v29 = vadd.f32 %v868_v27, %v867_v25  ;;  %v870_v31 = vpop.f32.mrb[6].mxu0 }
 0x119   :  { %v891_v30 = vadd.f32 %v890_v28, %v889_v26  ;;  %v892_v32 = vpop.f32.mrb[6].mxu1  ;;  %v871_v33 = vpop.f32.mrb[7].mxu0 }
 0x11a   :  { %v893_v34 = vpop.f32.mrb[7].mxu1  ;;  %v681_v35 = vadd.f32 %v869_v29, %v641_v24 }
 0x11c   :  { %v721_v36 = vadd.f32 %v891_v30, %v681_v35 }
 0x11e   :  { %vm726_vm0 = vcmp.ge.f32.partialorder %v721_v36, 0.0  ;;  %v727_v37 = vmul.f32 0.2, %v721_v36 }
 0x120   :  { %v728_v38 = vsel %vm726_vm0, %v721_v36, %v727_v37 }
 0x121   :  { %729 = vst [vmem:[%s1200_s3] sm:$0xff] %v728_v38 }

// kernel: discriminator_forward.14
= control target key start
LH: loop header
LB: loop body
LE: loop exit
PB: predicated region body
PF: predicated region fallthrough
CT: control target
= control target key end

     0   :  { %vm978_vm2 = vcmask 523264   ;;  %s1644_s1 = inlined_call_operand.vmem [shape: bf16[1152,64], index: 1, kind: input, shape index: {}]   ;;  %s1645_s0 = inlined_call_operand.vmem [shape: bf16[32,1152], index: 0, kind: input, shape index: {}]   ;;  %s1646_s2 = inlined_call_operand.vmem [shape: f32[1,64], index: 2, kind: input, shape index: {}]   ;;  %s1647_s3 = inlined_call_operand.vmem [shape: f32[32,64], index: 3, kind: input, shape index: {}]   ;;  %s1648_s4 = inlined_call_operand.vmem [shape: f32[32,64], index: 4, kind: output, shape index: {}]  }
   0x1   :  { %v1220_v0 = vld [vmem:[%s1644_s1 + $0x40] sm:$0xff]   ;;  %v1224_v4 = vld [vmem:[%s1644_s1 + $0x48] sm:$0xff]   ;;  %v1228_v8 = vld [vmem:[%s1644_s1 + $0x50] sm:$0xff]  }
   0x2   :  { %v1221_v1 = vld [vmem:[%s1644_s1] sm:$0xff]   ;;  %1078 = vmatprep.subr.bf16.mxu0 %v1220_v0  ;;  %v1225_v5 = vld [vmem:[%s1644_s1 + $0x8] sm:$0xff]   ;;  %v1229_v9 = vld [vmem:[%s1644_s1 + $0x10] sm:$0xff]  }
   0x3   :  { %v1222_v2 = vld [vmem:[%s1644_s1 + $0xc0] sm:$0xff]   ;;  %1079 = vmatpush3.bf16.msra.mxu0 %v1221_v1  ;;  %v1226_v6 = vld [vmem:[%s1644_s1 + $0xc8] sm:$0xff]   ;;  %v1230_v10 = vld [vmem:[%s1644_s1 + $0xd0] sm:$0xff]  }
   0x4   :  { %v1223_v3 = vld [vmem:[%s1644_s1 + $0x80] sm:$0xff]   ;;  %1106 = vmatprep.subr.bf16.mxu1 %v1222_v2  ;;  %1080 = vmatprep.subr.bf16.mxu0 %v1224_v4  ;;  %v1227_v7 = vld [vmem:[%s1644_s1 + $0x88] sm:$0xff]   ;;  %v1231_v11 = vld [vmem:[%s1644_s1 + $0x90] sm:$0xff]  }
   0x5   :  { %1107 = vmatpush3.bf16.msra.mxu1 %v1223_v3  ;;  %v1232_v12 = vld [vmem:[%s1644_s1 + $0x58] sm:$0xff]   ;;  %v1236_v16 = vld [vmem:[%s1644_s1 + $0x60] sm:$0xff]   ;;  %v1240_v20 = vld [vmem:[%s1644_s1 + $0x68] sm:$0xff]  }
   0x6   :  { %1108 = vmatprep.subr.bf16.mxu1 %v1226_v6  ;;  %v1233_v13 = vld [vmem:[%s1644_s1 + $0x18] sm:$0xff]   ;;  %v1237_v17 = vld [vmem:[%s1644_s1 + $0x20] sm:$0xff]   ;;  %v1241_v21 = vld [vmem:[%s1644_s1 + $0x28] sm:$0xff]  }
   0x7   :  { %1081 = vmatpush3.bf16.msra.mxu0 %v1225_v5  ;;  %v1234_v14 = vld [vmem:[%s1644_s1 + $0xd8] sm:$0xff]   ;;  %v1238_v18 = vld [vmem:[%s1644_s1 + $0xe0] sm:$0xff]   ;;  %v1242_v22 = vld [vmem:[%s1644_s1 + $0xe8] sm:$0xff]  }
   0x8   :  { %1082 = vmatprep.subr.bf16.mxu0 %v1228_v8  ;;  %v1235_v15 = vld [vmem:[%s1644_s1 + $0x98] sm:$0xff]   ;;  %v1239_v19 = vld [vmem:[%s1644_s1 + $0xa0] sm:$0xff]   ;;  %v1243_v23 = vld [vmem:[%s1644_s1 + $0xa8] sm:$0xff]  }
   0x9   :  { %1109 = vmatpush3.bf16.msra.mxu1 %v1227_v7  ;;  %v1244_v24 = vld [vmem:[%s1644_s1 + $0x70] sm:$0xff]   ;;  %v1248_v28 = vld [vmem:[%s1644_s1 + $0x78] sm:$0xff]   ;;  %v1251_v31 = vld [vmem:[%s1645_s0] ss:$36 sps:$4 sm:$0xff]  }
   0xa   :  { %1110 = vmatprep.subr.bf16.mxu1 %v1230_v10  ;;  %v1245_v25 = vld [vmem:[%s1644_s1 + $0x30] sm:$0xff]   ;;  %v1249_v29 = vld [vmem:[%s1644_s1 + $0x38] sm:$0xff]   ;;  %v1253_v32 = vld [vmem:[%s1645_s0 + $0x4] ss:$36 sps:$4 sm:$0xff]  }
   0xb   :  { %1083 = vmatpush3.bf16.msra.mxu0 %v1229_v9  ;;  %v1246_v26 = vld [vmem:[%s1644_s1 + $0xf0] sm:$0xff]   ;;  %v1250_v30 = vld [vmem:[%s1644_s1 + $0xf8] sm:$0xff]   ;;  %745 = vmatprep.mubr.bf16.mxu0 %v1253_v32  ;;  %v1255_v34 = vld [vmem:[%s1644_s1 + $0x140] sm:$0xff]  }
   0xc   :  { %1084 = vmatprep.subr.bf16.mxu0 %v1232_v12  ;;  %v1247_v27 = vld [vmem:[%s1644_s1 + $0xb0] sm:$0xff]   ;;  %v1254_v33 = vld [vmem:[%s1644_s1 + $0xb8] sm:$0xff]   ;;  %v1256_v35 = vld [vmem:[%s1645_s0 + $0x8] ss:$36 sps:$4 sm:$0xff]  }
   0xd   :  { %1111 = vmatpush3.bf16.msra.mxu1 %v1231_v11  ;;  %v1258_v36 = vld [vmem:[%s1645_s0 + $0xc] ss:$36 sps:$4 sm:$0xff]   ;;  %v1259_v37 = vld [vmem:[%s1644_s1 + $0x100] sm:$0xff]   ;;  %v1270_v48 = vld [vmem:[%s1644_s1 + $0x158] sm:$0xff]  }
   0xe   :  { %1112 = vmatprep.subr.bf16.mxu1 %v1234_v14  ;;  %794 = vmatprep.mubr.bf16.mxu1 %v1258_v36  ;;  %v1260_v38 = vld [vmem:[%s1644_s1 + $0x1c0] sm:$0xff]   ;;  %v1262_v40 = vld [vmem:[%s1644_s1 + $0x148] sm:$0xff]   ;;  %v1266_v44 = vld [vmem:[%s1644_s1 + $0x150] sm:$0xff]  }
   0xf   :  { %1085 = vmatpush3.bf16.msra.mxu0 %v1233_v13  ;;  %v1261_v39 = vld [vmem:[%s1644_s1 + $0x180] sm:$0xff]   ;;  %v1263_v41 = vld [vmem:[%s1644_s1 + $0x108] sm:$0xff]   ;;  %v1267_v45 = vld [vmem:[%s1644_s1 + $0x110] sm:$0xff]  }
  0x10   :  { %1086 = vmatprep.subr.bf16.mxu0 %v1236_v16  ;;  %v1264_v42 = vld [vmem:[%s1644_s1 + $0x1c8] sm:$0xff]   ;;  %v1268_v46 = vld [vmem:[%s1644_s1 + $0x1d0] sm:$0xff]   ;;  %v1271_v49 = vld [vmem:[%s1644_s1 + $0x118] sm:$0xff]  }
  0x11   :  { %1113 = vmatpush3.bf16.msra.mxu1 %v1235_v15  ;;  %v1265_v43 = vld [vmem:[%s1644_s1 + $0x188] sm:$0xff]   ;;  %v1269_v47 = vld [vmem:[%s1644_s1 + $0x190] sm:$0xff]   ;;  %v1272_v50 = vld [vmem:[%s1644_s1 + $0x1d8] sm:$0xff]  }
  0x12   :  { %1114 = vmatprep.subr.bf16.mxu1 %v1238_v18  ;;  %v1273_v51 = vld [vmem:[%s1644_s1 + $0x198] sm:$0xff]   ;;  %v1274_v52 = vld [vmem:[%s1644_s1 + $0x160] sm:$0xff]   ;;  %v1278_v56 = vld [vmem:[%s1644_s1 + $0x168] sm:$0xff]  }
  0x13   :  { %1087 = vmatpush3.bf16.msra.mxu0 %v1237_v17  ;;  %v1275_v53 = vld [vmem:[%s1644_s1 + $0x120] sm:$0xff]   ;;  %v1279_v57 = vld [vmem:[%s1645_s0 + $0x4c] ss:$36 sps:$4 sm:$0xff]   ;;  %v1284_v61 = vld [vmem:[%s1645_s0 + $0x54] ss:$36 sps:$4 sm:$0xff]  }
  0x14   :  { %1088 = vmatprep.subr.bf16.mxu0 %v1240_v20  ;;  %v1276_v54 = vld [vmem:[%s1644_s1 + $0x1e0] sm:$0xff]   ;;  %v1281_v58 = vld [vmem:[%s1644_s1 + $0x128] sm:$0xff]   ;;  %v1287_v63 = vld [vmem:[%s1645_s0 + $0x50] ss:$36 sps:$4 sm:$0xff]  }
  0x15   :  { %1115 = vmatpush3.bf16.msra.mxu1 %v1239_v19  ;;  %v1277_v55 = vld [vmem:[%s1644_s1 + $0x1a0] sm:$0xff]   ;;  %v1282_v59 = vld [vmem:[%s1645_s0 + $0x48] ss:$36 sps:$4 sm:$0xff]   ;;  %v1288_v0 = vld [vmem:[%s1644_s1 + $0x170] sm:$0xff]  }
  0x16   :  { %1116 = vmatprep.subr.bf16.mxu1 %v1242_v22  ;;  %v1283_v60 = vld [vmem:[%s1644_s1 + $0x1e8] sm:$0xff]   ;;  %v1289_v1 = vld [vmem:[%s1644_s1 + $0x130] sm:$0xff]   ;;  %v1292_v4 = vld [vmem:[%s1644_s1 + $0x178] sm:$0xff]  }
  0x17   :  { %1089 = vmatpush3.bf16.msra.mxu0 %v1241_v21  ;;  %v1286_v62 = vld [vmem:[%s1644_s1 + $0x1a8] sm:$0xff]   ;;  %v1290_v2 = vld [vmem:[%s1644_s1 + $0x1f0] sm:$0xff]   ;;  %v1293_v5 = vld [vmem:[%s1644_s1 + $0x138] sm:$0xff]  }
  0x18   :  { %1090 = vmatprep.subr.bf16.mxu0 %v1244_v24  ;;  %v1291_v3 = vld [vmem:[%s1644_s1 + $0x1b0] sm:$0xff]   ;;  %v1294_v6 = vld [vmem:[%s1644_s1 + $0x1f8] sm:$0xff]   ;;  %v1299_v10 = vld [vmem:[%s1644_s1 + $0x200] sm:$0xff]  }
  0x19   :  { %1117 = vmatpush3.bf16.msra.mxu1 %v1243_v23  ;;  %v1295_v7 = vld [vmem:[%s1645_s0 + $0x10] ss:$36 sps:$4 sm:$0xff]   ;;  %v1298_v9 = vld [vmem:[%s1644_s1 + $0x1b8] sm:$0xff]   ;;  %v1303_v13 = vld [vmem:[%s1644_s1 + $0x208] sm:$0xff]  }
  0x1a   :  { %1118 = vmatprep.subr.bf16.mxu1 %v1246_v26  ;;  %v1297_v8 = vld [vmem:[%s1645_s0 + $0x14] ss:$36 sps:$4 sm:$0xff]   ;;  %v1302_v12 = vld [vmem:[%s1645_s0 + $0x1c] ss:$36 sps:$4 sm:$0xff]   ;;  %v1308_v17 = vld [vmem:[%s1645_s0 + $0x64] ss:$36 sps:$4 sm:$0xff]  }
  0x1b   :  { %1091 = vmatpush3.bf16.msra.mxu0 %v1245_v25  ;;  %v1300_v11 = vld [vmem:[%s1645_s0 + $0x18] ss:$36 sps:$4 sm:$0xff]   ;;  %v1307_v16 = vld [vmem:[%s1644_s1 + $0x210] sm:$0xff]   ;;  %v1310_v18 = vld [vmem:[%s1645_s0 + $0x60] ss:$36 sps:$4 sm:$0xff]  }
  0x1c   :  { %1092 = vmatprep.subr.bf16.mxu0 %v1248_v28  ;;  %v1304_v14 = vld [vmem:[%s1645_s0 + $0x5c] ss:$36 sps:$4 sm:$0xff]   ;;  %v1313_v22 = vld [vmem:[%s1644_s1 + $0x228] sm:$0xff]   ;;  %v1314_v23 = vld [vmem:[%s1644_s1 + $0x230] sm:$0xff]  }
  0x1d   :  { %1119 = vmatpush3.bf16.msra.mxu1 %v1247_v27  ;;  %v1306_v15 = vld [vmem:[%s1645_s0 + $0x58] ss:$36 sps:$4 sm:$0xff]   ;;  %v1312_v20 = vld [vmem:[%s1644_s1 + $0x220] sm:$0xff]   ;;  %v1317_v25 = vld [vmem:[%s1645_s0 + $0x68] ss:$36 sps:$4 sm:$0xff]  }
  0x1e   :  { %1120 = vmatprep.subr.bf16.mxu1 %v1250_v30  ;;  %v1311_v19 = vld [vmem:[%s1644_s1 + $0x218] sm:$0xff]   ;;  %v1316_v21 = vld [vmem:[%s1645_s0 + $0x20] ss:$36 sps:$4 sm:$0xff]  }
  0x1f   :  { %1093 = vmatpush3.bf16.msra.mxu0 %v1249_v29  ;;  %v1315_v24 = vld [vmem:[%s1644_s1 + $0x238] sm:$0xff]   ;;  %v987_v27 = vld [vmem:[%s1646_s2] ss:$0 sm:$0xff] }
  0x20   :  { %1134 = vmatprep.subr.bf16.mxu0 %v1255_v34 }
  0x21   :  { %1121 = vmatpush3.bf16.msra.mxu1 %v1254_v33 }
  0x22   :  { %746 = vmatmul.mubr.bf16.vlgmr.msra.gmra.mrb[0].mxu0 %v1251_v31  ;;  %1162 = vmatprep.subr.bf16.mxu1 %v1260_v38 }
  0x23   :  { %1135 = vmatpush3.bf16.msra.mxu0 %v1259_v37  ;;  %753 = vmatprep.mubr.bf16.mxu0 %v1279_v57 }
  0x24   :  { %795 = vmatmul.mubr.bf16.vlgmr.msra.gmra.mrb[0].mxu1 %v1256_v35  ;;  %1136 = vmatprep.subr.bf16.mxu0 %v1262_v40 }
  0x25   :  { %1163 = vmatpush3.bf16.msra.mxu1 %v1261_v39  ;;  %802 = vmatprep.mubr.bf16.mxu1 %v1284_v61 }
  0x26   :  { %1164 = vmatprep.subr.bf16.mxu1 %v1264_v42 }
  0x27   :  { %1137 = vmatpush3.bf16.msra.mxu0 %v1263_v41 }
  0x28   :  { %1138 = vmatprep.subr.bf16.mxu0 %v1266_v44 }
  0x29   :  { %1165 = vmatpush3.bf16.msra.mxu1 %v1265_v43 }
  0x2a   :  { %1166 = vmatprep.subr.bf16.mxu1 %v1268_v46  ;;  %754 = vmatmul.mubr.bf16.gmra.mrb[4].mxu0 %v1282_v59 }
  0x2b   :  { %1139 = vmatpush3.bf16.msra.mxu0 %v1267_v45  ;;  %843 = vmatprep.mubr.bf16.mxu0 %v1297_v8 }
  0x2c   :  { %1140 = vmatprep.subr.bf16.mxu0 %v1270_v48  ;;  %803 = vmatmul.mubr.bf16.gmra.mrb[4].mxu1 %v1287_v63 }
  0x2d   :  { %1167 = vmatpush3.bf16.msra.mxu1 %v1269_v47  ;;  %892 = vmatprep.mubr.bf16.mxu1 %v1302_v12 }
  0x2e   :  { %1168 = vmatprep.subr.bf16.mxu1 %v1272_v50 }
  0x2f   :  { %1141 = vmatpush3.bf16.msra.mxu0 %v1271_v49 }
  0x30   :  { %1142 = vmatprep.subr.bf16.mxu0 %v1274_v52 }
  0x31   :  { %1169 = vmatpush3.bf16.msra.mxu1 %v1273_v51 }
  0x32   :  { %1170 = vmatprep.subr.bf16.mxu1 %v1276_v54 }
  0x33   :  { %1143 = vmatpush3.bf16.msra.mxu0 %v1275_v53 }
  0x34   :  { %1144 = vmatprep.subr.bf16.mxu0 %v1278_v56 }
  0x35   :  { %1171 = vmatpush3.bf16.msra.mxu1 %v1277_v55 }
  0x36   :  { %1172 = vmatprep.subr.bf16.mxu1 %v1283_v60 }
  0x37   :  { %1145 = vmatpush3.bf16.msra.mxu0 %v1281_v58 }
  0x38   :  { %1146 = vmatprep.subr.bf16.mxu0 %v1288_v0 }
  0x39   :  { %1173 = vmatpush3.bf16.msra.mxu1 %v1286_v62 }
  0x3a   :  { %1174 = vmatprep.subr.bf16.mxu1 %v1290_v2 }
  0x3b   :  { %1147 = vmatpush3.bf16.msra.mxu0 %v1289_v1 }
  0x3c   :  { %1148 = vmatprep.subr.bf16.mxu0 %v1292_v4 }
  0x3d   :  { %1175 = vmatpush3.bf16.msra.mxu1 %v1291_v3 }
  0x3e   :  { %1176 = vmatprep.subr.bf16.mxu1 %v1294_v6 }
  0x3f   :  { %1149 = vmatpush3.bf16.msra.mxu0 %v1293_v5 }
  0x40   :  { %1200 = vmatprep.subr.bf16.mxu0 %v1299_v10 }
  0x41   :  { %1177 = vmatpush3.bf16.msra.mxu1 %v1298_v9 }
  0x42   :  { %844 = vmatmul.mubr.bf16.vlgmr.msra.gmra.mrb[8].mxu0 %v1295_v7 }
  0x43   :  { %1201 = vmatpush3.bf16.msra.mxu0 %v1299_v10  ;;  %851 = vmatprep.mubr.bf16.mxu0 %v1304_v14 }
  0x44   :  { %893 = vmatmul.mubr.bf16.vlgmr.msra.gmra.mrb[8].mxu1 %v1300_v11  ;;  %1202 = vmatprep.subr.bf16.mxu0 %v1303_v13 }
  0x45   :  { %900 = vmatprep.mubr.bf16.mxu1 %v1308_v17 }
  0x47   :  { %1203 = vmatpush3.bf16.msra.mxu0 %v1303_v13 }
  0x48   :  { %1204 = vmatprep.subr.bf16.mxu0 %v1307_v16 }
  0x4a   :  { %852 = vmatmul.mubr.bf16.gmra.mrb[12].mxu0 %v1306_v15 }
  0x4b   :  { %1205 = vmatpush3.bf16.msra.mxu0 %v1307_v16  ;;  %1216 = vmatprep.mubr.bf16.mxu0 %v1316_v21 }
  0x4c   :  { %901 = vmatmul.mubr.bf16.gmra.mrb[12].mxu1 %v1310_v18  ;;  %1206 = vmatprep.subr.bf16.mxu0 %v1311_v19 }
  0x4f   :  { %1207 = vmatpush3.bf16.msra.mxu0 %v1311_v19 }
  0x50   :  { %1208 = vmatprep.subr.bf16.mxu0 %v1312_v20 }
  0x53   :  { %1209 = vmatpush3.bf16.msra.mxu0 %v1312_v20 }
  0x54   :  { %1210 = vmatprep.subr.bf16.mxu0 %v1313_v22 }
  0x57   :  { %1211 = vmatpush3.bf16.msra.mxu0 %v1313_v22 }
  0x58   :  { %1212 = vmatprep.subr.bf16.mxu0 %v1314_v23 }
  0x5b   :  { %1213 = vmatpush3.bf16.msra.mxu0 %v1314_v23 }
  0x5c   :  { %1214 = vmatprep.subr.bf16.mxu0 %v1315_v24 }
  0x5f   :  { %1215 = vmatpush3.bf16.msra.mxu0 %v1315_v24 }
  0x62   :  { %1217 = vmatmul.mubr.bf16.vlgmr.msra.gmra.mrb[16].mxu0 %v1317_v25 }
  0xf5   :  { %v1094_v26 = vpop.f32.mrb[0].mxu0 }
  0xf6   :  { %v1095_v28 = vpop.f32.mrb[1].mxu0 }
  0xf7   :  { %v1096_v29 = vadd.f32 %v1095_v28, %v1094_v26  ;;  %v1097_v30 = vpop.f32.mrb[2].mxu0  ;;  %v1122_v31 = vpop.f32.mrb[0].mxu1 }
  0xf8   :  { %v1098_v32 = vpop.f32.mrb[3].mxu0  ;;  %v1123_v35 = vpop.f32.mrb[1].mxu1 }
  0xf9   :  { %v748_v33 = vadd.f32 %v1096_v29, %v987_v27  ;;  %v1099_v34 = vadd.f32 %v1098_v32, %v1097_v30  ;;  %v1124_v36 = vadd.f32 %v1123_v35, %v1122_v31  ;;  %v1125_v37 = vpop.f32.mrb[2].mxu1 }
  0xfa   :  { %v1126_v39 = vpop.f32.mrb[3].mxu1 }
  0xfb   :  { %v751_v38 = vadd.f32 %v1099_v34, %v987_v27  ;;  %v797_v40 = vadd.f32 %v1124_v36, %v748_v33  ;;  %v1127_v41 = vadd.f32 %v1126_v39, %v1125_v37  ;;  %v972_v33 = vld [vmem:[%s1647_s3 + $0x10] sm:$0xff]  ;;  %v970_v37 = vld [vmem:[%s1647_s3] sm:$0xff] }
  0xfd   :  { %v800_v42 = vadd.f32 %v1127_v41, %v751_v38  ;;  %v1100_v43 = vpop.f32.mrb[4].mxu0  ;;  %v973_v41 = vld [vmem:[%s1647_s3 + $0x18] sm:$0xff] }
  0xfe   :  { %v1101_v44 = vpop.f32.mrb[5].mxu0 }
  0xff   :  { %v1102_v45 = vadd.f32 %v1101_v44, %v1100_v43  ;;  %v1103_v46 = vpop.f32.mrb[6].mxu0  ;;  %v1128_v47 = vpop.f32.mrb[4].mxu1 }
 0x100   :  { %v1104_v48 = vpop.f32.mrb[7].mxu0  ;;  %v1129_v51 = vpop.f32.mrb[5].mxu1 }
 0x101   :  { %v756_v49 = vadd.f32 %v1102_v45, %v987_v27  ;;  %v1105_v50 = vadd.f32 %v1104_v48, %v1103_v46  ;;  %v1130_v52 = vadd.f32 %v1129_v51, %v1128_v47  ;;  %v1131_v53 = vpop.f32.mrb[6].mxu1  ;;  %v971_v45 = vld [vmem:[%s1647_s3 + $0x8] sm:$0xff] }
 0x102   :  { %v1132_v55 = vpop.f32.mrb[7].mxu1 }
 0x103   :  { %v759_v54 = vadd.f32 %v1105_v50, %v987_v27  ;;  %v805_v56 = vadd.f32 %v1130_v52, %v756_v49  ;;  %v1133_v57 = vadd.f32 %v1132_v55, %v1131_v53 }
 0x105   :  { %v808_v58 = vadd.f32 %v1133_v57, %v759_v54 }
 0x115   :  { %v1150_v59 = vpop.f32.mrb[8].mxu0 }
 0x116   :  { %v1151_v60 = vpop.f32.mrb[9].mxu0 }
 0x117   :  { %v1152_v61 = vadd.f32 %v1151_v60, %v1150_v59  ;;  %v1153_v62 = vpop.f32.mrb[10].mxu0  ;;  %v1178_v63 = vpop.f32.mrb[8].mxu1 }
 0x118   :  { %v1154_v0 = vpop.f32.mrb[11].mxu0  ;;  %v1179_v3 = vpop.f32.mrb[9].mxu1 }
 0x119   :  { %v846_v1 = vadd.f32 %v1152_v61, %v797_v40  ;;  %v1155_v2 = vadd.f32 %v1154_v0, %v1153_v62  ;;  %v1180_v4 = vadd.f32 %v1179_v3, %v1178_v63  ;;  %v1181_v5 = vpop.f32.mrb[10].mxu1 }
 0x11a   :  { %v1182_v7 = vpop.f32.mrb[11].mxu1 }
 0x11b   :  { %v849_v6 = vadd.f32 %v1155_v2, %v800_v42  ;;  %v1183_v8 = vadd.f32 %v1182_v7, %v1181_v5  ;;  %v895_v9 = vadd.f32 %v1180_v4, %v846_v1 }
 0x11d   :  { %v1156_v10 = vpop.f32.mrb[12].mxu0  ;;  %v898_v12 = vadd.f32 %v1183_v8, %v849_v6 }
 0x11e   :  { %v1157_v11 = vpop.f32.mrb[13].mxu0 }
 0x11f   :  { %v1158_v13 = vadd.f32 %v1157_v11, %v1156_v10  ;;  %v1159_v14 = vpop.f32.mrb[14].mxu0  ;;  %v1184_v15 = vpop.f32.mrb[12].mxu1 }
 0x120   :  { %v1160_v16 = vpop.f32.mrb[15].mxu0  ;;  %v1185_v19 = vpop.f32.mrb[13].mxu1 }
 0x121   :  { %v854_v17 = vadd.f32 %v1158_v13, %v805_v56  ;;  %v1161_v18 = vadd.f32 %v1160_v16, %v1159_v14  ;;  %v1186_v20 = vadd.f32 %v1185_v19, %v1184_v15  ;;  %v1187_v21 = vpop.f32.mrb[14].mxu1 }
 0x122   :  { %v1188_v23 = vpop.f32.mrb[15].mxu1 }
 0x123   :  { %v857_v22 = vadd.f32 %v1161_v18, %v808_v58  ;;  %v1189_v24 = vadd.f32 %v1188_v23, %v1187_v21  ;;  %v903_v25 = vadd.f32 %v1186_v20, %v854_v17 }
 0x125   :  { %v906_v26 = vadd.f32 %v1189_v24, %v857_v22 }
 0x135   :  { %v1218_v27 = vpop.f32.mrb[16].mxu0 }
 0x136   :  { %v952_v28 = vadd.f32 %v1218_v27, %v903_v25  ;;  %v943_v29 = vpop.f32.mrb[17].mxu0 }
 0x137   :  { %v944_v30 = vadd.f32 %v943_v29, %v895_v9  ;;  %v1219_v31 = vpop.f32.mrb[18].mxu0 }
 0x138   :  { %vm960_vm0 = vcmp.ge.f32.partialorder %v952_v28, 0.0  ;;  %v964_v32 = vmul.f32 0.2, %v952_v28  ;;  %v955_v34 = vadd.f32 %v1219_v31, %v906_v26  ;;  %v946_v35 = vpop.f32.mrb[19].mxu0 }
 0x139   :  { %vm958_vm1 = vcmp.ge.f32.partialorder %v944_v30, 0.0  ;;  %v962_v36 = vmul.f32 0.2, %v944_v30  ;;  %v947_v38 = vadd.f32 %v946_v35, %v898_v12 }
 0x13a   :  { %v968_v39 = vsel %vm960_vm0, %v952_v28, %v964_v32  ;;  %vm961_vm3 = vcmp.ge.f32.partialorder %v955_v34, 0.0  ;;  %v965_v40 = vmul.f32 0.2, %v955_v34 }
 0x13b   :  { %v976_v42 = vadd.f32 %v972_v33, %v968_v39  ;;  %v966_v43 = vsel %vm958_vm1, %v944_v30, %v962_v36  ;;  %vm959_vm4 = vcmp.ge.f32.partialorder %v947_v38, 0.0  ;;  %v963_v44 = vmul.f32 0.2, %v947_v38 }
 0x13c   :  { %v974_v46 = vadd.f32 %v970_v37, %v966_v43  ;;  %v969_v47 = vsel %vm961_vm3, %v955_v34, %v965_v40 }
 0x13d   :  { %981 = vst.msk [vmem:[%s1648_s4 + $0x10] sm:$0xff] %vm978_vm2, %v976_v42  ;;  %v977_v48 = vadd.f32 %v973_v41, %v969_v47  ;;  %v967_v49 = vsel %vm959_vm4, %v947_v38, %v963_v44 }
 0x13e   :  { %979 = vst.msk [vmem:[%s1648_s4] sm:$0xff] %vm978_vm2, %v974_v46  ;;  %v975_v50 = vadd.f32 %v971_v45, %v967_v49 }
 0x13f   :  { %982 = vst.msk [vmem:[%s1648_s4 + $0x18] sm:$0xff] %vm978_vm2, %v977_v48 }
 0x140   :  { %980 = vst.msk [vmem:[%s1648_s4 + $0x8] sm:$0xff] %vm978_vm2, %v975_v50 }

// kernel: discriminator_forward.15
= control target key start
LH: loop header
LB: loop body
LE: loop exit
PB: predicated region body
PF: predicated region fallthrough
CT: control target
= control target key end

     0   :  { %vm561_vm0 = vcmask 523264   ;;  %vm957_vm1 = vcmask 261120   ;;  %s1767_s1 = inlined_call_operand.vmem [shape: bf16[576,32], index: 1, kind: input, shape index: {}]   ;;  %s1768_s0 = inlined_call_operand.vmem [shape: bf16[128,576], index: 0, kind: input, shape index: {}]   ;;  %s1769_s2 = inlined_call_operand.vmem [shape: f32[1,32], index: 2, kind: input, shape index: {}]   ;;  %s1770_s3 = inlined_call_operand.vmem [shape: f32[128,32], index: 3, kind: input, shape index: {}]   ;;  %s1771_s4 = inlined_call_operand.vmem [shape: f32[128,32], index: 4, kind: output, shape index: {}]  }
   0x1   :  { %v1235_v0 = vld [vmem:[%s1767_s1 + $0x40] sm:$0xff]   ;;  %v1239_v4 = vld [vmem:[%s1767_s1 + $0x48] sm:$0xff]   ;;  %v1243_v8 = vld [vmem:[%s1767_s1 + $0x50] sm:$0xff]  }
   0x2   :  { %v1236_v1 = vld [vmem:[%s1767_s1 + $0xc0] sm:$0xff]   ;;  %1063 = vmatprep.subr.bf16.mxu0 %v1235_v0  ;;  %v1240_v5 = vld [vmem:[%s1767_s1 + $0xc8] sm:$0xff]   ;;  %v1244_v9 = vld [vmem:[%s1767_s1 + $0xd0] sm:$0xff]  }
   0x3   :  { %v1237_v2 = vld [vmem:[%s1767_s1] sm:$0xff]   ;;  %1127 = vmatprep.subr.bf16.mxu1 %v1236_v1  ;;  %v1241_v6 = vld [vmem:[%s1767_s1 + $0x8] sm:$0xff]   ;;  %v1245_v10 = vld [vmem:[%s1767_s1 + $0x10] sm:$0xff]  }
   0x4   :  { %v1238_v3 = vld [vmem:[%s1767_s1 + $0x80] sm:$0xff]   ;;  %1064 = vmatpush3.bf16.msra.mxu0 %v1237_v2  ;;  %v1242_v7 = vld [vmem:[%s1767_s1 + $0x88] sm:$0xff]   ;;  %v1246_v11 = vld [vmem:[%s1767_s1 + $0x90] sm:$0xff]  }
   0x5   :  { %1128 = vmatpush3.bf16.msra.mxu1 %v1238_v3  ;;  %1065 = vmatprep.subr.bf16.mxu0 %v1239_v4  ;;  %v1247_v12 = vld [vmem:[%s1767_s1 + $0x58] sm:$0xff]   ;;  %v1251_v16 = vld [vmem:[%s1767_s1 + $0x60] sm:$0xff]   ;;  %v1255_v20 = vld [vmem:[%s1767_s1 + $0x68] sm:$0xff]  }
   0x6   :  { %1129 = vmatprep.subr.bf16.mxu1 %v1240_v5  ;;  %v1248_v13 = vld [vmem:[%s1767_s1 + $0xd8] sm:$0xff]   ;;  %v1252_v17 = vld [vmem:[%s1767_s1 + $0xe0] sm:$0xff]   ;;  %v1256_v21 = vld [vmem:[%s1767_s1 + $0xe8] sm:$0xff]  }
   0x7   :  { %v1249_v14 = vld [vmem:[%s1767_s1 + $0x18] sm:$0xff]   ;;  %v1253_v18 = vld [vmem:[%s1767_s1 + $0x20] sm:$0xff]   ;;  %v1257_v22 = vld [vmem:[%s1767_s1 + $0x28] sm:$0xff]  }
   0x8   :  { %1066 = vmatpush3.bf16.msra.mxu0 %v1241_v6  ;;  %v1250_v15 = vld [vmem:[%s1767_s1 + $0x98] sm:$0xff]   ;;  %v1254_v19 = vld [vmem:[%s1767_s1 + $0xa0] sm:$0xff]   ;;  %v1258_v23 = vld [vmem:[%s1767_s1 + $0xa8] sm:$0xff]  }
   0x9   :  { %1130 = vmatpush3.bf16.msra.mxu1 %v1242_v7  ;;  %1067 = vmatprep.subr.bf16.mxu0 %v1243_v8  ;;  %v1259_v24 = vld [vmem:[%s1767_s1 + $0x70] sm:$0xff]   ;;  %v1263_v28 = vld [vmem:[%s1767_s1 + $0x78] sm:$0xff]   ;;  %v1272_v35 = vld [vmem:[%s1768_s0 + $0xc] ss:$20 sps:$4 sm:$0xff]  }
   0xa   :  { %1131 = vmatprep.subr.bf16.mxu1 %v1244_v9  ;;  %v1260_v25 = vld [vmem:[%s1767_s1 + $0xf0] sm:$0xff]   ;;  %v1264_v29 = vld [vmem:[%s1767_s1 + $0xf8] sm:$0xff]   ;;  %v1273_v36 = vld [vmem:[%s1767_s1 + $0x100] sm:$0xff]   ;;  %715 = vmatprep.mubr.bf16.mxu1 %v1272_v35 }
   0xb   :  { %v1261_v26 = vld [vmem:[%s1767_s1 + $0x30] sm:$0xff]   ;;  %v1265_v30 = vld [vmem:[%s1767_s1 + $0x38] sm:$0xff]   ;;  %v1274_v37 = vld [vmem:[%s1768_s0 + $0x2c] ss:$20 sps:$4 sm:$0xff]  }
   0xc   :  { %1068 = vmatpush3.bf16.msra.mxu0 %v1245_v10  ;;  %v1262_v27 = vld [vmem:[%s1767_s1 + $0xb0] sm:$0xff]   ;;  %v1266_v31 = vld [vmem:[%s1767_s1 + $0xb8] sm:$0xff]   ;;  %v1286_v42 = vld [vmem:[%s1767_s1 + $0x108] sm:$0xff]  }
   0xd   :  { %1132 = vmatpush3.bf16.msra.mxu1 %v1246_v11  ;;  %1069 = vmatprep.subr.bf16.mxu0 %v1247_v12  ;;  %v1267_v32 = vld [vmem:[%s1768_s0] ss:$20 sps:$4 sm:$0xff]   ;;  %v1269_v33 = vld [vmem:[%s1768_s0 + $0x4] ss:$20 sps:$4 sm:$0xff]   ;;  %v1270_v34 = vld [vmem:[%s1768_s0 + $0x8] ss:$20 sps:$4 sm:$0xff]  }
   0xe   :  { %1133 = vmatprep.subr.bf16.mxu1 %v1248_v13  ;;  %618 = vmatprep.mubr.bf16.mxu0 %v1269_v33  ;;  %v1276_v38 = vld [vmem:[%s1768_s0 + $0x34] ss:$20 sps:$4 sm:$0xff]   ;;  %v1279_v40 = vld [vmem:[%s1768_s0 + $0x30] ss:$20 sps:$4 sm:$0xff]   ;;  %v1285_v45 = vld [vmem:[%s1768_s0 + $0x58] ss:$20 sps:$4 sm:$0xff]  }
   0xf   :  { %v1278_v39 = vld [vmem:[%s1768_s0 + $0x28] ss:$20 sps:$4 sm:$0xff]   ;;  %v1284_v44 = vld [vmem:[%s1768_s0 + $0x50] ss:$20 sps:$4 sm:$0xff]   ;;  %v1291_v50 = vld [vmem:[%s1768_s0 + $0x78] ss:$20 sps:$4 sm:$0xff]  }
  0x10   :  { %1070 = vmatpush3.bf16.msra.mxu0 %v1249_v14  ;;  %v1280_v41 = vld [vmem:[%s1768_s0 + $0x54] ss:$20 sps:$4 sm:$0xff]   ;;  %v1282_v43 = vld [vmem:[%s1768_s0 + $0x5c] ss:$20 sps:$4 sm:$0xff]   ;;  %v1289_v48 = vld [vmem:[%s1768_s0 + $0x84] ss:$20 sps:$4 sm:$0xff]  }
  0x11   :  { %1134 = vmatpush3.bf16.msra.mxu1 %v1250_v15  ;;  %1071 = vmatprep.subr.bf16.mxu0 %v1251_v16  ;;  %v1299_v46 = vld [vmem:[%s1767_s1 + $0x110] sm:$0xff]   ;;  %v1312_v49 = vld [vmem:[%s1767_s1 + $0x118] sm:$0xff]   ;;  %v1295_v53 = vld [vmem:[%s1768_s0 + $0xac] ss:$20 sps:$4 sm:$0xff]  }
  0x12   :  { %1135 = vmatprep.subr.bf16.mxu1 %v1252_v17  ;;  %v1287_v47 = vld [vmem:[%s1768_s0 + $0x7c] ss:$20 sps:$4 sm:$0xff]   ;;  %v1292_v51 = vld [vmem:[%s1768_s0 + $0x80] ss:$20 sps:$4 sm:$0xff]   ;;  %v1293_v52 = vld [vmem:[%s1768_s0 + $0xa4] ss:$20 sps:$4 sm:$0xff]  }
  0x13   :  { %v1297_v54 = vld [vmem:[%s1768_s0 + $0xa0] ss:$20 sps:$4 sm:$0xff]   ;;  %v1298_v55 = vld [vmem:[%s1768_s0 + $0xa8] ss:$20 sps:$4 sm:$0xff]   ;;  %v1305_v59 = vld [vmem:[%s1768_s0 + $0xd0] ss:$20 sps:$4 sm:$0xff]  }
  0x14   :  { %1072 = vmatpush3.bf16.msra.mxu0 %v1253_v18  ;;  %v1300_v56 = vld [vmem:[%s1768_s0 + $0xcc] ss:$20 sps:$4 sm:$0xff]   ;;  %v1302_v57 = vld [vmem:[%s1768_s0 + $0xd4] ss:$20 sps:$4 sm:$0xff]   ;;  %v1308_v61 = vld [vmem:[%s1768_s0 + $0xfc] ss:$20 sps:$4 sm:$0xff]  }
  0x15   :  { %1136 = vmatpush3.bf16.msra.mxu1 %v1254_v19  ;;  %1073 = vmatprep.subr.bf16.mxu0 %v1255_v20  ;;  %v1304_v58 = vld [vmem:[%s1768_s0 + $0xc8] ss:$20 sps:$4 sm:$0xff]   ;;  %v1310_v62 = vld [vmem:[%s1768_s0 + $0xf0] ss:$20 sps:$4 sm:$0xff]   ;;  %v1311_v63 = vld [vmem:[%s1768_s0 + $0xf8] ss:$20 sps:$4 sm:$0xff]  }
  0x16   :  { %1137 = vmatprep.subr.bf16.mxu1 %v1256_v21  ;;  %v1306_v60 = vld [vmem:[%s1768_s0 + $0xf4] ss:$20 sps:$4 sm:$0xff]   ;;  %v1313_v0 = vld [vmem:[%s1768_s0 + $0x11c] ss:$20 sps:$4 sm:$0xff]   ;;  %v1315_v1 = vld [vmem:[%s1768_s0 + $0x124] ss:$20 sps:$4 sm:$0xff]  }
  0x17   :  { %v1317_v2 = vld [vmem:[%s1768_s0 + $0x118] ss:$20 sps:$4 sm:$0xff]   ;;  %v1318_v3 = vld [vmem:[%s1768_s0 + $0x120] ss:$20 sps:$4 sm:$0xff]   ;;  %v1319_v4 = vld [vmem:[%s1768_s0 + $0x10] ss:$20 sps:$4 sm:$0xff]  }
  0x18   :  { %1074 = vmatpush3.bf16.msra.mxu0 %v1257_v22  ;;  %v1320_v5 = vld [vmem:[%s1768_s0 + $0xb0] ss:$20 sps:$4 sm:$0xff]   ;;  %v1321_v6 = vld [vmem:[%s1768_s0 + $0x38] ss:$20 sps:$4 sm:$0xff]   ;;  %v1323_v8 = vld [vmem:[%s1768_s0 + $0x60] ss:$20 sps:$4 sm:$0xff]  }
  0x19   :  { %1138 = vmatpush3.bf16.msra.mxu1 %v1258_v23  ;;  %1075 = vmatprep.subr.bf16.mxu0 %v1259_v24  ;;  %v1322_v7 = vld [vmem:[%s1768_s0 + $0xd8] ss:$20 sps:$4 sm:$0xff]   ;;  %v1324_v9 = vld [vmem:[%s1768_s0 + $0x100] ss:$20 sps:$4 sm:$0xff]   ;;  %v1325_v10 = vld [vmem:[%s1768_s0 + $0x88] ss:$20 sps:$4 sm:$0xff]  }
  0x1a   :  { %1139 = vmatprep.subr.bf16.mxu1 %v1260_v25  ;;  %v1326_v11 = vld [vmem:[%s1768_s0 + $0x128] ss:$20 sps:$4 sm:$0xff]   ;;  %v1591_v14 = vld [vmem:[%s1769_s2] ss:$0 sm:$0xff] }
  0x1c   :  { %1076 = vmatpush3.bf16.msra.mxu0 %v1261_v26 }
  0x1d   :  { %1140 = vmatpush3.bf16.msra.mxu1 %v1262_v27  ;;  %1077 = vmatprep.subr.bf16.mxu0 %v1263_v28 }
  0x1e   :  { %1141 = vmatprep.subr.bf16.mxu1 %v1264_v29 }
  0x20   :  { %1078 = vmatpush3.bf16.msra.mxu0 %v1265_v30 }
  0x21   :  { %1142 = vmatpush3.bf16.msra.mxu1 %v1266_v31  ;;  %1203 = vmatprep.subr.bf16.mxu0 %v1273_v36 }
  0x22   :  { %1227 = vmatprep.subr.bf16.mxu1 %v1273_v36 }
  0x23   :  { %619 = vmatmul.mubr.bf16.vlgmr.msra.gmra.mrb[0].mxu0 %v1267_v32 }
  0x24   :  { %716 = vmatmul.mubr.bf16.vlgmr.msra.gmra.mrb[0].mxu1 %v1270_v34  ;;  %1204 = vmatpush3.bf16.msra.mxu0 %v1273_v36 }
  0x25   :  { %1231 = vmatpush3.bf16.msra.mxu1 %v1273_v36  ;;  %626 = vmatprep.mubr.bf16.mxu0 %v1274_v37 }
  0x26   :  { %723 = vmatprep.mubr.bf16.mxu1 %v1276_v38  ;;  %1205 = vmatprep.subr.bf16.mxu0 %v1286_v42 }
  0x27   :  { %1228 = vmatprep.subr.bf16.mxu1 %v1286_v42 }
  0x28   :  { %1206 = vmatpush3.bf16.msra.mxu0 %v1286_v42 }
  0x29   :  { %1232 = vmatpush3.bf16.msra.mxu1 %v1286_v42  ;;  %1207 = vmatprep.subr.bf16.mxu0 %v1299_v46 }
  0x2a   :  { %1229 = vmatprep.subr.bf16.mxu1 %v1299_v46 }
  0x2b   :  { %627 = vmatmul.mubr.bf16.gmra.mrb[4].mxu0 %v1278_v39 }
  0x2c   :  { %724 = vmatmul.mubr.bf16.gmra.mrb[4].mxu1 %v1279_v40  ;;  %634 = vmatprep.mubr.bf16.mxu0 %v1280_v41 }
  0x2d   :  { %731 = vmatprep.mubr.bf16.mxu1 %v1282_v43  ;;  %1208 = vmatpush3.bf16.msra.mxu0 %v1299_v46 }
  0x2e   :  { %1233 = vmatpush3.bf16.msra.mxu1 %v1299_v46  ;;  %1209 = vmatprep.subr.bf16.mxu0 %v1312_v49 }
  0x2f   :  { %1230 = vmatprep.subr.bf16.mxu1 %v1312_v49 }
  0x31   :  { %1210 = vmatpush3.bf16.msra.mxu0 %v1312_v49 }
  0x32   :  { %1234 = vmatpush3.bf16.msra.mxu1 %v1312_v49 }
  0x33   :  { %635 = vmatmul.mubr.bf16.gmra.mrb[8].mxu0 %v1284_v44 }
  0x34   :  { %732 = vmatmul.mubr.bf16.gmra.mrb[8].mxu1 %v1285_v45  ;;  %642 = vmatprep.mubr.bf16.mxu0 %v1287_v47 }
  0x35   :  { %739 = vmatprep.mubr.bf16.mxu1 %v1289_v48 }
  0x3b   :  { %643 = vmatmul.mubr.bf16.gmra.mrb[12].mxu0 %v1291_v50 }
  0x3c   :  { %740 = vmatmul.mubr.bf16.gmra.mrb[12].mxu1 %v1292_v51  ;;  %650 = vmatprep.mubr.bf16.mxu0 %v1293_v52 }
  0x3d   :  { %747 = vmatprep.mubr.bf16.mxu1 %v1295_v53 }
  0x43   :  { %651 = vmatmul.mubr.bf16.gmra.mrb[16].mxu0 %v1297_v54 }
  0x44   :  { %748 = vmatmul.mubr.bf16.gmra.mrb[16].mxu1 %v1298_v55  ;;  %658 = vmatprep.mubr.bf16.mxu0 %v1300_v56 }
  0x45   :  { %755 = vmatprep.mubr.bf16.mxu1 %v1302_v57 }
  0x4b   :  { %659 = vmatmul.mubr.bf16.gmra.mrb[20].mxu0 %v1304_v58 }
  0x4c   :  { %756 = vmatmul.mubr.bf16.gmra.mrb[20].mxu1 %v1305_v59  ;;  %666 = vmatprep.mubr.bf16.mxu0 %v1306_v60 }
  0x4d   :  { %763 = vmatprep.mubr.bf16.mxu1 %v1308_v61 }
  0x53   :  { %667 = vmatmul.mubr.bf16.gmra.mrb[24].mxu0 %v1310_v62 }
  0x54   :  { %764 = vmatmul.mubr.bf16.gmra.mrb[24].mxu1 %v1311_v63  ;;  %674 = vmatprep.mubr.bf16.mxu0 %v1313_v0 }
  0x55   :  { %771 = vmatprep.mubr.bf16.mxu1 %v1315_v1 }
  0x5b   :  { %675 = vmatmul.mubr.bf16.gmra.mrb[28].mxu0 %v1317_v2 }
  0x5c   :  { %772 = vmatmul.mubr.bf16.gmra.mrb[28].mxu1 %v1318_v3  ;;  %1211 = vmatprep.mubr.msk.bf16.mxu0 %vm561_vm0, %v1319_v4 }
  0x5d   :  { %1219 = vmatprep.mubr.msk.bf16.mxu1 %vm561_vm0, %v1320_v5 }
  0x63   :  { %1212 = vmatmul.mubr.msk.bf16.vlgmr.msra.gmra.mrb[32].mxu0 %vm561_vm0, %v1321_v6 }
  0x64   :  { %1220 = vmatmul.mubr.msk.bf16.vlgmr.msra.gmra.mrb[32].mxu1 %vm561_vm0, %v1322_v7  ;;  %1215 = vmatprep.mubr.msk.bf16.mxu0 %vm561_vm0, %v1323_v8 }
  0x65   :  { %1223 = vmatprep.mubr.msk.bf16.mxu1 %vm561_vm0, %v1324_v9 }
  0x6b   :  { %1216 = vmatmul.mubr.msk.bf16.gmra.mrb[36].mxu0 %vm561_vm0, %v1325_v10 }
  0x6c   :  { %1224 = vmatmul.mubr.msk.bf16.gmra.mrb[36].mxu1 %vm561_vm0, %v1326_v11 }
  0xf6   :  { %v1079_v12 = vpop.f32.mrb[0].mxu0 }
  0xf7   :  { %v1143_v13 = vpop.f32.mrb[0].mxu1  ;;  %v1080_v15 = vpop.f32.mrb[1].mxu0 }
  0xf8   :  { %v1081_v16 = vadd.f32 %v1080_v15, %v1079_v12  ;;  %v1144_v17 = vpop.f32.mrb[1].mxu1  ;;  %v1082_v18 = vpop.f32.mrb[2].mxu0 }
  0xf9   :  { %v1145_v19 = vadd.f32 %v1144_v17, %v1143_v13  ;;  %v1146_v20 = vpop.f32.mrb[2].mxu1  ;;  %v1083_v21 = vpop.f32.mrb[3].mxu0 }
  0xfa   :  { %v621_v22 = vadd.f32 %v1081_v16, %v1591_v14  ;;  %v1084_v23 = vadd.f32 %v1083_v21, %v1082_v18  ;;  %v1147_v24 = vpop.f32.mrb[3].mxu1 }
  0xfb   :  { %v1148_v25 = vadd.f32 %v1147_v24, %v1146_v20 }
  0xfc   :  { %v624_v26 = vadd.f32 %v1084_v23, %v1591_v14  ;;  %v1595_v27 = vadd.f32 %v1145_v19, %v621_v22 }
  0xfe   :  { %v1085_v28 = vpop.f32.mrb[4].mxu0  ;;  %v1597_v29 = vadd.f32 %v1148_v25, %v624_v26 }
  0xff   :  { %v1149_v30 = vpop.f32.mrb[4].mxu1  ;;  %v1086_v31 = vpop.f32.mrb[5].mxu0 }
 0x100   :  { %v1087_v32 = vadd.f32 %v1086_v31, %v1085_v28  ;;  %v1150_v33 = vpop.f32.mrb[5].mxu1  ;;  %v1088_v34 = vpop.f32.mrb[6].mxu0 }
 0x101   :  { %v1151_v35 = vadd.f32 %v1150_v33, %v1149_v30  ;;  %v1152_v36 = vpop.f32.mrb[6].mxu1  ;;  %v1089_v37 = vpop.f32.mrb[7].mxu0 }
 0x102   :  { %v629_v38 = vadd.f32 %v1087_v32, %v1591_v14  ;;  %v1090_v39 = vadd.f32 %v1089_v37, %v1088_v34  ;;  %v1153_v40 = vpop.f32.mrb[7].mxu1 }
 0x103   :  { %v1154_v41 = vadd.f32 %v1153_v40, %v1152_v36 }
 0x104   :  { %v632_v42 = vadd.f32 %v1090_v39, %v1591_v14  ;;  %v1601_v43 = vadd.f32 %v1151_v35, %v629_v38 }
 0x106   :  { %v1091_v44 = vpop.f32.mrb[8].mxu0  ;;  %v1603_v45 = vadd.f32 %v1154_v41, %v632_v42 }
 0x107   :  { %v1155_v46 = vpop.f32.mrb[8].mxu1  ;;  %v1092_v47 = vpop.f32.mrb[9].mxu0 }
 0x108   :  { %v1093_v48 = vadd.f32 %v1092_v47, %v1091_v44  ;;  %v1156_v49 = vpop.f32.mrb[9].mxu1  ;;  %v1094_v50 = vpop.f32.mrb[10].mxu0 }
 0x109   :  { %v1157_v51 = vadd.f32 %v1156_v49, %v1155_v46  ;;  %v1158_v52 = vpop.f32.mrb[10].mxu1  ;;  %v1095_v53 = vpop.f32.mrb[11].mxu0 }
 0x10a   :  { %v637_v54 = vadd.f32 %v1093_v48, %v1591_v14  ;;  %v1096_v55 = vadd.f32 %v1095_v53, %v1094_v50  ;;  %v1159_v56 = vpop.f32.mrb[11].mxu1 }
 0x10b   :  { %v1160_v57 = vadd.f32 %v1159_v56, %v1158_v52 }
 0x10c   :  { %v640_v58 = vadd.f32 %v1096_v55, %v1591_v14  ;;  %v1607_v59 = vadd.f32 %v1157_v51, %v637_v54 }
 0x10e   :  { %v1097_v60 = vpop.f32.mrb[12].mxu0  ;;  %v1609_v61 = vadd.f32 %v1160_v57, %v640_v58 }
 0x10f   :  { %v1161_v62 = vpop.f32.mrb[12].mxu1  ;;  %v1098_v63 = vpop.f32.mrb[13].mxu0 }
 0x110   :  { %v1099_v0 = vadd.f32 %v1098_v63, %v1097_v60  ;;  %v1162_v1 = vpop.f32.mrb[13].mxu1  ;;  %v1100_v2 = vpop.f32.mrb[14].mxu0 }
 0x111   :  { %v1163_v3 = vadd.f32 %v1162_v1, %v1161_v62  ;;  %v1164_v4 = vpop.f32.mrb[14].mxu1  ;;  %v1101_v5 = vpop.f32.mrb[15].mxu0 }
 0x112   :  { %v645_v6 = vadd.f32 %v1099_v0, %v1591_v14  ;;  %v1102_v7 = vadd.f32 %v1101_v5, %v1100_v2  ;;  %v1165_v8 = vpop.f32.mrb[15].mxu1 }
 0x113   :  { %v1166_v9 = vadd.f32 %v1165_v8, %v1164_v4 }
 0x114   :  { %v648_v10 = vadd.f32 %v1102_v7, %v1591_v14  ;;  %v1613_v11 = vadd.f32 %v1163_v3, %v645_v6 }
 0x116   :  { %v1103_v12 = vpop.f32.mrb[16].mxu0  ;;  %v1615_v13 = vadd.f32 %v1166_v9, %v648_v10 }
 0x117   :  { %v1167_v15 = vpop.f32.mrb[16].mxu1  ;;  %v1104_v16 = vpop.f32.mrb[17].mxu0 }
 0x118   :  { %v1105_v17 = vadd.f32 %v1104_v16, %v1103_v12  ;;  %v1168_v18 = vpop.f32.mrb[17].mxu1  ;;  %v1106_v19 = vpop.f32.mrb[18].mxu0 }
 0x119   :  { %v1169_v20 = vadd.f32 %v1168_v18, %v1167_v15  ;;  %v1170_v21 = vpop.f32.mrb[18].mxu1  ;;  %v1107_v22 = vpop.f32.mrb[19].mxu0 }
 0x11a   :  { %v653_v23 = vadd.f32 %v1105_v17, %v1591_v14  ;;  %v1108_v24 = vadd.f32 %v1107_v22, %v1106_v19  ;;  %v1171_v25 = vpop.f32.mrb[19].mxu1 }
 0x11b   :  { %v1172_v26 = vadd.f32 %v1171_v25, %v1170_v21 }
 0x11c   :  { %v656_v28 = vadd.f32 %v1108_v24, %v1591_v14  ;;  %v1619_v30 = vadd.f32 %v1169_v20, %v653_v23 }
 0x11e   :  { %v1109_v31 = vpop.f32.mrb[20].mxu0  ;;  %v1621_v32 = vadd.f32 %v1172_v26, %v656_v28  ;;  %v927_v28 = vld [vmem:[%s1770_s3 + $0x10] sm:$0xff] }
 0x11f   :  { %v1173_v33 = vpop.f32.mrb[20].mxu1  ;;  %v1110_v34 = vpop.f32.mrb[21].mxu0 }
 0x120   :  { %v1111_v35 = vadd.f32 %v1110_v34, %v1109_v31  ;;  %v1174_v36 = vpop.f32.mrb[21].mxu1  ;;  %v1112_v37 = vpop.f32.mrb[22].mxu0 }
 0x121   :  { %v1175_v38 = vadd.f32 %v1174_v36, %v1173_v33  ;;  %v1176_v39 = vpop.f32.mrb[22].mxu1  ;;  %v1113_v40 = vpop.f32.mrb[23].mxu0  ;;  %v935_v33 = vld [vmem:[%s1770_s3 + $0x50] sm:$0xff] }
 0x122   :  { %v661_v41 = vadd.f32 %v1111_v35, %v1591_v14  ;;  %v1114_v42 = vadd.f32 %v1113_v40, %v1112_v37  ;;  %v1177_v44 = vpop.f32.mrb[23].mxu1 }
 0x123   :  { %v1178_v46 = vadd.f32 %v1177_v44, %v1176_v39 }
 0x124   :  { %v664_v47 = vadd.f32 %v1114_v42, %v1591_v14  ;;  %v758_v48 = vadd.f32 %v1175_v38, %v661_v41 }
 0x126   :  { %v1115_v49 = vpop.f32.mrb[24].mxu0  ;;  %v1625_v50 = vadd.f32 %v1178_v46, %v664_v47  ;;  %v933_v46 = vld [vmem:[%s1770_s3 + $0x40] sm:$0xff] }
 0x127   :  { %v1179_v51 = vpop.f32.mrb[24].mxu1  ;;  %v1116_v52 = vpop.f32.mrb[25].mxu0 }
 0x128   :  { %v1117_v53 = vadd.f32 %v1116_v52, %v1115_v49  ;;  %v1180_v54 = vpop.f32.mrb[25].mxu1  ;;  %v1118_v55 = vpop.f32.mrb[26].mxu0 }
 0x129   :  { %v1181_v56 = vadd.f32 %v1180_v54, %v1179_v51  ;;  %v1182_v57 = vpop.f32.mrb[26].mxu1  ;;  %v1119_v58 = vpop.f32.mrb[27].mxu0 }
 0x12a   :  { %v669_v60 = vadd.f32 %v1117_v53, %v1591_v14  ;;  %v1120_v62 = vadd.f32 %v1119_v58, %v1118_v55  ;;  %v1183_v63 = vpop.f32.mrb[27].mxu1  ;;  %v936_v58 = vld [vmem:[%s1770_s3 + $0x58] sm:$0xff] }
 0x12b   :  { %v1184_v0 = vadd.f32 %v1183_v63, %v1182_v57 }
 0x12c   :  { %v672_v1 = vadd.f32 %v1120_v62, %v1591_v14  ;;  %v1629_v2 = vadd.f32 %v1181_v56, %v669_v60  ;;  %v926_v62 = vld [vmem:[%s1770_s3 + $0x8] sm:$0xff] }
 0x12e   :  { %v1121_v3 = vpop.f32.mrb[28].mxu0  ;;  %v1631_v4 = vadd.f32 %v1184_v0, %v672_v1  ;;  %v934_v1 = vld [vmem:[%s1770_s3 + $0x48] sm:$0xff] }
 0x12f   :  { %v1185_v5 = vpop.f32.mrb[28].mxu1  ;;  %v1122_v6 = vpop.f32.mrb[29].mxu0 }
 0x130   :  { %v1123_v7 = vadd.f32 %v1122_v6, %v1121_v3  ;;  %v1186_v8 = vpop.f32.mrb[29].mxu1  ;;  %v1124_v9 = vpop.f32.mrb[30].mxu0 }
 0x131   :  { %v1187_v10 = vadd.f32 %v1186_v8, %v1185_v5  ;;  %v1188_v12 = vpop.f32.mrb[30].mxu1  ;;  %v1125_v15 = vpop.f32.mrb[31].mxu0 }
 0x132   :  { %v677_v16 = vadd.f32 %v1123_v7, %v1591_v14  ;;  %v1126_v17 = vadd.f32 %v1125_v15, %v1124_v9  ;;  %v1189_v18 = vpop.f32.mrb[31].mxu1 }
 0x133   :  { %v1190_v19 = vadd.f32 %v1189_v18, %v1188_v12 }
 0x134   :  { %v680_v20 = vadd.f32 %v1126_v17, %v1591_v14  ;;  %v1635_v21 = vadd.f32 %v1187_v10, %v677_v16 }
 0x136   :  { %v1213_v22 = vpop.f32.mrb[32].mxu0  ;;  %v1637_v23 = vadd.f32 %v1190_v19, %v680_v20 }
 0x137   :  { %v823_v24 = vadd.f32 %v1213_v22, %v1601_v43  ;;  %v1221_v25 = vpop.f32.mrb[32].mxu1  ;;  %v814_v26 = vpop.f32.mrb[33].mxu0  ;;  %v925_v43 = vld [vmem:[%s1770_s3] sm:$0xff] }
 0x138   :  { %v855_v31 = vadd.f32 %v1221_v25, %v758_v48  ;;  %v815_v14 = vadd.f32 %v814_v26, %v1595_v27  ;;  %v846_v34 = vpop.f32.mrb[33].mxu1  ;;  %v1214_v35 = vpop.f32.mrb[34].mxu0 }
 0x139   :  { %vm879_vm2 = vcmp.ge.f32.partialorder %v823_v24, 0.0  ;;  %v895_v36 = vmul.f32 0.2, %v823_v24  ;;  %v847_v37 = vadd.f32 %v846_v34, %v1619_v30  ;;  %v826_v38 = vadd.f32 %v1214_v35, %v1603_v45  ;;  %v1222_v39 = vpop.f32.mrb[34].mxu1  ;;  %v817_v40 = vpop.f32.mrb[35].mxu0  ;;  %v928_v45 = vld [vmem:[%s1770_s3 + $0x18] sm:$0xff] }
 0x13a   :  { %vm887_vm3 = vcmp.ge.f32.partialorder %v855_v31, 0.0  ;;  %v903_v41 = vmul.f32 0.2, %v855_v31  ;;  %vm877_vm4 = vcmp.ge.f32.partialorder %v815_v14, 0.0  ;;  %v893_v42 = vmul.f32 0.2, %v815_v14 }
 0x13b   :  { %v911_v44 = vsel %vm879_vm2, %v823_v24, %v895_v36  ;;  %vm885_vm5 = vcmp.ge.f32.partialorder %v847_v37, 0.0  ;;  %v901_v27 = vmul.f32 0.2, %v847_v37  ;;  %vm880_vm6 = vcmp.ge.f32.partialorder %v826_v38, 0.0  ;;  %v849_v47 = vpop.f32.mrb[35].mxu1 }
 0x13c   :  { %v943_v48 = vadd.f32 %v927_v28, %v911_v44  ;;  %v919_v49 = vsel %vm887_vm3, %v855_v31, %v903_v41  ;;  %v909_v30 = vsel %vm877_vm4, %v815_v14, %v893_v42  ;;  %v896_v51 = vmul.f32 0.2, %v826_v38  ;;  %v939_v28 = vld [vmem:[%s1770_s3 + $0x70] sm:$0xff]  ;;  %v929_v14 = vld [vmem:[%s1770_s3 + $0x20] sm:$0xff] }
 0x13d   :  { %v951_v52 = vadd.f32 %v935_v33, %v919_v49  ;;  %v941_v53 = vadd.f32 %v925_v43, %v909_v30  ;;  %v917_v54 = vsel %vm885_vm5, %v847_v37, %v901_v27  ;;  %v858_v55 = vadd.f32 %v1222_v39, %v1625_v50 }
 0x13e   :  { %960 = vst.msk [vmem:[%s1771_s4 + $0x10] sm:$0xff] %vm957_vm1, %v943_v48  ;;  %v949_v56 = vadd.f32 %v933_v46, %v917_v54  ;;  %v912_v57 = vsel %vm880_vm6, %v826_v38, %v896_v51  ;;  %v818_v60 = vadd.f32 %v817_v40, %v1597_v29  ;;  %v850_v63 = vadd.f32 %v849_v47, %v1621_v32  ;;  %v1217_v50 = vpop.f32.mrb[36].mxu0  ;;  %v930_v46 = vld [vmem:[%s1770_s3 + $0x28] sm:$0xff] }
 0x13f   :  { %968 = vst.msk [vmem:[%s1771_s4 + $0x50] sm:$0xff] %vm957_vm1, %v951_v52  ;;  %958 = vst.msk [vmem:[%s1771_s4] sm:$0xff] %vm957_vm1, %v941_v53  ;;  %v944_v0 = vadd.f32 %v928_v45, %v912_v57  ;;  %vm888_vm7 = vcmp.ge.f32.partialorder %v858_v55, 0.0  ;;  %v904_v29 = vmul.f32 0.2, %v858_v55  ;;  %v839_v32 = vadd.f32 %v1217_v50, %v1613_v11  ;;  %v1225_v3 = vpop.f32.mrb[36].mxu1 }
 0x140   :  { %v830_v5 = vpop.f32.mrb[37].mxu0  ;;  %966 = vst.msk [vmem:[%s1771_s4 + $0x40] sm:$0xff] %vm957_vm1, %v949_v56  ;;  %vm878_vm8 = vcmp.ge.f32.partialorder %v818_v60, 0.0  ;;  %v894_v6 = vmul.f32 0.2, %v818_v60  ;;  %vm886_vm9 = vcmp.ge.f32.partialorder %v850_v63, 0.0  ;;  %v871_v10 = vadd.f32 %v1225_v3, %v1635_v21 }
 0x141   :  { %v902_v7 = vmul.f32 0.2, %v850_v63  ;;  %961 = vst.msk [vmem:[%s1771_s4 + $0x18] sm:$0xff] %vm957_vm1, %v944_v0  ;;  %v920_v8 = vsel %vm888_vm7, %v858_v55, %v904_v29  ;;  %vm883_vm10 = vcmp.ge.f32.partialorder %v839_v32, 0.0  ;;  %v899_v9 = vmul.f32 0.2, %v839_v32 }
 0x142   :  { %v931_v11 = vld [vmem:[%s1770_s3 + $0x30] sm:$0xff]  ;;  %v862_v12 = vpop.f32.mrb[37].mxu1  ;;  %v1218_v15 = vpop.f32.mrb[38].mxu0  ;;  %v952_v16 = vadd.f32 %v936_v58, %v920_v8  ;;  %v910_v17 = vsel %vm878_vm8, %v818_v60, %v894_v6  ;;  %v831_v19 = vadd.f32 %v830_v5, %v1607_v59  ;;  %vm891_vm11 = vcmp.ge.f32.partialorder %v871_v10, 0.0  ;;  %v938_v51 = vld [vmem:[%s1770_s3 + $0x68] sm:$0xff] }
 0x143   :  { %v918_v18 = vsel %vm886_vm9, %v850_v63, %v902_v7  ;;  %v1226_v20 = vpop.f32.mrb[38].mxu1  ;;  %v833_v22 = vpop.f32.mrb[39].mxu0  ;;  %v942_v24 = vadd.f32 %v926_v62, %v910_v17  ;;  %v915_v26 = vsel %vm883_vm10, %v839_v32, %v899_v9  ;;  %v907_v33 = vmul.f32 0.2, %v871_v10 }
 0x144   :  { %v950_v25 = vadd.f32 %v934_v1, %v918_v18  ;;  %v865_v31 = vpop.f32.mrb[39].mxu1  ;;  %969 = vst.msk [vmem:[%s1771_s4 + $0x58] sm:$0xff] %vm957_vm1, %v952_v16  ;;  %v947_v21 = vadd.f32 %v931_v11, %v915_v26  ;;  %vm881_vm12 = vcmp.ge.f32.partialorder %v831_v19, 0.0  ;;  %v897_v59 = vmul.f32 0.2, %v831_v19 }
 0x145   :  { %959 = vst.msk [vmem:[%s1771_s4 + $0x8] sm:$0xff] %vm957_vm1, %v942_v24  ;;  %v863_v34 = vadd.f32 %v862_v12, %v1629_v2  ;;  %v842_v35 = vadd.f32 %v1218_v15, %v1615_v13  ;;  %v874_v36 = vadd.f32 %v1226_v20, %v1637_v23  ;;  %v834_v43 = vadd.f32 %v833_v22, %v1609_v61  ;;  %v937_v13 = vld [vmem:[%s1770_s3 + $0x60] sm:$0xff]  ;;  %v932_v61 = vld [vmem:[%s1770_s3 + $0x38] sm:$0xff] }
 0x146   :  { %967 = vst.msk [vmem:[%s1771_s4 + $0x48] sm:$0xff] %vm957_vm1, %v950_v25  ;;  %964 = vst.msk [vmem:[%s1771_s4 + $0x30] sm:$0xff] %vm957_vm1, %v947_v21  ;;  %v923_v37 = vsel %vm891_vm11, %v871_v10, %v907_v33  ;;  %v913_v38 = vsel %vm881_vm12, %v831_v19, %v897_v59  ;;  %v866_v39 = vadd.f32 %v865_v31, %v1631_v4  ;;  %v940_v23 = vld [vmem:[%s1770_s3 + $0x78] sm:$0xff] }
 0x147   :  { %v955_v40 = vadd.f32 %v939_v28, %v923_v37  ;;  %v945_v41 = vadd.f32 %v929_v14, %v913_v38  ;;  %vm889_vm13 = vcmp.ge.f32.partialorder %v863_v34, 0.0  ;;  %v905_v2 = vmul.f32 0.2, %v863_v34 }
 0x148   :  { %vm884_vm14 = vcmp.ge.f32.partialorder %v842_v35, 0.0  ;;  %v900_v42 = vmul.f32 0.2, %v842_v35  ;;  %vm892_vm15 = vcmp.ge.f32.partialorder %v874_v36, 0.0  ;;  %v908_v4 = vmul.f32 0.2, %v874_v36 }
 0x149   :  { %972 = vst.msk [vmem:[%s1771_s4 + $0x70] sm:$0xff] %vm957_vm1, %v955_v40  ;;  %962 = vst.msk [vmem:[%s1771_s4 + $0x20] sm:$0xff] %vm957_vm1, %v945_v41  ;;  %v921_v44 = vsel %vm889_vm13, %v863_v34, %v905_v2  ;;  %vm882_vm0 = vcmp.ge.f32.partialorder %v834_v43, 0.0  ;;  %v898_v27 = vmul.f32 0.2, %v834_v43  ;;  %vm890_vm2 = vcmp.ge.f32.partialorder %v866_v39, 0.0 }
 0x14a   :  { %v953_v47 = vadd.f32 %v937_v13, %v921_v44  ;;  %v916_v48 = vsel %vm884_vm14, %v842_v35, %v900_v42  ;;  %v924_v49 = vsel %vm892_vm15, %v874_v36, %v908_v4  ;;  %v906_v30 = vmul.f32 0.2, %v866_v39 }
 0x14b   :  { %v948_v45 = vadd.f32 %v932_v61, %v916_v48  ;;  %v956_v52 = vadd.f32 %v940_v23, %v924_v49  ;;  %v914_v53 = vsel %vm882_vm0, %v834_v43, %v898_v27 }
 0x14c   :  { %970 = vst.msk [vmem:[%s1771_s4 + $0x60] sm:$0xff] %vm957_vm1, %v953_v47  ;;  %v946_v54 = vadd.f32 %v930_v46, %v914_v53  ;;  %v922_v55 = vsel %vm890_vm2, %v866_v39, %v906_v30 }
 0x14d   :  { %965 = vst.msk [vmem:[%s1771_s4 + $0x38] sm:$0xff] %vm957_vm1, %v948_v45  ;;  %973 = vst.msk [vmem:[%s1771_s4 + $0x78] sm:$0xff] %vm957_vm1, %v956_v52  ;;  %v954_v56 = vadd.f32 %v938_v51, %v922_v55 }
 0x14e   :  { %963 = vst.msk [vmem:[%s1771_s4 + $0x28] sm:$0xff] %vm957_vm1, %v946_v54 }
 0x14f   :  { %971 = vst.msk [vmem:[%s1771_s4 + $0x68] sm:$0xff] %vm957_vm1, %v954_v56 }

// kernel: discriminator_forward.16
= control target key start
LH: loop header
LB: loop body
LE: loop exit
PB: predicated region body
PF: predicated region fallthrough
CT: control target
= control target key end

     0   :  { %s1716_s15 = smov 0   ;;  %s2046_s0 = inlined_call_operand.vmem [shape: bf16[512,288], index: 0, kind: input, shape index: {}]   ;;  %s2047_s1 = inlined_call_operand.vmem [shape: bf16[288,16], index: 1, kind: input, shape index: {}]   ;;  %s2048_s2 = inlined_call_operand.vmem [shape: f32[1,16], index: 2, kind: input, shape index: {}]   ;;  %s2049_s3 = inlined_call_operand.vmem [shape: f32[512,16], index: 3, kind: input, shape index: {}]   ;;  %s2050_s4 = inlined_call_operand.vmem [shape: f32[512,16], index: 4, kind: output, shape index: {}]  }
   0x1 LB: > { %s1314_s16 = sadd.s32 4294967295, %s1689_s15   ;;  %p1318_p0 = scmp.ge.s32.totalorder %s1689_s15, 1  ;;  %s1689_s15 = sphi %s1716_s15, %s14_s15  }
   0x2   : > { %p175_p1 = scmp.lt.s32.totalorder %s1689_s15, 3 }
   0x4   : > { %p176_p2 = pnand %p1318_p0, %p175_p1 }
   0x5   : > { %v1601_v0 = vld [vmem:[%s2047_s1 + $0x40] sm:$0xff] (!%p176_p2)   ;;  %s1319_s19 = sshll.u32 (!%p176_p2), %s1314_s16, 5  ;;  %v1603_v2 = vld [vmem:[%s2047_s1 + $0x48] sm:$0xff] (!%p176_p2)   ;;  %v1605_v4 = vld [vmem:[%s2047_s1 + $0x50] sm:$0xff] (!%p176_p2)   ;;  %vm682_vm0 = vcmask (!%p176_p2), 261120   ;;  %vm1213_vm3 = vcmask (!%p176_p2), 130048  }
   0x6   : > { %179 = sbr.rel (%p176_p2) target bundleno = 355 (0x163), region = 36  ;;  %v1602_v1 = vld [vmem:[%s2047_s1] sm:$0xff] (!%p176_p2)   ;;  %1410 = vmatprep.subr.bf16.mxu0 (!%p176_p2), %v1601_v0  ;;  %1576 = vmatprep.subr.bf16.mxu1 (!%p176_p2), %v1601_v0  ;;  %p208_p3 = scmp.lt.s32.totalorder (!%p176_p2), %s1319_s19, 63  ;;  %v1604_v3 = vld [vmem:[%s2047_s1 + $0x8] sm:$0xff] (!%p176_p2)   ;;  %v1606_v5 = vld [vmem:[%s2047_s1 + $0x10] sm:$0xff] (!%p176_p2)  }
   0x7   : > { %1411 = vmatpush3.bf16.msra.mxu0 (!%p176_p2), %v1602_v1  ;;  %1584 = vmatpush3.bf16.msra.mxu1 (!%p176_p2), %v1602_v1  ;;  %v1607_v6 = vld [vmem:[%s2047_s1 + $0x58] sm:$0xff] (!%p176_p2)   ;;  %v1609_v8 = vld [vmem:[%s2047_s1 + $0x60] sm:$0xff] (!%p176_p2)   ;;  %v1611_v10 = vld [vmem:[%s2047_s1 + $0x68] sm:$0xff] (!%p176_p2)  }
   0x8   : > { %1412 = vmatprep.subr.bf16.mxu0 (!%p176_p2), %v1603_v2  ;;  %1577 = vmatprep.subr.bf16.mxu1 (!%p176_p2), %v1603_v2  ;;  %v1608_v7 = vld [vmem:[%s2047_s1 + $0x18] sm:$0xff] (!%p176_p2)   ;;  %v1610_v9 = vld [vmem:[%s2047_s1 + $0x20] sm:$0xff] (!%p176_p2)   ;;  %v1612_v13 = vld [vmem:[%s2047_s1 + $0x28] sm:$0xff] (!%p176_p2)  }
   0x9   : > { %v1613_v14 = vld [vmem:[%s2047_s1 + $0x70] sm:$0xff] (!%p176_p2)   ;;  %v1615_v16 = vld [vmem:[%s2047_s1 + $0x78] sm:$0xff] (!%p176_p2)   ;;  %v1623_v18 = vld [vmem:[%s2047_s1 + $0x80] sm:$0xff] (!%p176_p2)  }
   0xa   : > { %v1614_v15 = vld [vmem:[%s2047_s1 + $0x30] sm:$0xff] (!%p176_p2)   ;;  %v1616_v17 = vld [vmem:[%s2047_s1 + $0x38] sm:$0xff] (!%p176_p2)   ;;  %v1636_v23 = vld [vmem:[%s2047_s1 + $0x88] sm:$0xff] (!%p176_p2)  }
   0xb   : > { %1413 = vmatpush3.bf16.msra.mxu0 (!%p176_p2), %v1604_v3  ;;  %1585 = vmatpush3.bf16.msra.mxu1 (!%p176_p2), %v1604_v3 }
   0xc   : > { %1414 = vmatprep.subr.bf16.mxu0 (!%p176_p2), %v1605_v4  ;;  %1578 = vmatprep.subr.bf16.mxu1 (!%p176_p2), %v1605_v4 }
   0xd   : > { %s2052_s19 = smov (!%p208_p3, %s1319_s19), 63 }
   0xe   : > { %s1592_s6 = smul.u32 12, %s2052_s19  ;;  %s1322_s8 = sshll.u32 %s2052_s19, 3 }
   0xf   : > { %1415 = vmatpush3.bf16.msra.mxu0 %v1606_v5  ;;  %1586 = vmatpush3.bf16.msra.mxu1 %v1606_v5  ;;  %s1894_s16 = scalar_lea.vmem %s2050_s4, %s1322_s8 }
  0x10   : > { %1416 = vmatprep.subr.bf16.mxu0 %v1607_v6  ;;  %1579 = vmatprep.subr.bf16.mxu1 %v1607_v6  ;;  %s1757_s13 = scalar_lea.vmem %s2046_s0, %s1592_s6 }
  0x11   : > { %v1619_v11 = vld [vmem:[%s1757_s13 + $0x4] ss:$12 sps:$4 sm:$0xff]   ;;  %v1617_v19 = vld [vmem:[%s1757_s13] ss:$12 sps:$4 sm:$0xff]   ;;  %v1624_v21 = vld [vmem:[%s1757_s13 + $0x1c] ss:$12 sps:$4 sm:$0xff]  }
  0x12   : > { %v1622_v12 = vld [vmem:[%s1757_s13 + $0x124] ss:$12 sps:$4 sm:$0xff]   ;;  %763 = vmatprep.mubr.bf16.mxu0 %v1619_v11  ;;  %v1620_v20 = vld [vmem:[%s1757_s13 + $0x120] ss:$12 sps:$4 sm:$0xff]   ;;  %v1626_v22 = vld [vmem:[%s1757_s13 + $0x13c] ss:$12 sps:$4 sm:$0xff]  }
  0x13   : > { %1417 = vmatpush3.bf16.msra.mxu0 %v1608_v7  ;;  %1587 = vmatpush3.bf16.msra.mxu1 %v1608_v7  ;;  %v1628_v24 = vld [vmem:[%s1757_s13 + $0x18] ss:$12 sps:$4 sm:$0xff]   ;;  %v1630_v26 = vld [vmem:[%s1757_s13 + $0x34] ss:$12 sps:$4 sm:$0xff]   ;;  %v1634_v28 = vld [vmem:[%s1757_s13 + $0x30] ss:$12 sps:$4 sm:$0xff]  }
  0x14   : > { %1418 = vmatprep.subr.bf16.mxu0 %v1609_v8  ;;  %1580 = vmatprep.subr.bf16.mxu1 %v1609_v8  ;;  %v1629_v25 = vld [vmem:[%s1757_s13 + $0x138] ss:$12 sps:$4 sm:$0xff]   ;;  %v1632_v27 = vld [vmem:[%s1757_s13 + $0x154] ss:$12 sps:$4 sm:$0xff]   ;;  %v1635_v29 = vld [vmem:[%s1757_s13 + $0x150] ss:$12 sps:$4 sm:$0xff]  }
  0x15   : > { %859 = vmatprep.mubr.bf16.mxu1 %v1622_v12  ;;  %v1637_v30 = vld [vmem:[%s1757_s13 + $0x4c] ss:$12 sps:$4 sm:$0xff]   ;;  %v1641_v32 = vld [vmem:[%s1757_s13 + $0x48] ss:$12 sps:$4 sm:$0xff]   ;;  %v1643_v34 = vld [vmem:[%s1757_s13 + $0x64] ss:$12 sps:$4 sm:$0xff]  }
  0x16   : > { %v1639_v31 = vld [vmem:[%s1757_s13 + $0x16c] ss:$12 sps:$4 sm:$0xff]   ;;  %v1642_v33 = vld [vmem:[%s1757_s13 + $0x168] ss:$12 sps:$4 sm:$0xff]   ;;  %v1652_v41 = vld [vmem:[%s1757_s13 + $0x50] ss:$12 sps:$4 sm:$0xff]  }
  0x17   : > { %1419 = vmatpush3.bf16.msra.mxu0 %v1610_v9  ;;  %1588 = vmatpush3.bf16.msra.mxu1 %v1610_v9  ;;  %v1645_v35 = vld [vmem:[%s1757_s13 + $0x8] ss:$12 sps:$4 sm:$0xff]   ;;  %v1646_v36 = vld [vmem:[%s1757_s13 + $0x60] ss:$12 sps:$4 sm:$0xff]   ;;  %v1650_v39 = vld [vmem:[%s1757_s13 + $0x38] ss:$12 sps:$4 sm:$0xff]  }
  0x18   : > { %1420 = vmatprep.subr.bf16.mxu0 %v1611_v10  ;;  %1581 = vmatprep.subr.bf16.mxu1 %v1611_v10  ;;  %v1647_v37 = vld [vmem:[%s1757_s13 + $0x20] ss:$12 sps:$4 sm:$0xff]   ;;  %v1648_v38 = vld [vmem:[%s1757_s13 + $0x7c] ss:$12 sps:$4 sm:$0xff]   ;;  %v1651_v40 = vld [vmem:[%s1757_s13 + $0x78] ss:$12 sps:$4 sm:$0xff]  }
  0x19   : > { %v1653_v42 = vld [vmem:[%s1757_s13 + $0x94] ss:$12 sps:$4 sm:$0xff]   ;;  %v1656_v44 = vld [vmem:[%s1757_s13 + $0x90] ss:$12 sps:$4 sm:$0xff]   ;;  %v1658_v46 = vld [vmem:[%s1757_s13 + $0xac] ss:$12 sps:$4 sm:$0xff]  }
  0x1a   : > { %v1655_v43 = vld [vmem:[%s1757_s13 + $0x68] ss:$12 sps:$4 sm:$0xff]   ;;  %v1657_v45 = vld [vmem:[%s1757_s13 + $0x80] ss:$12 sps:$4 sm:$0xff]   ;;  %v1660_v47 = vld [vmem:[%s1757_s13 + $0x98] ss:$12 sps:$4 sm:$0xff]  }
  0x1b   : > { %1421 = vmatpush3.bf16.msra.mxu0 %v1612_v13  ;;  %1589 = vmatpush3.bf16.msra.mxu1 %v1612_v13  ;;  %v1661_v48 = vld [vmem:[%s1757_s13 + $0xa8] ss:$12 sps:$4 sm:$0xff]   ;;  %v1662_v49 = vld [vmem:[%s1757_s13 + $0xb0] ss:$12 sps:$4 sm:$0xff]   ;;  %v1666_v52 = vld [vmem:[%s1757_s13 + $0xc0] ss:$12 sps:$4 sm:$0xff]  }
  0x1c   : > { %1422 = vmatprep.subr.bf16.mxu0 %v1613_v14  ;;  %1582 = vmatprep.subr.bf16.mxu1 %v1613_v14  ;;  %v1663_v50 = vld [vmem:[%s1757_s13 + $0xc4] ss:$12 sps:$4 sm:$0xff]   ;;  %v1665_v51 = vld [vmem:[%s1757_s13 + $0xc8] ss:$12 sps:$4 sm:$0xff]   ;;  %v1667_v53 = vld [vmem:[%s1757_s13 + $0xe0] ss:$12 sps:$4 sm:$0xff]  }
  0x1d   : > { %v1668_v54 = vld [vmem:[%s1757_s13 + $0xdc] ss:$12 sps:$4 sm:$0xff]   ;;  %v1670_v55 = vld [vmem:[%s1757_s13 + $0xf8] ss:$12 sps:$4 sm:$0xff]   ;;  %v1673_v58 = vld [vmem:[%s1757_s13 + $0xf4] ss:$12 sps:$4 sm:$0xff]  }
  0x1e   : > { %v1671_v56 = vld [vmem:[%s1757_s13 + $0xd8] ss:$12 sps:$4 sm:$0xff]   ;;  %v1672_v57 = vld [vmem:[%s1757_s13 + $0x110] ss:$12 sps:$4 sm:$0xff]   ;;  %v1675_v59 = vld [vmem:[%s1757_s13 + $0x128] ss:$12 sps:$4 sm:$0xff]  }
  0x1f   : > { %1423 = vmatpush3.bf16.msra.mxu0 %v1614_v15  ;;  %1590 = vmatpush3.bf16.msra.mxu1 %v1614_v15  ;;  %v1676_v60 = vld [vmem:[%s1757_s13 + $0xf0] ss:$12 sps:$4 sm:$0xff]   ;;  %v1677_v61 = vld [vmem:[%s1757_s13 + $0x140] ss:$12 sps:$4 sm:$0xff]   ;;  %v1680_v63 = vld [vmem:[%s1757_s13 + $0x158] ss:$12 sps:$4 sm:$0xff]  }
  0x20   : > { %1424 = vmatprep.subr.bf16.mxu0 %v1615_v16  ;;  %1583 = vmatprep.subr.bf16.mxu1 %v1615_v16  ;;  %v1678_v62 = vld [vmem:[%s1757_s13 + $0x10c] ss:$12 sps:$4 sm:$0xff]   ;;  %v1681_v0 = vld [vmem:[%s1757_s13 + $0x108] ss:$12 sps:$4 sm:$0xff]   ;;  %v1682_v1 = vld [vmem:[%s1757_s13 + $0x170] ss:$12 sps:$4 sm:$0xff]   ;;  %s1880_s13 = scalar_lea.vmem %s2049_s3, %s1322_s8 }
  0x23   : > { %1425 = vmatpush3.bf16.msra.mxu0 %v1616_v17  ;;  %1591 = vmatpush3.bf16.msra.mxu1 %v1616_v17 }
  0x24   : > { %1540 = vmatprep.subr.bf16.mxu1 %v1623_v18 }
  0x26   : > { %764 = vmatmul.mubr.bf16.vlgmr.msra.gmra.mrb[0].mxu0 %v1617_v19  ;;  %860 = vmatmul.mubr.bf16.vlgmr.msra.gmra.mrb[0].mxu1 %v1620_v20 }
  0x27   : > { %1541 = vmatpush3.bf16.msra.mxu1 %v1623_v18  ;;  %771 = vmatprep.mubr.bf16.mxu0 %v1624_v21 }
  0x28   : > { %867 = vmatprep.mubr.bf16.mxu1 %v1626_v22  ;;  %1542 = vmatprep.subr.bf16.mxu1 %v1636_v23 }
  0x2b   : > { %1543 = vmatpush3.bf16.msra.mxu1 %v1636_v23 }
  0x2e   : > { %772 = vmatmul.mubr.bf16.gmra.mrb[4].mxu0 %v1628_v24  ;;  %868 = vmatmul.mubr.bf16.gmra.mrb[4].mxu1 %v1629_v25 }
  0x2f   : > { %779 = vmatprep.mubr.bf16.mxu0 %v1630_v26  ;;  %875 = vmatprep.mubr.bf16.mxu1 %v1632_v27 }
  0x36   : > { %780 = vmatmul.mubr.bf16.gmra.mrb[8].mxu0 %v1634_v28  ;;  %876 = vmatmul.mubr.bf16.gmra.mrb[8].mxu1 %v1635_v29 }
  0x37   : > { %787 = vmatprep.mubr.bf16.mxu0 %v1637_v30  ;;  %883 = vmatprep.mubr.bf16.mxu1 %v1639_v31 }
  0x3e   : > { %788 = vmatmul.mubr.bf16.gmra.mrb[12].mxu0 %v1641_v32  ;;  %884 = vmatmul.mubr.bf16.gmra.mrb[12].mxu1 %v1642_v33 }
  0x3f   : > { %795 = vmatprep.mubr.bf16.mxu0 %v1643_v34  ;;  %1544 = vmatprep.mubr.msk.bf16.mxu1 %vm682_vm0, %v1645_v35 }
  0x46   : > { %796 = vmatmul.mubr.bf16.gmra.mrb[16].mxu0 %v1646_v36  ;;  %1545 = vmatmul.mubr.msk.bf16.vlgmr.msra.gmra.mrb[16].mxu1 %vm682_vm0, %v1647_v37 }
  0x47   : > { %803 = vmatprep.mubr.bf16.mxu0 %v1648_v38  ;;  %1548 = vmatprep.mubr.msk.bf16.mxu1 %vm682_vm0, %v1650_v39 }
  0x4e   : > { %804 = vmatmul.mubr.bf16.gmra.mrb[20].mxu0 %v1651_v40  ;;  %1549 = vmatmul.mubr.msk.bf16.gmra.mrb[20].mxu1 %vm682_vm0, %v1652_v41 }
  0x4f   : > { %811 = vmatprep.mubr.bf16.mxu0 %v1653_v42  ;;  %1552 = vmatprep.mubr.msk.bf16.mxu1 %vm682_vm0, %v1655_v43 }
  0x56   : > { %812 = vmatmul.mubr.bf16.gmra.mrb[24].mxu0 %v1656_v44  ;;  %1553 = vmatmul.mubr.msk.bf16.gmra.mrb[24].mxu1 %vm682_vm0, %v1657_v45 }
  0x57   : > { %819 = vmatprep.mubr.bf16.mxu0 %v1658_v46  ;;  %1556 = vmatprep.mubr.msk.bf16.mxu1 %vm682_vm0, %v1660_v47 }
  0x5e   : > { %820 = vmatmul.mubr.bf16.gmra.mrb[28].mxu0 %v1661_v48  ;;  %1557 = vmatmul.mubr.msk.bf16.gmra.mrb[28].mxu1 %vm682_vm0, %v1662_v49 }
  0x5f   : > { %827 = vmatprep.mubr.bf16.mxu0 %v1663_v50  ;;  %1560 = vmatprep.mubr.msk.bf16.mxu1 %vm682_vm0, %v1665_v51  ;;  %v1874_v50 = vld [vmem:[%s2048_s2] ss:$0 sm:$0xff] }
  0x66   : > { %828 = vmatmul.mubr.bf16.gmra.mrb[32].mxu0 %v1666_v52  ;;  %1561 = vmatmul.mubr.msk.bf16.gmra.mrb[32].mxu1 %vm682_vm0, %v1667_v53 }
  0x67   : > { %835 = vmatprep.mubr.bf16.mxu0 %v1668_v54  ;;  %1564 = vmatprep.mubr.msk.bf16.mxu1 %vm682_vm0, %v1670_v55 }
  0x6e   : > { %836 = vmatmul.mubr.bf16.gmra.mrb[36].mxu0 %v1671_v56  ;;  %1565 = vmatmul.mubr.msk.bf16.gmra.mrb[36].mxu1 %vm682_vm0, %v1672_v57 }
  0x6f   : > { %843 = vmatprep.mubr.bf16.mxu0 %v1673_v58  ;;  %1568 = vmatprep.mubr.msk.bf16.mxu1 %vm682_vm0, %v1675_v59 }
  0x76   : > { %844 = vmatmul.mubr.bf16.gmra.mrb[40].mxu0 %v1676_v60  ;;  %1569 = vmatmul.mubr.msk.bf16.gmra.mrb[40].mxu1 %vm682_vm0, %v1677_v61 }
  0x77   : > { %851 = vmatprep.mubr.bf16.mxu0 %v1678_v62  ;;  %1572 = vmatprep.mubr.msk.bf16.mxu1 %vm682_vm0, %v1680_v63 }
  0x7e   : > { %852 = vmatmul.mubr.bf16.gmra.mrb[44].mxu0 %v1681_v0  ;;  %1573 = vmatmul.mubr.msk.bf16.gmra.mrb[44].mxu1 %vm682_vm0, %v1682_v1  ;;  %v1151_v1 = vld [vmem:[%s1880_s13 + $0x10] sm:$0xff] }
  0xf9   : > { %v1426_v2 = vpop.f32.mrb[0].mxu0  ;;  %v1498_v3 = vpop.f32.mrb[0].mxu1 }
  0xfa   : > { %v1427_v4 = vpop.f32.mrb[1].mxu0  ;;  %v1499_v5 = vpop.f32.mrb[1].mxu1 }
  0xfb   : > { %v1428_v6 = vadd.f32 %v1427_v4, %v1426_v2  ;;  %v1429_v7 = vpop.f32.mrb[2].mxu0  ;;  %v1850_v8 = vadd.f32 %v1499_v5, %v1498_v3  ;;  %v1501_v9 = vpop.f32.mrb[2].mxu1 }
  0xfc   : > { %v1430_v10 = vpop.f32.mrb[3].mxu0  ;;  %v1502_v11 = vpop.f32.mrb[3].mxu1 }
  0xfd   : > { %v1431_v12 = vadd.f32 %v1430_v10, %v1429_v7  ;;  %v1852_v13 = vadd.f32 %v1502_v11, %v1501_v9  ;;  %v766_v54 = vadd.f32 %v1428_v6, %v1874_v50  ;;  %v1149_v6 = vld [vmem:[%s1880_s13] sm:$0xff] }
  0xff   : > { %v769_v63 = vadd.f32 %v1431_v12, %v1874_v50  ;;  %v1152_v12 = vld [vmem:[%s1880_s13 + $0x18] sm:$0xff] }
 0x101   : > { %v1432_v14 = vpop.f32.mrb[4].mxu0  ;;  %v1504_v15 = vpop.f32.mrb[4].mxu1 }
 0x102   : > { %v1433_v16 = vpop.f32.mrb[5].mxu0  ;;  %v1505_v17 = vpop.f32.mrb[5].mxu1 }
 0x103   : > { %v1434_v18 = vadd.f32 %v1433_v16, %v1432_v14  ;;  %v1435_v19 = vpop.f32.mrb[6].mxu0  ;;  %v1854_v20 = vadd.f32 %v1505_v17, %v1504_v15  ;;  %v1507_v21 = vpop.f32.mrb[6].mxu1  ;;  %v1150_v17 = vld [vmem:[%s1880_s13 + $0x8] sm:$0xff] }
 0x104   : > { %v1436_v22 = vpop.f32.mrb[7].mxu0  ;;  %v1508_v23 = vpop.f32.mrb[7].mxu1 }
 0x105   : > { %v1437_v24 = vadd.f32 %v1436_v22, %v1435_v19  ;;  %v1856_v25 = vadd.f32 %v1508_v23, %v1507_v21  ;;  %v774_v51 = vadd.f32 %v1434_v18, %v1874_v50 }
 0x107   : > { %v777_v58 = vadd.f32 %v1437_v24, %v1874_v50 }
 0x109   : > { %v1438_v26 = vpop.f32.mrb[8].mxu0  ;;  %v1510_v27 = vpop.f32.mrb[8].mxu1 }
 0x10a   : > { %v1439_v28 = vpop.f32.mrb[9].mxu0  ;;  %v1511_v29 = vpop.f32.mrb[9].mxu1 }
 0x10b   : > { %v1858_v30 = vadd.f32 %v1439_v28, %v1438_v26  ;;  %v1441_v31 = vpop.f32.mrb[10].mxu0  ;;  %v1860_v32 = vadd.f32 %v1511_v29, %v1510_v27  ;;  %v1513_v33 = vpop.f32.mrb[10].mxu1 }
 0x10c   : > { %v1442_v34 = vpop.f32.mrb[11].mxu0  ;;  %v1514_v35 = vpop.f32.mrb[11].mxu1 }
 0x10d   : > { %v1862_v36 = vadd.f32 %v1442_v34, %v1441_v31  ;;  %v1864_v37 = vadd.f32 %v1514_v35, %v1513_v33  ;;  %v782_v27 = vadd.f32 %v1858_v30, %v1874_v50 }
 0x111   : > { %v1444_v38 = vpop.f32.mrb[12].mxu0  ;;  %v1516_v39 = vpop.f32.mrb[12].mxu1 }
 0x112   : > { %v1445_v40 = vpop.f32.mrb[13].mxu0  ;;  %v1517_v41 = vpop.f32.mrb[13].mxu1 }
 0x113   : > { %v1446_v42 = vadd.f32 %v1445_v40, %v1444_v38  ;;  %v1447_v43 = vpop.f32.mrb[14].mxu0  ;;  %v1866_v44 = vadd.f32 %v1517_v41, %v1516_v39  ;;  %v1519_v45 = vpop.f32.mrb[14].mxu1  ;;  %v785_v41 = vadd.f32 %v1862_v36, %v1874_v50  ;;  %v1156_v36 = vld [vmem:[%s1880_s13 + $0x38] sm:$0xff] }
 0x114   : > { %v1448_v46 = vpop.f32.mrb[15].mxu0  ;;  %v1520_v47 = vpop.f32.mrb[15].mxu1 }
 0x115   : > { %v1449_v48 = vadd.f32 %v1448_v46, %v1447_v43  ;;  %v1868_v49 = vadd.f32 %v1520_v47, %v1519_v45  ;;  %v790_v21 = vadd.f32 %v1446_v42, %v1874_v50  ;;  %v1155_v42 = vld [vmem:[%s1880_s13 + $0x30] sm:$0xff] }
 0x117   : > { %v793_v34 = vadd.f32 %v1449_v48, %v1874_v50  ;;  %v1153_v48 = vld [vmem:[%s1880_s13 + $0x20] sm:$0xff] }
 0x119   : > { %v1450_v52 = vpop.f32.mrb[16].mxu0  ;;  %v1546_v53 = vpop.f32.mrb[16].mxu1 }
 0x11a   : > { %v935_v55 = vadd.f32 %v1546_v53, %v774_v51  ;;  %v1451_v56 = vpop.f32.mrb[17].mxu0  ;;  %v926_v57 = vpop.f32.mrb[17].mxu1 }
 0x11b   : > { %v1884_v59 = vadd.f32 %v1451_v56, %v1450_v52  ;;  %v927_v60 = vadd.f32 %v926_v57, %v766_v54  ;;  %v1453_v61 = vpop.f32.mrb[18].mxu0  ;;  %v1547_v62 = vpop.f32.mrb[18].mxu1 }
 0x11c   : > { %vm1055_vm1 = vcmp.ge.f32.partialorder %v935_v55, 0.0  ;;  %v1087_v0 = vmul.f32 0.2, %v935_v55  ;;  %v938_v2 = vadd.f32 %v1547_v62, %v777_v58  ;;  %v1454_v3 = vpop.f32.mrb[19].mxu0  ;;  %v929_v4 = vpop.f32.mrb[19].mxu1  ;;  %v1154_v58 = vld [vmem:[%s1880_s13 + $0x28] sm:$0xff] }
 0x11d   : > { %vm1053_vm2 = vcmp.ge.f32.partialorder %v927_v60, 0.0  ;;  %v1085_v5 = vmul.f32 0.2, %v927_v60  ;;  %v1889_v7 = vadd.f32 %v1454_v3, %v1453_v61  ;;  %v930_v9 = vadd.f32 %v929_v4, %v769_v63 }
 0x11e   : > { %v1119_v10 = vsel %vm1055_vm1, %v935_v55, %v1087_v0  ;;  %vm1056_vm4 = vcmp.ge.f32.partialorder %v938_v2, 0.0  ;;  %v1088_v11 = vmul.f32 0.2, %v938_v2  ;;  %v798_v3 = vadd.f32 %v1884_v59, %v1874_v50 }
 0x11f   : > { %v1183_v14 = vadd.f32 %v1151_v1, %v1119_v10  ;;  %v1117_v15 = vsel %vm1053_vm2, %v927_v60, %v1085_v5  ;;  %vm1054_vm5 = vcmp.ge.f32.partialorder %v930_v9, 0.0  ;;  %v1086_v16 = vmul.f32 0.2, %v930_v9 }
 0x120   : > { %v1181_v18 = vadd.f32 %v1149_v6, %v1117_v15  ;;  %v1120_v19 = vsel %vm1056_vm4, %v938_v2, %v1088_v11 }
 0x121   : > { %1216 = vst.msk [vmem:[%s1894_s16 + $0x10] sm:$0xff] %vm1213_vm3, %v1183_v14  ;;  %v1184_v22 = vadd.f32 %v1152_v12, %v1120_v19  ;;  %v1118_v23 = vsel %vm1054_vm5, %v930_v9, %v1086_v16  ;;  %v1456_v24 = vpop.f32.mrb[20].mxu0  ;;  %v1550_v26 = vpop.f32.mrb[20].mxu1  ;;  %v801_v16 = vadd.f32 %v1889_v7, %v1874_v50 }
 0x122   : > { %1214 = vst.msk [vmem:[%s1894_s16] sm:$0xff] %vm1213_vm3, %v1181_v18  ;;  %v1182_v28 = vadd.f32 %v1150_v17, %v1118_v23  ;;  %v951_v29 = vadd.f32 %v1550_v26, %v790_v21  ;;  %v1457_v31 = vpop.f32.mrb[21].mxu0  ;;  %v942_v33 = vpop.f32.mrb[21].mxu1  ;;  %v1159_v17 = vld [vmem:[%s1880_s13 + $0x50] sm:$0xff]  ;;  %v1157_v23 = vld [vmem:[%s1880_s13 + $0x40] sm:$0xff] }
 0x123   : > { %1217 = vst.msk [vmem:[%s1894_s16 + $0x18] sm:$0xff] %vm1213_vm3, %v1184_v22  ;;  %v1458_v35 = vadd.f32 %v1457_v31, %v1456_v24  ;;  %v943_v38 = vadd.f32 %v942_v33, %v782_v27  ;;  %v1459_v39 = vpop.f32.mrb[22].mxu0  ;;  %v1551_v40 = vpop.f32.mrb[22].mxu1 }
 0x124   : > { %1215 = vst.msk [vmem:[%s1894_s16 + $0x8] sm:$0xff] %vm1213_vm3, %v1182_v28  ;;  %vm1059_vm6 = vcmp.ge.f32.partialorder %v951_v29, 0.0  ;;  %v1091_v30 = vmul.f32 0.2, %v951_v29  ;;  %v954_v43 = vadd.f32 %v1551_v40, %v793_v34  ;;  %v1460_v45 = vpop.f32.mrb[23].mxu0  ;;  %v945_v46 = vpop.f32.mrb[23].mxu1 }
 0x125   : > { %vm1057_vm7 = vcmp.ge.f32.partialorder %v943_v38, 0.0  ;;  %v1089_v47 = vmul.f32 0.2, %v943_v38  ;;  %v1461_v51 = vadd.f32 %v1460_v45, %v1459_v39  ;;  %v946_v52 = vadd.f32 %v945_v46, %v785_v41  ;;  %v1160_v28 = vld [vmem:[%s1880_s13 + $0x58] sm:$0xff]  ;;  %v1158_v34 = vld [vmem:[%s1880_s13 + $0x48] sm:$0xff] }
 0x126   : > { %v1123_v53 = vsel %vm1059_vm6, %v951_v29, %v1091_v30  ;;  %vm1060_vm8 = vcmp.ge.f32.partialorder %v954_v43, 0.0  ;;  %v1092_v54 = vmul.f32 0.2, %v954_v43  ;;  %v806_v62 = vadd.f32 %v1458_v35, %v1874_v50 }
 0x127   : > { %v1187_v55 = vadd.f32 %v1155_v42, %v1123_v53  ;;  %v1121_v56 = vsel %vm1057_vm7, %v943_v38, %v1089_v47  ;;  %vm1058_vm9 = vcmp.ge.f32.partialorder %v946_v52, 0.0  ;;  %v1090_v57 = vmul.f32 0.2, %v946_v52 }
 0x128   : > { %v1185_v60 = vadd.f32 %v1153_v48, %v1121_v56  ;;  %v1124_v61 = vsel %vm1060_vm8, %v954_v43, %v1092_v54  ;;  %v809_v10 = vadd.f32 %v1461_v51, %v1874_v50 }
 0x129   : > { %1220 = vst.msk [vmem:[%s1894_s16 + $0x30] sm:$0xff] %vm1213_vm3, %v1187_v55  ;;  %v1188_v63 = vadd.f32 %v1156_v36, %v1124_v61  ;;  %v1122_v0 = vsel %vm1058_vm9, %v946_v52, %v1090_v57  ;;  %v1462_v1 = vpop.f32.mrb[24].mxu0  ;;  %v1554_v2 = vpop.f32.mrb[24].mxu1  ;;  %v1161_v57 = vld [vmem:[%s1880_s13 + $0x60] sm:$0xff] }
 0x12a   : > { %1218 = vst.msk [vmem:[%s1894_s16 + $0x20] sm:$0xff] %vm1213_vm3, %v1185_v60  ;;  %v1186_v4 = vadd.f32 %v1154_v58, %v1122_v0  ;;  %v967_v5 = vadd.f32 %v1554_v2, %v806_v62  ;;  %v1463_v6 = vpop.f32.mrb[25].mxu0  ;;  %v958_v9 = vpop.f32.mrb[25].mxu1  ;;  %v1162_v2 = vld [vmem:[%s1880_s13 + $0x68] sm:$0xff] }
 0x12b   : > { %1221 = vst.msk [vmem:[%s1894_s16 + $0x38] sm:$0xff] %vm1213_vm3, %v1188_v63  ;;  %v1464_v11 = vadd.f32 %v1463_v6, %v1462_v1  ;;  %v959_v12 = vadd.f32 %v958_v9, %v798_v3  ;;  %v1465_v14 = vpop.f32.mrb[26].mxu0  ;;  %v1555_v15 = vpop.f32.mrb[26].mxu1 }
 0x12c   : > { %1219 = vst.msk [vmem:[%s1894_s16 + $0x28] sm:$0xff] %vm1213_vm3, %v1186_v4  ;;  %vm1063_vm10 = vcmp.ge.f32.partialorder %v967_v5, 0.0  ;;  %v1095_v59 = vmul.f32 0.2, %v967_v5  ;;  %v970_v18 = vadd.f32 %v1555_v15, %v809_v10  ;;  %v1466_v19 = vpop.f32.mrb[27].mxu0  ;;  %v961_v21 = vpop.f32.mrb[27].mxu1 }
 0x12d   : > { %vm1061_vm11 = vcmp.ge.f32.partialorder %v959_v12, 0.0  ;;  %v1093_v22 = vmul.f32 0.2, %v959_v12  ;;  %v1467_v24 = vadd.f32 %v1466_v19, %v1465_v14  ;;  %v962_v26 = vadd.f32 %v961_v21, %v801_v16  ;;  %v1163_v4 = vld [vmem:[%s1880_s13 + $0x70] sm:$0xff]  ;;  %v1164_v16 = vld [vmem:[%s1880_s13 + $0x78] sm:$0xff] }
 0x12e   : > { %v1127_v27 = vsel %vm1063_vm10, %v967_v5, %v1095_v59  ;;  %vm1064_vm12 = vcmp.ge.f32.partialorder %v970_v18, 0.0  ;;  %v1096_v7 = vmul.f32 0.2, %v970_v18  ;;  %v814_v42 = vadd.f32 %v1464_v11, %v1874_v50 }
 0x12f   : > { %v1191_v29 = vadd.f32 %v1159_v17, %v1127_v27  ;;  %v1125_v31 = vsel %vm1061_vm11, %v959_v12, %v1093_v22  ;;  %vm1062_vm13 = vcmp.ge.f32.partialorder %v962_v26, 0.0  ;;  %v1094_v33 = vmul.f32 0.2, %v962_v26 }
 0x130   : > { %v1189_v35 = vadd.f32 %v1157_v23, %v1125_v31  ;;  %v1128_v38 = vsel %vm1064_vm12, %v970_v18, %v1096_v7  ;;  %v817_v54 = vadd.f32 %v1467_v24, %v1874_v50 }
 0x131   : > { %1224 = vst.msk [vmem:[%s1894_s16 + $0x50] sm:$0xff] %vm1213_vm3, %v1191_v29  ;;  %v1192_v39 = vadd.f32 %v1160_v28, %v1128_v38  ;;  %v1126_v40 = vsel %vm1062_vm13, %v962_v26, %v1094_v33  ;;  %v1468_v41 = vpop.f32.mrb[28].mxu0  ;;  %v1558_v30 = vpop.f32.mrb[28].mxu1  ;;  %v1165_v38 = vld [vmem:[%s1880_s13 + $0x80] sm:$0xff] }
 0x132   : > { %1222 = vst.msk [vmem:[%s1894_s16 + $0x40] sm:$0xff] %vm1213_vm3, %v1189_v35  ;;  %v1190_v43 = vadd.f32 %v1158_v34, %v1126_v40  ;;  %v1469_v45 = vpop.f32.mrb[29].mxu0  ;;  %v974_v46 = vpop.f32.mrb[29].mxu1 }
 0x133   : > { %1225 = vst.msk [vmem:[%s1894_s16 + $0x58] sm:$0xff] %vm1213_vm3, %v1192_v39  ;;  %v1470_v47 = vadd.f32 %v1469_v45, %v1468_v41  ;;  %v975_v48 = vadd.f32 %v974_v46, %v814_v42  ;;  %v1471_v51 = vpop.f32.mrb[30].mxu0  ;;  %v1559_v52 = vpop.f32.mrb[30].mxu1 }
 0x134   : > { %1223 = vst.msk [vmem:[%s1894_s16 + $0x48] sm:$0xff] %vm1213_vm3, %v1190_v43  ;;  %v1472_v53 = vpop.f32.mrb[31].mxu0  ;;  %v977_v36 = vpop.f32.mrb[31].mxu1 }
 0x135   : > { %v822_v55 = vadd.f32 %v1470_v47, %v1874_v50  ;;  %vm1065_vm14 = vcmp.ge.f32.partialorder %v975_v48, 0.0  ;;  %v1097_v56 = vmul.f32 0.2, %v975_v48  ;;  %v1473_v58 = vadd.f32 %v1472_v53, %v1471_v51 }
 0x136   : > { %v978_v60 = vadd.f32 %v977_v36, %v817_v54 }
 0x137   : > { %v983_v61 = vadd.f32 %v1558_v30, %v822_v55  ;;  %v1129_v62 = vsel %vm1065_vm14, %v975_v48, %v1097_v56  ;;  %v825_v63 = vadd.f32 %v1473_v58, %v1874_v50  ;;  %v1166_v30 = vld [vmem:[%s1880_s13 + $0x88] sm:$0xff]  ;;  %v862_v58 = vadd.f32 %v1850_v8, %v1874_v50 }
 0x138   : > { %v1193_v0 = vadd.f32 %v1161_v57, %v1129_v62  ;;  %vm1066_vm15 = vcmp.ge.f32.partialorder %v978_v60, 0.0  ;;  %v1098_v1 = vmul.f32 0.2, %v978_v60  ;;  %v870_v57 = vadd.f32 %v1854_v20, %v1874_v50  ;;  %v1167_v62 = vld [vmem:[%s1880_s13 + $0x90] sm:$0xff] }
 0x139   : > { %vm1067_vm0 = vcmp.ge.f32.partialorder %v983_v61, 0.0  ;;  %v1099_v3 = vmul.f32 0.2, %v983_v61  ;;  %v986_v5 = vadd.f32 %v1559_v52, %v825_v63  ;;  %v1474_v6 = vpop.f32.mrb[32].mxu0  ;;  %v1562_v9 = vpop.f32.mrb[32].mxu1  ;;  %v886_v8 = vadd.f32 %v1866_v44, %v1874_v50  ;;  %v1175_v44 = vld [vmem:[%s1880_s13 + $0xd0] sm:$0xff] }
 0x13a   : > { %1226 = vst.msk [vmem:[%s1894_s16 + $0x60] sm:$0xff] %vm1213_vm3, %v1193_v0  ;;  %v1130_v10 = vsel %vm1066_vm15, %v978_v60, %v1098_v1  ;;  %v1475_v11 = vpop.f32.mrb[33].mxu0  ;;  %v990_v12 = vpop.f32.mrb[33].mxu1  ;;  %v865_v60 = vadd.f32 %v1852_v13, %v1874_v50  ;;  %v878_v13 = vadd.f32 %v1860_v32, %v1874_v50 }
 0x13b   : > { %v1131_v14 = vsel %vm1067_vm0, %v983_v61, %v1099_v3  ;;  %vm1068_vm1 = vcmp.ge.f32.partialorder %v986_v5, 0.0  ;;  %v1100_v15 = vmul.f32 0.2, %v986_v5  ;;  %v1194_v59 = vadd.f32 %v1162_v2, %v1130_v10  ;;  %v1477_v17 = vpop.f32.mrb[34].mxu0  ;;  %v1563_v18 = vpop.f32.mrb[34].mxu1  ;;  %v1168_v10 = vld [vmem:[%s1880_s13 + $0x98] sm:$0xff] }
 0x13c   : > { %v1195_v19 = vadd.f32 %v1163_v4, %v1131_v14  ;;  %v1476_v21 = vadd.f32 %v1475_v11, %v1474_v6  ;;  %v1478_v22 = vpop.f32.mrb[35].mxu0  ;;  %v993_v23 = vpop.f32.mrb[35].mxu1  ;;  %v873_v2 = vadd.f32 %v1856_v25, %v1874_v50 }
 0x13d   : > { %v1132_v24 = vsel %vm1068_vm1, %v986_v5, %v1100_v15  ;;  %1227 = vst.msk [vmem:[%s1894_s16 + $0x68] sm:$0xff] %vm1213_vm3, %v1194_v59  ;;  %v1479_v26 = vadd.f32 %v1478_v22, %v1477_v17  ;;  %v1989_v5 = vadd.f32 %v1864_v37, %v1874_v50 }
 0x13e   : > { %1228 = vst.msk [vmem:[%s1894_s16 + $0x70] sm:$0xff] %vm1213_vm3, %v1195_v19  ;;  %v1196_v27 = vadd.f32 %v1164_v16, %v1132_v24  ;;  %v830_v7 = vadd.f32 %v1476_v21, %v1874_v50  ;;  %v1173_v24 = vld [vmem:[%s1880_s13 + $0xc0] sm:$0xff] }
 0x13f   : > { %v833_v28 = vadd.f32 %v1479_v26, %v1874_v50 }
 0x140   : > { %1229 = vst.msk [vmem:[%s1894_s16 + $0x78] sm:$0xff] %vm1213_vm3, %v1196_v27  ;;  %v991_v29 = vadd.f32 %v990_v12, %v830_v7 }
 0x141   : > { %v994_v31 = vadd.f32 %v993_v23, %v833_v28  ;;  %v1480_v33 = vpop.f32.mrb[36].mxu0  ;;  %v1960_v34 = vpop.f32.mrb[36].mxu1  ;;  %v1176_v28 = vld [vmem:[%s1880_s13 + $0xd8] sm:$0xff] }
 0x142   : > { %vm1069_vm2 = vcmp.ge.f32.partialorder %v991_v29, 0.0  ;;  %v1101_v35 = vmul.f32 0.2, %v991_v29  ;;  %v1481_v39 = vpop.f32.mrb[37].mxu0  ;;  %v1006_v40 = vpop.f32.mrb[37].mxu1 }
 0x143   : > { %vm1070_vm4 = vcmp.ge.f32.partialorder %v994_v31, 0.0  ;;  %v1102_v41 = vmul.f32 0.2, %v994_v31  ;;  %v1482_v42 = vadd.f32 %v1481_v39, %v1480_v33  ;;  %v1483_v43 = vpop.f32.mrb[38].mxu0  ;;  %v1964_v45 = vpop.f32.mrb[38].mxu1  ;;  %v1169_v39 = vld [vmem:[%s1880_s13 + $0xa0] sm:$0xff] }
 0x144   : > { %v1133_v46 = vsel %vm1069_vm2, %v991_v29, %v1101_v35  ;;  %v1484_v47 = vpop.f32.mrb[39].mxu0  ;;  %v1966_v48 = vpop.f32.mrb[39].mxu1  ;;  %v889_v35 = vadd.f32 %v1868_v49, %v1874_v50 }
 0x145   : > { %v1197_v51 = vadd.f32 %v1165_v38, %v1133_v46  ;;  %v1134_v52 = vsel %vm1070_vm4, %v994_v31, %v1102_v41  ;;  %v838_v53 = vadd.f32 %v1482_v42, %v1874_v50  ;;  %v1485_v54 = vadd.f32 %v1484_v47, %v1483_v43 }
 0x146   : > { %v1198_v36 = vadd.f32 %v1166_v30, %v1134_v52 }
 0x147   : > { %1230 = vst.msk [vmem:[%s1894_s16 + $0x80] sm:$0xff] %vm1213_vm3, %v1197_v51  ;;  %v999_v55 = vadd.f32 %v1562_v9, %v838_v53  ;;  %v841_v56 = vadd.f32 %v1485_v54, %v1874_v50  ;;  %v1174_v51 = vld [vmem:[%s1880_s13 + $0xc8] sm:$0xff] }
 0x148   : > { %1231 = vst.msk [vmem:[%s1894_s16 + $0x88] sm:$0xff] %vm1213_vm3, %v1198_v36 }
 0x149   : > { %vm1071_vm5 = vcmp.ge.f32.partialorder %v999_v55, 0.0  ;;  %v1103_v61 = vmul.f32 0.2, %v999_v55  ;;  %v1002_v63 = vadd.f32 %v1563_v18, %v841_v56  ;;  %v1486_v0 = vpop.f32.mrb[40].mxu0  ;;  %v1570_v1 = vpop.f32.mrb[40].mxu1 }
 0x14a   : > { %v1031_v3 = vadd.f32 %v1570_v1, %v870_v57  ;;  %v1487_v4 = vpop.f32.mrb[41].mxu0  ;;  %v1022_v20 = vpop.f32.mrb[41].mxu1 }
 0x14b   : > { %v1135_v6 = vsel %vm1071_vm5, %v999_v55, %v1103_v61  ;;  %vm1072_vm6 = vcmp.ge.f32.partialorder %v1002_v63, 0.0  ;;  %v1104_v9 = vmul.f32 0.2, %v1002_v63  ;;  %v1488_v25 = vadd.f32 %v1487_v4, %v1486_v0  ;;  %v1489_v11 = vpop.f32.mrb[42].mxu0  ;;  %v1571_v12 = vpop.f32.mrb[42].mxu1 }
 0x14c   : > { %v1199_v14 = vadd.f32 %v1167_v62, %v1135_v6  ;;  %vm1079_vm7 = vcmp.ge.f32.partialorder %v1031_v3, 0.0  ;;  %v1111_v15 = vmul.f32 0.2, %v1031_v3  ;;  %v1023_v16 = vadd.f32 %v1022_v20, %v862_v58  ;;  %v1490_v59 = vpop.f32.mrb[43].mxu0  ;;  %v1025_v32 = vpop.f32.mrb[43].mxu1 }
 0x14d   : > { %v1136_v37 = vsel %vm1072_vm6, %v1002_v63, %v1104_v9  ;;  %v846_v17 = vadd.f32 %v1488_v25, %v1874_v50  ;;  %v1034_v18 = vadd.f32 %v1571_v12, %v873_v2  ;;  %v1491_v19 = vadd.f32 %v1490_v59, %v1489_v11  ;;  %v1179_v2 = vld [vmem:[%s1880_s13 + $0xf0] sm:$0xff] }
 0x14e   : > { %1232 = vst.msk [vmem:[%s1894_s16 + $0x90] sm:$0xff] %vm1213_vm3, %v1199_v14  ;;  %v1200_v21 = vadd.f32 %v1168_v10, %v1136_v37  ;;  %v1143_v22 = vsel %vm1079_vm7, %v1031_v3, %v1111_v15  ;;  %vm1077_vm8 = vcmp.ge.f32.partialorder %v1023_v16, 0.0  ;;  %v1109_v23 = vmul.f32 0.2, %v1023_v16  ;;  %v1180_v15 = vld [vmem:[%s1880_s13 + $0xf8] sm:$0xff] }
 0x14f   : > { %v1207_v26 = vadd.f32 %v1175_v44, %v1143_v22  ;;  %v1007_v27 = vadd.f32 %v1006_v40, %v846_v17  ;;  %vm1080_vm9 = vcmp.ge.f32.partialorder %v1034_v18, 0.0  ;;  %v1112_v7 = vmul.f32 0.2, %v1034_v18 }
 0x150   : > { %1233 = vst.msk [vmem:[%s1894_s16 + $0x98] sm:$0xff] %vm1213_vm3, %v1200_v21  ;;  %v1141_v29 = vsel %vm1077_vm8, %v1023_v16, %v1109_v23  ;;  %v849_v31 = vadd.f32 %v1491_v19, %v1874_v50  ;;  %v1026_v33 = vadd.f32 %v1025_v32, %v865_v60  ;;  %v1170_v60 = vld [vmem:[%s1880_s13 + $0xa8] sm:$0xff]  ;;  %v1171_v16 = vld [vmem:[%s1880_s13 + $0xb0] sm:$0xff] }
 0x151   : > { %1240 = vst.msk [vmem:[%s1894_s16 + $0xd0] sm:$0xff] %vm1213_vm3, %v1207_v26  ;;  %vm1073_vm10 = vcmp.ge.f32.partialorder %v1007_v27, 0.0  ;;  %v1105_v38 = vmul.f32 0.2, %v1007_v27  ;;  %v1205_v40 = vadd.f32 %v1173_v24, %v1141_v29  ;;  %v1144_v41 = vsel %vm1080_vm9, %v1034_v18, %v1112_v7  ;;  %v1492_v30 = vpop.f32.mrb[44].mxu0  ;;  %v1574_v42 = vpop.f32.mrb[44].mxu1 }
 0x152   : > { %v1208_v43 = vadd.f32 %v1176_v28, %v1144_v41  ;;  %v1010_v46 = vadd.f32 %v1966_v48, %v849_v31  ;;  %vm1078_vm11 = vcmp.ge.f32.partialorder %v1026_v33, 0.0  ;;  %v1110_v47 = vmul.f32 0.2, %v1026_v33  ;;  %v1493_v52 = vpop.f32.mrb[45].mxu0  ;;  %v1038_v49 = vpop.f32.mrb[45].mxu1  ;;  %v1178_v23 = vld [vmem:[%s1880_s13 + $0xe8] sm:$0xff] }
 0x153   : > { %v1137_v53 = vsel %vm1073_vm10, %v1007_v27, %v1105_v38  ;;  %1238 = vst.msk [vmem:[%s1894_s16 + $0xc0] sm:$0xff] %vm1213_vm3, %v1205_v40  ;;  %v1047_v54 = vadd.f32 %v1574_v42, %v886_v8  ;;  %v1494_v36 = vadd.f32 %v1493_v52, %v1492_v30  ;;  %v1039_v55 = vadd.f32 %v1038_v49, %v878_v13  ;;  %v1495_v56 = vpop.f32.mrb[46].mxu0  ;;  %v1575_v57 = vpop.f32.mrb[46].mxu1  ;;  %v1177_v8 = vld [vmem:[%s1880_s13 + $0xe0] sm:$0xff]  ;;  %v1172_v24 = vld [vmem:[%s1880_s13 + $0xb8] sm:$0xff] }
 0x154   : > { %v1201_v58 = vadd.f32 %v1169_v39, %v1137_v53  ;;  %1241 = vst.msk [vmem:[%s1894_s16 + $0xd8] sm:$0xff] %vm1213_vm3, %v1208_v43  ;;  %vm1074_vm12 = vcmp.ge.f32.partialorder %v1010_v46, 0.0  ;;  %v1106_v48 = vmul.f32 0.2, %v1010_v46  ;;  %v1142_v61 = vsel %vm1078_vm11, %v1026_v33, %v1110_v47  ;;  %v1496_v62 = vpop.f32.mrb[47].mxu0  ;;  %v1041_v63 = vpop.f32.mrb[47].mxu1 }
 0x155   : > { %v1206_v0 = vadd.f32 %v1174_v51, %v1142_v61  ;;  %vm1083_vm13 = vcmp.ge.f32.partialorder %v1047_v54, 0.0  ;;  %v1115_v1 = vmul.f32 0.2, %v1047_v54  ;;  %v854_v3 = vadd.f32 %v1494_v36, %v1874_v50 }
 0x156   : > { %1234 = vst.msk [vmem:[%s1894_s16 + $0xa0] sm:$0xff] %vm1213_vm3, %v1201_v58  ;;  %v1138_v4 = vsel %vm1074_vm12, %v1010_v46, %v1106_v48  ;;  %vm1081_vm14 = vcmp.ge.f32.partialorder %v1039_v55, 0.0  ;;  %v1113_v20 = vmul.f32 0.2, %v1039_v55  ;;  %v1050_v13 = vadd.f32 %v1575_v57, %v889_v35 }
 0x157   : > { %v1202_v6 = vadd.f32 %v1170_v60, %v1138_v4  ;;  %1239 = vst.msk [vmem:[%s1894_s16 + $0xc8] sm:$0xff] %vm1213_vm3, %v1206_v0  ;;  %v1147_v9 = vsel %vm1083_vm13, %v1047_v54, %v1115_v1  ;;  %v1015_v10 = vadd.f32 %v1960_v34, %v854_v3  ;;  %v1497_v25 = vadd.f32 %v1496_v62, %v1495_v56 }
 0x158   : > { %v1211_v11 = vadd.f32 %v1179_v2, %v1147_v9  ;;  %v1145_v12 = vsel %vm1081_vm14, %v1039_v55, %v1113_v20  ;;  %vm1084_vm15 = vcmp.ge.f32.partialorder %v1050_v13, 0.0  ;;  %v1116_v14 = vmul.f32 0.2, %v1050_v13 }
 0x159   : > { %1235 = vst.msk [vmem:[%s1894_s16 + $0xa8] sm:$0xff] %vm1213_vm3, %v1202_v6  ;;  %vm1075_vm0 = vcmp.ge.f32.partialorder %v1015_v10, 0.0  ;;  %v1107_v44 = vmul.f32 0.2, %v1015_v10  ;;  %v1209_v59 = vadd.f32 %v1177_v8, %v1145_v12  ;;  %v857_v32 = vadd.f32 %v1497_v25, %v1874_v50 }
 0x15a   : > { %1244 = vst.msk [vmem:[%s1894_s16 + $0xf0] sm:$0xff] %vm1213_vm3, %v1211_v11  ;;  %v1148_v34 = vsel %vm1084_vm15, %v1050_v13, %v1116_v14  ;;  %v1042_v37 = vadd.f32 %v1041_v63, %v1989_v5 }
 0x15b   : > { %v1139_v17 = vsel %vm1075_vm0, %v1015_v10, %v1107_v44  ;;  %1242 = vst.msk [vmem:[%s1894_s16 + $0xe0] sm:$0xff] %vm1213_vm3, %v1209_v59  ;;  %v1212_v18 = vadd.f32 %v1180_v15, %v1148_v34  ;;  %v1018_v19 = vadd.f32 %v1964_v45, %v857_v32 }
 0x15c   : > { %v1203_v21 = vadd.f32 %v1171_v16, %v1139_v17  ;;  %vm1082_vm1 = vcmp.ge.f32.partialorder %v1042_v37, 0.0  ;;  %v1114_v22 = vmul.f32 0.2, %v1042_v37 }
 0x15d   : > { %1245 = vst.msk [vmem:[%s1894_s16 + $0xf8] sm:$0xff] %vm1213_vm3, %v1212_v18  ;;  %vm1076_vm2 = vcmp.ge.f32.partialorder %v1018_v19, 0.0  ;;  %v1108_v50 = vmul.f32 0.2, %v1018_v19 }
 0x15e   : > { %1236 = vst.msk [vmem:[%s1894_s16 + $0xb0] sm:$0xff] %vm1213_vm3, %v1203_v21  ;;  %v1146_v5 = vsel %vm1082_vm1, %v1042_v37, %v1114_v22 }
 0x15f   : > { %v1140_v26 = vsel %vm1076_vm2, %v1018_v19, %v1108_v50  ;;  %v1210_v27 = vadd.f32 %v1178_v23, %v1146_v5 }
 0x160   : > { %v1204_v7 = vadd.f32 %v1172_v24, %v1140_v26 }
 0x161   : > { %1243 = vst.msk [vmem:[%s1894_s16 + $0xe8] sm:$0xff] %vm1213_vm3, %v1210_v27 }
 0x162   : > { %1237 = vst.msk [vmem:[%s1894_s16 + $0xb8] sm:$0xff] %vm1213_vm3, %v1204_v7 }
 0x163 PF: > { %s14_s15 = sadd.s32 1, %s1689_s15  }
 0x164   : > { %p11_p4 = scmp.ge.s32.totalorder %s14_s15, 4  }
 0x166   :  { %13 = sbr.rel (!%p11_p4) target bundleno = 1 (0x1), region = 69 }

// kernel: discriminator_forward.17
= control target key start
LH: loop header
LB: loop body
LE: loop exit
PB: predicated region body
PF: predicated region fallthrough
CT: control target
= control target key end

     0   :  { %s1011_s12 = smov 0   ;;  %s1215_s0 = inlined_call_operand.vmem [shape: bf16[512,144], index: 0, kind: input, shape index: {}]   ;;  %s1216_s1 = inlined_call_operand.vmem [shape: bf16[144,16], index: 1, kind: input, shape index: {}]   ;;  %s1217_s2 = inlined_call_operand.vmem [shape: f32[1,16], index: 2, kind: input, shape index: {}]   ;;  %s1218_s3 = inlined_call_operand.vmem [shape: f32[512,16], index: 3, kind: output, shape index: {}]  }
   0x1 LB: > { %s827_s13 = sadd.s32 4294967295, %s988_s12   ;;  %p831_p0 = scmp.ge.s32.totalorder %s988_s12, 1  ;;  %s988_s12 = sphi %s1011_s12, %s13_s12  }
   0x2   : > { %p139_p1 = scmp.lt.s32.totalorder %s988_s12, 3 }
   0x4   : > { %p140_p2 = pnand %p831_p0, %p139_p1 }
   0x5   : > { %v925_v0 = vld [vmem:[%s1216_s1] sm:$0xff] (!%p140_p2)   ;;  %v990_v1 = vmov (!%p140_p2), 0   ;;  %s832_s16 = sshll.u32 (!%p140_p2), %s827_s13, 5  ;;  %v926_v2 = vld [vmem:[%s1216_s1 + $0x8] sm:$0xff] (!%p140_p2)   ;;  %v927_v3 = vld [vmem:[%s1216_s1 + $0x10] sm:$0xff] (!%p140_p2)   ;;  %vm433_vm0 = vcmask (!%p140_p2), 130048  }
   0x6   : > { %143 = sbr.rel (%p140_p2) target bundleno = 320 (0x140), region = 32  ;;  %482 = vmatprep.subr.bf16.mxu0 (!%p140_p2), %v990_v1  ;;  %898 = vmatprep.subr.bf16.mxu1 (!%p140_p2), %v990_v1  ;;  %p165_p3 = scmp.lt.s32.totalorder (!%p140_p2), %s832_s16, 63  ;;  %v928_v4 = vld [vmem:[%s1216_s1 + $0x18] sm:$0xff] (!%p140_p2)   ;;  %v929_v7 = vld [vmem:[%s1216_s1 + $0x20] sm:$0xff] (!%p140_p2)   ;;  %v930_v8 = vld [vmem:[%s1216_s1 + $0x28] sm:$0xff] (!%p140_p2)  }
   0x7   : > { %483 = vmatpush1.bf16.msra.mxu0 (!%p140_p2), %v925_v0  ;;  %907 = vmatpush1.bf16.msra.mxu1 (!%p140_p2), %v925_v0  ;;  %v931_v9 = vld [vmem:[%s1216_s1 + $0x30] sm:$0xff] (!%p140_p2)   ;;  %v932_v10 = vld [vmem:[%s1216_s1 + $0x38] sm:$0xff] (!%p140_p2)   ;;  %v933_v11 = vld [vmem:[%s1216_s1 + $0x40] sm:$0xff] (!%p140_p2)  }
   0x8   : > { %484 = vmatprep.subr.bf16.mxu0 (!%p140_p2), %v990_v1  ;;  %899 = vmatprep.subr.bf16.mxu1 (!%p140_p2), %v990_v1  ;;  %v1107_v42 = vld [vmem:[%s1217_s2] ss:$0 sm:$0xff] (!%p140_p2) }
   0xb   : > { %485 = vmatpush1.bf16.msra.mxu0 (!%p140_p2), %v926_v2  ;;  %908 = vmatpush1.bf16.msra.mxu1 (!%p140_p2), %v926_v2 }
   0xc   : > { %486 = vmatprep.subr.bf16.mxu0 (!%p140_p2), %v990_v1  ;;  %900 = vmatprep.subr.bf16.mxu1 (!%p140_p2), %v990_v1 }
   0xd   : > { %s1220_s16 = smov (!%p165_p3, %s832_s16), 63 }
   0xe   : > { %s897_s21 = sshll.u32 %s1220_s16, 3 }
   0xf   : > { %s1036_s24 = scalar_lea.vmem %s1215_s0, %s897_s21  ;;  %487 = vmatpush1.bf16.msra.mxu0 %v927_v3  ;;  %909 = vmatpush1.bf16.msra.mxu1 %v927_v3  ;;  %s1116_s15 = scalar_lea.vmem %s1218_s3, %s897_s21 }
  0x10   : > { %v936_v5 = vld [vmem:[%s1036_s24 + $0x4] ss:$8 sps:$4 sm:$0xff]   ;;  %488 = vmatprep.subr.bf16.mxu0 %v990_v1  ;;  %901 = vmatprep.subr.bf16.mxu1 %v990_v1  ;;  %v934_v12 = vld [vmem:[%s1036_s24] ss:$8 sps:$4 sm:$0xff]   ;;  %v940_v14 = vld [vmem:[%s1036_s24 + $0x14] ss:$8 sps:$4 sm:$0xff]  }
  0x11   : > { %v939_v6 = vld [vmem:[%s1036_s24 + $0x84] ss:$8 sps:$4 sm:$0xff]   ;;  %879 = vmatprep.mubr.msk.bf16.mxu0 %vm433_vm0, %v936_v5  ;;  %v937_v13 = vld [vmem:[%s1036_s24 + $0x80] ss:$8 sps:$4 sm:$0xff]   ;;  %v942_v15 = vld [vmem:[%s1036_s24 + $0x94] ss:$8 sps:$4 sm:$0xff]  }
  0x12   : > { %887 = vmatprep.mubr.msk.bf16.mxu1 %vm433_vm0, %v939_v6  ;;  %v944_v16 = vld [vmem:[%s1036_s24 + $0x10] ss:$8 sps:$4 sm:$0xff]   ;;  %v946_v18 = vld [vmem:[%s1036_s24 + $0x24] ss:$8 sps:$4 sm:$0xff]   ;;  %v950_v20 = vld [vmem:[%s1036_s24 + $0x20] ss:$8 sps:$4 sm:$0xff]  }
  0x13   : > { %489 = vmatpush1.bf16.msra.mxu0 %v928_v4  ;;  %910 = vmatpush1.bf16.msra.mxu1 %v928_v4  ;;  %v945_v17 = vld [vmem:[%s1036_s24 + $0x90] ss:$8 sps:$4 sm:$0xff]   ;;  %v948_v19 = vld [vmem:[%s1036_s24 + $0xa4] ss:$8 sps:$4 sm:$0xff]   ;;  %v951_v21 = vld [vmem:[%s1036_s24 + $0xa0] ss:$8 sps:$4 sm:$0xff]  }
  0x14   : > { %490 = vmatprep.subr.bf16.mxu0 %v990_v1  ;;  %902 = vmatprep.subr.bf16.mxu1 %v990_v1  ;;  %v952_v22 = vld [vmem:[%s1036_s24 + $0x34] ss:$8 sps:$4 sm:$0xff]   ;;  %v956_v24 = vld [vmem:[%s1036_s24 + $0x30] ss:$8 sps:$4 sm:$0xff]   ;;  %v958_v26 = vld [vmem:[%s1036_s24 + $0x44] ss:$8 sps:$4 sm:$0xff]  }
  0x15   : > { %v954_v23 = vld [vmem:[%s1036_s24 + $0xb4] ss:$8 sps:$4 sm:$0xff]   ;;  %v957_v25 = vld [vmem:[%s1036_s24 + $0xb0] ss:$8 sps:$4 sm:$0xff]   ;;  %v960_v27 = vld [vmem:[%s1036_s24 + $0xc4] ss:$8 sps:$4 sm:$0xff]  }
  0x16   : > { %v962_v28 = vld [vmem:[%s1036_s24 + $0x40] ss:$8 sps:$4 sm:$0xff]   ;;  %v964_v30 = vld [vmem:[%s1036_s24 + $0x54] ss:$8 sps:$4 sm:$0xff]   ;;  %v968_v32 = vld [vmem:[%s1036_s24 + $0x50] ss:$8 sps:$4 sm:$0xff]  }
  0x17   : > { %491 = vmatpush1.bf16.msra.mxu0 %v929_v7  ;;  %911 = vmatpush1.bf16.msra.mxu1 %v929_v7  ;;  %v963_v29 = vld [vmem:[%s1036_s24 + $0xc0] ss:$8 sps:$4 sm:$0xff]   ;;  %v966_v31 = vld [vmem:[%s1036_s24 + $0xd4] ss:$8 sps:$4 sm:$0xff]   ;;  %v969_v33 = vld [vmem:[%s1036_s24 + $0xd0] ss:$8 sps:$4 sm:$0xff]  }
  0x18   : > { %492 = vmatprep.subr.bf16.mxu0 %v990_v1  ;;  %903 = vmatprep.subr.bf16.mxu1 %v990_v1  ;;  %v970_v34 = vld [vmem:[%s1036_s24 + $0x64] ss:$8 sps:$4 sm:$0xff]   ;;  %v974_v36 = vld [vmem:[%s1036_s24 + $0x60] ss:$8 sps:$4 sm:$0xff]   ;;  %v976_v38 = vld [vmem:[%s1036_s24 + $0x74] ss:$8 sps:$4 sm:$0xff]  }
  0x19   : > { %v972_v35 = vld [vmem:[%s1036_s24 + $0xe4] ss:$8 sps:$4 sm:$0xff]   ;;  %v975_v37 = vld [vmem:[%s1036_s24 + $0xe0] ss:$8 sps:$4 sm:$0xff]   ;;  %v978_v39 = vld [vmem:[%s1036_s24 + $0xf4] ss:$8 sps:$4 sm:$0xff]  }
  0x1a   : > { %v980_v40 = vld [vmem:[%s1036_s24 + $0x70] ss:$8 sps:$4 sm:$0xff]  }
  0x1b   : > { %493 = vmatpush1.bf16.msra.mxu0 %v930_v8  ;;  %912 = vmatpush1.bf16.msra.mxu1 %v930_v8  ;;  %v981_v41 = vld [vmem:[%s1036_s24 + $0xf0] ss:$8 sps:$4 sm:$0xff]  }
  0x1c   : > { %494 = vmatprep.subr.bf16.mxu0 %v990_v1  ;;  %904 = vmatprep.subr.bf16.mxu1 %v990_v1 }
  0x1f   : > { %495 = vmatpush1.bf16.msra.mxu0 %v931_v9  ;;  %913 = vmatpush1.bf16.msra.mxu1 %v931_v9 }
  0x20   : > { %496 = vmatprep.subr.bf16.mxu0 %v990_v1  ;;  %905 = vmatprep.subr.bf16.mxu1 %v990_v1 }
  0x23   : > { %497 = vmatpush1.bf16.msra.mxu0 %v932_v10  ;;  %914 = vmatpush1.bf16.msra.mxu1 %v932_v10 }
  0x24   : > { %498 = vmatprep.subr.bf16.mxu0 %v990_v1  ;;  %906 = vmatprep.subr.bf16.mxu1 %v990_v1 }
  0x27   : > { %499 = vmatpush1.bf16.msra.mxu0 %v933_v11  ;;  %915 = vmatpush1.bf16.msra.mxu1 %v933_v11 }
  0x2a   : > { %515 = vmatmul.mubr.bf16.vlgmr.msra.gmra.mrb[0].mxu0 %v934_v12  ;;  %579 = vmatmul.mubr.bf16.vlgmr.msra.gmra.mrb[0].mxu1 %v937_v13 }
  0x2b   : > { %880 = vmatprep.mubr.msk.bf16.mxu0 %vm433_vm0, %v940_v14  ;;  %888 = vmatprep.mubr.msk.bf16.mxu1 %vm433_vm0, %v942_v15 }
  0x32   : > { %523 = vmatmul.mubr.bf16.gmra.mrb[4].mxu0 %v944_v16  ;;  %587 = vmatmul.mubr.bf16.gmra.mrb[4].mxu1 %v945_v17 }
  0x33   : > { %881 = vmatprep.mubr.msk.bf16.mxu0 %vm433_vm0, %v946_v18  ;;  %889 = vmatprep.mubr.msk.bf16.mxu1 %vm433_vm0, %v948_v19 }
  0x3a   : > { %531 = vmatmul.mubr.bf16.gmra.mrb[8].mxu0 %v950_v20  ;;  %595 = vmatmul.mubr.bf16.gmra.mrb[8].mxu1 %v951_v21 }
  0x3b   : > { %882 = vmatprep.mubr.msk.bf16.mxu0 %vm433_vm0, %v952_v22  ;;  %890 = vmatprep.mubr.msk.bf16.mxu1 %vm433_vm0, %v954_v23 }
  0x42   : > { %539 = vmatmul.mubr.bf16.gmra.mrb[12].mxu0 %v956_v24  ;;  %603 = vmatmul.mubr.bf16.gmra.mrb[12].mxu1 %v957_v25 }
  0x43   : > { %883 = vmatprep.mubr.msk.bf16.mxu0 %vm433_vm0, %v958_v26  ;;  %891 = vmatprep.mubr.msk.bf16.mxu1 %vm433_vm0, %v960_v27 }
  0x4a   : > { %547 = vmatmul.mubr.bf16.gmra.mrb[16].mxu0 %v962_v28  ;;  %611 = vmatmul.mubr.bf16.gmra.mrb[16].mxu1 %v963_v29 }
  0x4b   : > { %884 = vmatprep.mubr.msk.bf16.mxu0 %vm433_vm0, %v964_v30  ;;  %892 = vmatprep.mubr.msk.bf16.mxu1 %vm433_vm0, %v966_v31 }
  0x52   : > { %555 = vmatmul.mubr.bf16.gmra.mrb[20].mxu0 %v968_v32  ;;  %619 = vmatmul.mubr.bf16.gmra.mrb[20].mxu1 %v969_v33 }
  0x53   : > { %885 = vmatprep.mubr.msk.bf16.mxu0 %vm433_vm0, %v970_v34  ;;  %893 = vmatprep.mubr.msk.bf16.mxu1 %vm433_vm0, %v972_v35 }
  0x5a   : > { %563 = vmatmul.mubr.bf16.gmra.mrb[24].mxu0 %v974_v36  ;;  %627 = vmatmul.mubr.bf16.gmra.mrb[24].mxu1 %v975_v37 }
  0x5b   : > { %886 = vmatprep.mubr.msk.bf16.mxu0 %vm433_vm0, %v976_v38  ;;  %894 = vmatprep.mubr.msk.bf16.mxu1 %vm433_vm0, %v978_v39 }
  0x62   : > { %571 = vmatmul.mubr.bf16.gmra.mrb[28].mxu0 %v980_v40  ;;  %635 = vmatmul.mubr.bf16.gmra.mrb[28].mxu1 %v981_v41 }
  0xfd   : > { %v516_v43 = vpop.f32.mrb[0].mxu0  ;;  %v580_v44 = vpop.f32.mrb[0].mxu1 }
  0xfe   : > { %v517_v45 = vadd.f32 %v1107_v42, %v516_v43  ;;  %v581_v46 = vadd.f32 %v1107_v42, %v580_v44  ;;  %v518_v47 = vpop.f32.mrb[1].mxu0  ;;  %v582_v48 = vpop.f32.mrb[1].mxu1 }
  0xff   : > { %v519_v49 = vpop.f32.mrb[2].mxu0  ;;  %v583_v50 = vpop.f32.mrb[2].mxu1 }
 0x100   : > { %vm643_vm1 = vcmp.ge.f32.partialorder %v517_v45, 0.0  ;;  %v675_v51 = vmul.f32 0.2, %v517_v45  ;;  %vm659_vm2 = vcmp.ge.f32.partialorder %v581_v46, 0.0  ;;  %v691_v52 = vmul.f32 0.2, %v581_v46 }
 0x101   : > { %v520_v53 = vadd.f32 %v1107_v42, %v519_v49  ;;  %v584_v54 = vadd.f32 %v1107_v42, %v583_v50  ;;  %v521_v55 = vpop.f32.mrb[3].mxu0  ;;  %v585_v56 = vpop.f32.mrb[3].mxu1 }
 0x102   : > { %v707_v57 = vsel %vm643_vm1, %v517_v45, %v675_v51  ;;  %v723_v58 = vsel %vm659_vm2, %v581_v46, %v691_v52 }
 0x103   : > { %739 = vst.msk [vmem:[%s1116_s15] sm:$0xff] %vm433_vm0, %v707_v57  ;;  %755 = vst.msk [vmem:[%s1116_s15 + $0x80] sm:$0xff] %vm433_vm0, %v723_v58  ;;  %vm644_vm3 = vcmp.ge.f32.partialorder %v520_v53, 0.0  ;;  %v676_v59 = vmul.f32 0.2, %v520_v53  ;;  %vm660_vm4 = vcmp.ge.f32.partialorder %v584_v54, 0.0 }
 0x104   : > { %v692_v60 = vmul.f32 0.2, %v584_v54 }
 0x105   : > { %v708_v61 = vsel %vm644_vm3, %v520_v53, %v676_v59  ;;  %v524_v63 = vpop.f32.mrb[4].mxu0  ;;  %v588_v0 = vpop.f32.mrb[4].mxu1 }
 0x106   : > { %v724_v62 = vsel %vm660_vm4, %v584_v54, %v692_v60  ;;  %740 = vst.msk [vmem:[%s1116_s15 + $0x8] sm:$0xff] %vm433_vm0, %v708_v61  ;;  %v525_v1 = vadd.f32 %v1107_v42, %v524_v63  ;;  %v589_v2 = vadd.f32 %v1107_v42, %v588_v0  ;;  %v526_v3 = vpop.f32.mrb[5].mxu0  ;;  %v590_v4 = vpop.f32.mrb[5].mxu1 }
 0x107   : > { %756 = vst.msk [vmem:[%s1116_s15 + $0x88] sm:$0xff] %vm433_vm0, %v724_v62  ;;  %v527_v5 = vpop.f32.mrb[6].mxu0  ;;  %v591_v6 = vpop.f32.mrb[6].mxu1 }
 0x108   : > { %vm645_vm5 = vcmp.ge.f32.partialorder %v525_v1, 0.0  ;;  %v677_v7 = vmul.f32 0.2, %v525_v1  ;;  %vm661_vm6 = vcmp.ge.f32.partialorder %v589_v2, 0.0  ;;  %v693_v8 = vmul.f32 0.2, %v589_v2 }
 0x109   : > { %v528_v9 = vadd.f32 %v1107_v42, %v527_v5  ;;  %v592_v10 = vadd.f32 %v1107_v42, %v591_v6  ;;  %v529_v11 = vpop.f32.mrb[7].mxu0  ;;  %v593_v12 = vpop.f32.mrb[7].mxu1 }
 0x10a   : > { %v709_v13 = vsel %vm645_vm5, %v525_v1, %v677_v7  ;;  %v725_v14 = vsel %vm661_vm6, %v589_v2, %v693_v8 }
 0x10b   : > { %741 = vst.msk [vmem:[%s1116_s15 + $0x10] sm:$0xff] %vm433_vm0, %v709_v13  ;;  %757 = vst.msk [vmem:[%s1116_s15 + $0x90] sm:$0xff] %vm433_vm0, %v725_v14  ;;  %vm646_vm7 = vcmp.ge.f32.partialorder %v528_v9, 0.0  ;;  %v678_v15 = vmul.f32 0.2, %v528_v9  ;;  %vm662_vm8 = vcmp.ge.f32.partialorder %v592_v10, 0.0 }
 0x10c   : > { %v694_v16 = vmul.f32 0.2, %v592_v10 }
 0x10d   : > { %v710_v17 = vsel %vm646_vm7, %v528_v9, %v678_v15  ;;  %v532_v19 = vpop.f32.mrb[8].mxu0  ;;  %v596_v20 = vpop.f32.mrb[8].mxu1 }
 0x10e   : > { %v726_v18 = vsel %vm662_vm8, %v592_v10, %v694_v16  ;;  %742 = vst.msk [vmem:[%s1116_s15 + $0x18] sm:$0xff] %vm433_vm0, %v710_v17  ;;  %v533_v21 = vadd.f32 %v1107_v42, %v532_v19  ;;  %v597_v22 = vadd.f32 %v1107_v42, %v596_v20  ;;  %v534_v23 = vpop.f32.mrb[9].mxu0  ;;  %v598_v24 = vpop.f32.mrb[9].mxu1 }
 0x10f   : > { %758 = vst.msk [vmem:[%s1116_s15 + $0x98] sm:$0xff] %vm433_vm0, %v726_v18  ;;  %v535_v25 = vpop.f32.mrb[10].mxu0  ;;  %v599_v26 = vpop.f32.mrb[10].mxu1 }
 0x110   : > { %vm647_vm9 = vcmp.ge.f32.partialorder %v533_v21, 0.0  ;;  %v679_v27 = vmul.f32 0.2, %v533_v21  ;;  %vm663_vm10 = vcmp.ge.f32.partialorder %v597_v22, 0.0  ;;  %v695_v28 = vmul.f32 0.2, %v597_v22 }
 0x111   : > { %v536_v29 = vadd.f32 %v1107_v42, %v535_v25  ;;  %v600_v30 = vadd.f32 %v1107_v42, %v599_v26  ;;  %v537_v31 = vpop.f32.mrb[11].mxu0  ;;  %v601_v32 = vpop.f32.mrb[11].mxu1 }
 0x112   : > { %v711_v33 = vsel %vm647_vm9, %v533_v21, %v679_v27  ;;  %v727_v34 = vsel %vm663_vm10, %v597_v22, %v695_v28 }
 0x113   : > { %743 = vst.msk [vmem:[%s1116_s15 + $0x20] sm:$0xff] %vm433_vm0, %v711_v33  ;;  %759 = vst.msk [vmem:[%s1116_s15 + $0xa0] sm:$0xff] %vm433_vm0, %v727_v34  ;;  %vm648_vm11 = vcmp.ge.f32.partialorder %v536_v29, 0.0  ;;  %v680_v35 = vmul.f32 0.2, %v536_v29  ;;  %vm664_vm12 = vcmp.ge.f32.partialorder %v600_v30, 0.0 }
 0x114   : > { %v696_v36 = vmul.f32 0.2, %v600_v30 }
 0x115   : > { %v712_v37 = vsel %vm648_vm11, %v536_v29, %v680_v35  ;;  %v540_v39 = vpop.f32.mrb[12].mxu0  ;;  %v604_v40 = vpop.f32.mrb[12].mxu1 }
 0x116   : > { %v728_v38 = vsel %vm664_vm12, %v600_v30, %v696_v36  ;;  %744 = vst.msk [vmem:[%s1116_s15 + $0x28] sm:$0xff] %vm433_vm0, %v712_v37  ;;  %v541_v41 = vadd.f32 %v1107_v42, %v540_v39  ;;  %v605_v43 = vadd.f32 %v1107_v42, %v604_v40  ;;  %v542_v44 = vpop.f32.mrb[13].mxu0  ;;  %v606_v45 = vpop.f32.mrb[13].mxu1 }
 0x117   : > { %760 = vst.msk [vmem:[%s1116_s15 + $0xa8] sm:$0xff] %vm433_vm0, %v728_v38  ;;  %v543_v46 = vpop.f32.mrb[14].mxu0  ;;  %v607_v47 = vpop.f32.mrb[14].mxu1 }
 0x118   : > { %vm649_vm13 = vcmp.ge.f32.partialorder %v541_v41, 0.0  ;;  %v681_v48 = vmul.f32 0.2, %v541_v41  ;;  %vm665_vm14 = vcmp.ge.f32.partialorder %v605_v43, 0.0  ;;  %v697_v49 = vmul.f32 0.2, %v605_v43 }
 0x119   : > { %v544_v50 = vadd.f32 %v1107_v42, %v543_v46  ;;  %v608_v51 = vadd.f32 %v1107_v42, %v607_v47  ;;  %v545_v52 = vpop.f32.mrb[15].mxu0  ;;  %v609_v53 = vpop.f32.mrb[15].mxu1 }
 0x11a   : > { %v713_v54 = vsel %vm649_vm13, %v541_v41, %v681_v48  ;;  %v729_v55 = vsel %vm665_vm14, %v605_v43, %v697_v49 }
 0x11b   : > { %745 = vst.msk [vmem:[%s1116_s15 + $0x30] sm:$0xff] %vm433_vm0, %v713_v54  ;;  %761 = vst.msk [vmem:[%s1116_s15 + $0xb0] sm:$0xff] %vm433_vm0, %v729_v55  ;;  %vm650_vm15 = vcmp.ge.f32.partialorder %v544_v50, 0.0  ;;  %v682_v56 = vmul.f32 0.2, %v544_v50  ;;  %vm666_vm1 = vcmp.ge.f32.partialorder %v608_v51, 0.0 }
 0x11c   : > { %v698_v57 = vmul.f32 0.2, %v608_v51 }
 0x11d   : > { %v714_v58 = vsel %vm650_vm15, %v544_v50, %v682_v56  ;;  %v548_v60 = vpop.f32.mrb[16].mxu0  ;;  %v612_v61 = vpop.f32.mrb[16].mxu1 }
 0x11e   : > { %v730_v59 = vsel %vm666_vm1, %v608_v51, %v698_v57  ;;  %746 = vst.msk [vmem:[%s1116_s15 + $0x38] sm:$0xff] %vm433_vm0, %v714_v58  ;;  %v549_v62 = vadd.f32 %v1107_v42, %v548_v60  ;;  %v613_v63 = vadd.f32 %v1107_v42, %v612_v61  ;;  %v550_v0 = vpop.f32.mrb[17].mxu0  ;;  %v614_v1 = vpop.f32.mrb[17].mxu1 }
 0x11f   : > { %762 = vst.msk [vmem:[%s1116_s15 + $0xb8] sm:$0xff] %vm433_vm0, %v730_v59  ;;  %v551_v2 = vpop.f32.mrb[18].mxu0  ;;  %v615_v3 = vpop.f32.mrb[18].mxu1 }
 0x120   : > { %vm651_vm2 = vcmp.ge.f32.partialorder %v549_v62, 0.0  ;;  %v683_v4 = vmul.f32 0.2, %v549_v62  ;;  %vm667_vm3 = vcmp.ge.f32.partialorder %v613_v63, 0.0  ;;  %v699_v5 = vmul.f32 0.2, %v613_v63 }
 0x121   : > { %v552_v6 = vadd.f32 %v1107_v42, %v551_v2  ;;  %v616_v7 = vadd.f32 %v1107_v42, %v615_v3  ;;  %v553_v8 = vpop.f32.mrb[19].mxu0  ;;  %v617_v9 = vpop.f32.mrb[19].mxu1 }
 0x122   : > { %v715_v10 = vsel %vm651_vm2, %v549_v62, %v683_v4  ;;  %v731_v11 = vsel %vm667_vm3, %v613_v63, %v699_v5 }
 0x123   : > { %747 = vst.msk [vmem:[%s1116_s15 + $0x40] sm:$0xff] %vm433_vm0, %v715_v10  ;;  %763 = vst.msk [vmem:[%s1116_s15 + $0xc0] sm:$0xff] %vm433_vm0, %v731_v11  ;;  %vm652_vm4 = vcmp.ge.f32.partialorder %v552_v6, 0.0  ;;  %v684_v12 = vmul.f32 0.2, %v552_v6  ;;  %vm668_vm5 = vcmp.ge.f32.partialorder %v616_v7, 0.0 }
 0x124   : > { %v700_v13 = vmul.f32 0.2, %v616_v7 }
 0x125   : > { %v716_v14 = vsel %vm652_vm4, %v552_v6, %v684_v12  ;;  %v556_v16 = vpop.f32.mrb[20].mxu0  ;;  %v620_v17 = vpop.f32.mrb[20].mxu1 }
 0x126   : > { %v732_v15 = vsel %vm668_vm5, %v616_v7, %v700_v13  ;;  %748 = vst.msk [vmem:[%s1116_s15 + $0x48] sm:$0xff] %vm433_vm0, %v716_v14  ;;  %v557_v18 = vadd.f32 %v1107_v42, %v556_v16  ;;  %v621_v19 = vadd.f32 %v1107_v42, %v620_v17  ;;  %v558_v20 = vpop.f32.mrb[21].mxu0  ;;  %v622_v21 = vpop.f32.mrb[21].mxu1 }
 0x127   : > { %764 = vst.msk [vmem:[%s1116_s15 + $0xc8] sm:$0xff] %vm433_vm0, %v732_v15  ;;  %v559_v22 = vpop.f32.mrb[22].mxu0  ;;  %v623_v23 = vpop.f32.mrb[22].mxu1 }
 0x128   : > { %vm653_vm6 = vcmp.ge.f32.partialorder %v557_v18, 0.0  ;;  %v685_v24 = vmul.f32 0.2, %v557_v18  ;;  %vm669_vm7 = vcmp.ge.f32.partialorder %v621_v19, 0.0  ;;  %v701_v25 = vmul.f32 0.2, %v621_v19 }
 0x129   : > { %v560_v26 = vadd.f32 %v1107_v42, %v559_v22  ;;  %v624_v27 = vadd.f32 %v1107_v42, %v623_v23  ;;  %v561_v28 = vpop.f32.mrb[23].mxu0  ;;  %v625_v29 = vpop.f32.mrb[23].mxu1 }
 0x12a   : > { %v717_v30 = vsel %vm653_vm6, %v557_v18, %v685_v24  ;;  %v733_v31 = vsel %vm669_vm7, %v621_v19, %v701_v25 }
 0x12b   : > { %749 = vst.msk [vmem:[%s1116_s15 + $0x50] sm:$0xff] %vm433_vm0, %v717_v30  ;;  %765 = vst.msk [vmem:[%s1116_s15 + $0xd0] sm:$0xff] %vm433_vm0, %v733_v31  ;;  %vm654_vm8 = vcmp.ge.f32.partialorder %v560_v26, 0.0  ;;  %v686_v32 = vmul.f32 0.2, %v560_v26  ;;  %vm670_vm9 = vcmp.ge.f32.partialorder %v624_v27, 0.0 }
 0x12c   : > { %v702_v33 = vmul.f32 0.2, %v624_v27 }
 0x12d   : > { %v718_v34 = vsel %vm654_vm8, %v560_v26, %v686_v32  ;;  %v564_v36 = vpop.f32.mrb[24].mxu0  ;;  %v628_v37 = vpop.f32.mrb[24].mxu1 }
 0x12e   : > { %v734_v35 = vsel %vm670_vm9, %v624_v27, %v702_v33  ;;  %750 = vst.msk [vmem:[%s1116_s15 + $0x58] sm:$0xff] %vm433_vm0, %v718_v34  ;;  %v565_v38 = vadd.f32 %v1107_v42, %v564_v36  ;;  %v629_v39 = vadd.f32 %v1107_v42, %v628_v37  ;;  %v566_v40 = vpop.f32.mrb[25].mxu0  ;;  %v630_v41 = vpop.f32.mrb[25].mxu1 }
 0x12f   : > { %766 = vst.msk [vmem:[%s1116_s15 + $0xd8] sm:$0xff] %vm433_vm0, %v734_v35  ;;  %v567_v43 = vpop.f32.mrb[26].mxu0  ;;  %v631_v44 = vpop.f32.mrb[26].mxu1 }
 0x130   : > { %vm655_vm10 = vcmp.ge.f32.partialorder %v565_v38, 0.0  ;;  %v687_v45 = vmul.f32 0.2, %v565_v38  ;;  %vm671_vm11 = vcmp.ge.f32.partialorder %v629_v39, 0.0  ;;  %v703_v46 = vmul.f32 0.2, %v629_v39 }
 0x131   : > { %v568_v47 = vadd.f32 %v1107_v42, %v567_v43  ;;  %v632_v48 = vadd.f32 %v1107_v42, %v631_v44  ;;  %v569_v49 = vpop.f32.mrb[27].mxu0  ;;  %v633_v50 = vpop.f32.mrb[27].mxu1 }
 0x132   : > { %v719_v51 = vsel %vm655_vm10, %v565_v38, %v687_v45  ;;  %v735_v52 = vsel %vm671_vm11, %v629_v39, %v703_v46 }
 0x133   : > { %751 = vst.msk [vmem:[%s1116_s15 + $0x60] sm:$0xff] %vm433_vm0, %v719_v51  ;;  %767 = vst.msk [vmem:[%s1116_s15 + $0xe0] sm:$0xff] %vm433_vm0, %v735_v52  ;;  %vm656_vm12 = vcmp.ge.f32.partialorder %v568_v47, 0.0  ;;  %v688_v53 = vmul.f32 0.2, %v568_v47  ;;  %vm672_vm13 = vcmp.ge.f32.partialorder %v632_v48, 0.0 }
 0x134   : > { %v704_v54 = vmul.f32 0.2, %v632_v48 }
 0x135   : > { %v720_v55 = vsel %vm656_vm12, %v568_v47, %v688_v53  ;;  %v572_v57 = vpop.f32.mrb[28].mxu0  ;;  %v636_v58 = vpop.f32.mrb[28].mxu1 }
 0x136   : > { %v736_v56 = vsel %vm672_vm13, %v632_v48, %v704_v54  ;;  %752 = vst.msk [vmem:[%s1116_s15 + $0x68] sm:$0xff] %vm433_vm0, %v720_v55  ;;  %v573_v59 = vadd.f32 %v1107_v42, %v572_v57  ;;  %v637_v60 = vadd.f32 %v1107_v42, %v636_v58  ;;  %v574_v61 = vpop.f32.mrb[29].mxu0  ;;  %v638_v62 = vpop.f32.mrb[29].mxu1 }
 0x137   : > { %768 = vst.msk [vmem:[%s1116_s15 + $0xe8] sm:$0xff] %vm433_vm0, %v736_v56  ;;  %v575_v63 = vpop.f32.mrb[30].mxu0  ;;  %v639_v0 = vpop.f32.mrb[30].mxu1 }
 0x138   : > { %vm657_vm14 = vcmp.ge.f32.partialorder %v573_v59, 0.0  ;;  %v689_v1 = vmul.f32 0.2, %v573_v59  ;;  %vm673_vm15 = vcmp.ge.f32.partialorder %v637_v60, 0.0  ;;  %v705_v2 = vmul.f32 0.2, %v637_v60 }
 0x139   : > { %v576_v3 = vadd.f32 %v1107_v42, %v575_v63  ;;  %v640_v4 = vadd.f32 %v1107_v42, %v639_v0  ;;  %v577_v5 = vpop.f32.mrb[31].mxu0  ;;  %v641_v6 = vpop.f32.mrb[31].mxu1 }
 0x13a   : > { %v721_v7 = vsel %vm657_vm14, %v573_v59, %v689_v1  ;;  %v737_v8 = vsel %vm673_vm15, %v637_v60, %v705_v2 }
 0x13b   : > { %753 = vst.msk [vmem:[%s1116_s15 + $0x70] sm:$0xff] %vm433_vm0, %v721_v7  ;;  %769 = vst.msk [vmem:[%s1116_s15 + $0xf0] sm:$0xff] %vm433_vm0, %v737_v8  ;;  %vm658_vm1 = vcmp.ge.f32.partialorder %v576_v3, 0.0  ;;  %v690_v9 = vmul.f32 0.2, %v576_v3  ;;  %vm674_vm2 = vcmp.ge.f32.partialorder %v640_v4, 0.0 }
 0x13c   : > { %v706_v10 = vmul.f32 0.2, %v640_v4 }
 0x13d   : > { %v722_v11 = vsel %vm658_vm1, %v576_v3, %v690_v9 }
 0x13e   : > { %v738_v12 = vsel %vm674_vm2, %v640_v4, %v706_v10  ;;  %754 = vst.msk [vmem:[%s1116_s15 + $0x78] sm:$0xff] %vm433_vm0, %v722_v11 }
 0x13f   : > { %770 = vst.msk [vmem:[%s1116_s15 + $0xf8] sm:$0xff] %vm433_vm0, %v738_v12 }
 0x140 PF: > { %s13_s12 = sadd.s32 1, %s988_s12  }
 0x141   : > { %p10_p4 = scmp.ge.s32.totalorder %s13_s12, 4  }
 0x143   :  { %12 = sbr.rel (!%p10_p4) target bundleno = 1 (0x1), region = 62 }

// kernel: discriminator_forward.19
= control target key start
LH: loop header
LB: loop body
LE: loop exit
PB: predicated region body
PF: predicated region fallthrough
CT: control target
= control target key end

     0   :  { %s916_s12 = smov 0   ;;  %s1120_s0 = inlined_call_operand.vmem [shape: bf16[512,144], index: 0, kind: input, shape index: {}]   ;;  %s1121_s1 = inlined_call_operand.vmem [shape: bf16[144,8], index: 1, kind: input, shape index: {}]   ;;  %s1122_s2 = inlined_call_operand.vmem [shape: f32[1,8], index: 2, kind: input, shape index: {}]   ;;  %s1123_s3 = inlined_call_operand.vmem [shape: f32[512,8], index: 3, kind: output, shape index: {}]  }
   0x1 LB: > { %s732_s13 = sadd.s32 4294967295, %s893_s12   ;;  %p736_p0 = scmp.ge.s32.totalorder %s893_s12, 1  ;;  %s893_s12 = sphi %s916_s12, %s13_s12  }
   0x2   : > { %p139_p1 = scmp.lt.s32.totalorder %s893_s12, 3 }
   0x4   : > { %p140_p2 = pnand %p736_p0, %p139_p1 }
   0x5   : > { %v830_v0 = vld [vmem:[%s1121_s1] sm:$0xff] (!%p140_p2)   ;;  %v895_v1 = vmov (!%p140_p2), 0   ;;  %s737_s16 = sshll.u32 (!%p140_p2), %s732_s13, 5  ;;  %v831_v2 = vld [vmem:[%s1121_s1 + $0x8] sm:$0xff] (!%p140_p2)   ;;  %v832_v3 = vld [vmem:[%s1121_s1 + $0x10] sm:$0xff] (!%p140_p2)   ;;  %vm433_vm0 = vcmask (!%p140_p2), 130048  }
   0x6   : > { %143 = sbr.rel (%p140_p2) target bundleno = 315 (0x13b), region = 32  ;;  %482 = vmatprep.subr.bf16.mxu0 (!%p140_p2), %v895_v1  ;;  %803 = vmatprep.subr.bf16.mxu1 (!%p140_p2), %v895_v1  ;;  %p165_p3 = scmp.lt.s32.totalorder (!%p140_p2), %s737_s16, 63  ;;  %v833_v4 = vld [vmem:[%s1121_s1 + $0x18] sm:$0xff] (!%p140_p2)   ;;  %v834_v7 = vld [vmem:[%s1121_s1 + $0x20] sm:$0xff] (!%p140_p2)   ;;  %v835_v8 = vld [vmem:[%s1121_s1 + $0x28] sm:$0xff] (!%p140_p2)   ;;  %vm643_vm1 = vcmask (!%p140_p2), 64512  }
   0x7   : > { %483 = vmatpush1.bf16.msra.mxu0 (!%p140_p2), %v830_v0  ;;  %812 = vmatpush1.bf16.msra.mxu1 (!%p140_p2), %v830_v0  ;;  %v836_v9 = vld [vmem:[%s1121_s1 + $0x30] sm:$0xff] (!%p140_p2)   ;;  %v837_v10 = vld [vmem:[%s1121_s1 + $0x38] sm:$0xff] (!%p140_p2)   ;;  %v838_v11 = vld [vmem:[%s1121_s1 + $0x40] sm:$0xff] (!%p140_p2)  }
   0x8   : > { %484 = vmatprep.subr.bf16.mxu0 (!%p140_p2), %v895_v1  ;;  %804 = vmatprep.subr.bf16.mxu1 (!%p140_p2), %v895_v1  ;;  %v1012_v42 = vld [vmem:[%s1122_s2] ss:$0 sm:$0xff] (!%p140_p2) }
   0xb   : > { %485 = vmatpush1.bf16.msra.mxu0 (!%p140_p2), %v831_v2  ;;  %813 = vmatpush1.bf16.msra.mxu1 (!%p140_p2), %v831_v2 }
   0xc   : > { %486 = vmatprep.subr.bf16.mxu0 (!%p140_p2), %v895_v1  ;;  %805 = vmatprep.subr.bf16.mxu1 (!%p140_p2), %v895_v1 }
   0xd   : > { %s1125_s16 = smov (!%p165_p3, %s737_s16), 63 }
   0xe   : > { %s802_s21 = sshll.u32 %s1125_s16, 3 }
   0xf   : > { %s941_s24 = scalar_lea.vmem %s1120_s0, %s802_s21  ;;  %487 = vmatpush1.bf16.msra.mxu0 %v832_v3  ;;  %814 = vmatpush1.bf16.msra.mxu1 %v832_v3  ;;  %s1019_s15 = scalar_lea.vmem %s1123_s3, %s802_s21 }
  0x10   : > { %v841_v5 = vld [vmem:[%s941_s24 + $0x4] ss:$8 sps:$4 sm:$0xff]   ;;  %488 = vmatprep.subr.bf16.mxu0 %v895_v1  ;;  %806 = vmatprep.subr.bf16.mxu1 %v895_v1  ;;  %v839_v12 = vld [vmem:[%s941_s24] ss:$8 sps:$4 sm:$0xff]   ;;  %v845_v14 = vld [vmem:[%s941_s24 + $0x14] ss:$8 sps:$4 sm:$0xff]  }
  0x11   : > { %v844_v6 = vld [vmem:[%s941_s24 + $0x84] ss:$8 sps:$4 sm:$0xff]   ;;  %784 = vmatprep.mubr.msk.bf16.mxu0 %vm433_vm0, %v841_v5  ;;  %v842_v13 = vld [vmem:[%s941_s24 + $0x80] ss:$8 sps:$4 sm:$0xff]   ;;  %v847_v15 = vld [vmem:[%s941_s24 + $0x94] ss:$8 sps:$4 sm:$0xff]  }
  0x12   : > { %792 = vmatprep.mubr.msk.bf16.mxu1 %vm433_vm0, %v844_v6  ;;  %v849_v16 = vld [vmem:[%s941_s24 + $0x10] ss:$8 sps:$4 sm:$0xff]   ;;  %v851_v18 = vld [vmem:[%s941_s24 + $0x24] ss:$8 sps:$4 sm:$0xff]   ;;  %v855_v20 = vld [vmem:[%s941_s24 + $0x20] ss:$8 sps:$4 sm:$0xff]  }
  0x13   : > { %489 = vmatpush1.bf16.msra.mxu0 %v833_v4  ;;  %815 = vmatpush1.bf16.msra.mxu1 %v833_v4  ;;  %v850_v17 = vld [vmem:[%s941_s24 + $0x90] ss:$8 sps:$4 sm:$0xff]   ;;  %v853_v19 = vld [vmem:[%s941_s24 + $0xa4] ss:$8 sps:$4 sm:$0xff]   ;;  %v856_v21 = vld [vmem:[%s941_s24 + $0xa0] ss:$8 sps:$4 sm:$0xff]  }
  0x14   : > { %490 = vmatprep.subr.bf16.mxu0 %v895_v1  ;;  %807 = vmatprep.subr.bf16.mxu1 %v895_v1  ;;  %v857_v22 = vld [vmem:[%s941_s24 + $0x34] ss:$8 sps:$4 sm:$0xff]   ;;  %v861_v24 = vld [vmem:[%s941_s24 + $0x30] ss:$8 sps:$4 sm:$0xff]   ;;  %v863_v26 = vld [vmem:[%s941_s24 + $0x44] ss:$8 sps:$4 sm:$0xff]  }
  0x15   : > { %v859_v23 = vld [vmem:[%s941_s24 + $0xb4] ss:$8 sps:$4 sm:$0xff]   ;;  %v862_v25 = vld [vmem:[%s941_s24 + $0xb0] ss:$8 sps:$4 sm:$0xff]   ;;  %v865_v27 = vld [vmem:[%s941_s24 + $0xc4] ss:$8 sps:$4 sm:$0xff]  }
  0x16   : > { %v867_v28 = vld [vmem:[%s941_s24 + $0x40] ss:$8 sps:$4 sm:$0xff]   ;;  %v869_v30 = vld [vmem:[%s941_s24 + $0x54] ss:$8 sps:$4 sm:$0xff]   ;;  %v873_v32 = vld [vmem:[%s941_s24 + $0x50] ss:$8 sps:$4 sm:$0xff]  }
  0x17   : > { %491 = vmatpush1.bf16.msra.mxu0 %v834_v7  ;;  %816 = vmatpush1.bf16.msra.mxu1 %v834_v7  ;;  %v868_v29 = vld [vmem:[%s941_s24 + $0xc0] ss:$8 sps:$4 sm:$0xff]   ;;  %v871_v31 = vld [vmem:[%s941_s24 + $0xd4] ss:$8 sps:$4 sm:$0xff]   ;;  %v874_v33 = vld [vmem:[%s941_s24 + $0xd0] ss:$8 sps:$4 sm:$0xff]  }
  0x18   : > { %492 = vmatprep.subr.bf16.mxu0 %v895_v1  ;;  %808 = vmatprep.subr.bf16.mxu1 %v895_v1  ;;  %v875_v34 = vld [vmem:[%s941_s24 + $0x64] ss:$8 sps:$4 sm:$0xff]   ;;  %v879_v36 = vld [vmem:[%s941_s24 + $0x60] ss:$8 sps:$4 sm:$0xff]   ;;  %v881_v38 = vld [vmem:[%s941_s24 + $0x74] ss:$8 sps:$4 sm:$0xff]  }
  0x19   : > { %v877_v35 = vld [vmem:[%s941_s24 + $0xe4] ss:$8 sps:$4 sm:$0xff]   ;;  %v880_v37 = vld [vmem:[%s941_s24 + $0xe0] ss:$8 sps:$4 sm:$0xff]   ;;  %v883_v39 = vld [vmem:[%s941_s24 + $0xf4] ss:$8 sps:$4 sm:$0xff]  }
  0x1a   : > { %v885_v40 = vld [vmem:[%s941_s24 + $0x70] ss:$8 sps:$4 sm:$0xff]  }
  0x1b   : > { %493 = vmatpush1.bf16.msra.mxu0 %v835_v8  ;;  %817 = vmatpush1.bf16.msra.mxu1 %v835_v8  ;;  %v886_v41 = vld [vmem:[%s941_s24 + $0xf0] ss:$8 sps:$4 sm:$0xff]  }
  0x1c   : > { %494 = vmatprep.subr.bf16.mxu0 %v895_v1  ;;  %809 = vmatprep.subr.bf16.mxu1 %v895_v1 }
  0x1f   : > { %495 = vmatpush1.bf16.msra.mxu0 %v836_v9  ;;  %818 = vmatpush1.bf16.msra.mxu1 %v836_v9 }
  0x20   : > { %496 = vmatprep.subr.bf16.mxu0 %v895_v1  ;;  %810 = vmatprep.subr.bf16.mxu1 %v895_v1 }
  0x23   : > { %497 = vmatpush1.bf16.msra.mxu0 %v837_v10  ;;  %819 = vmatpush1.bf16.msra.mxu1 %v837_v10 }
  0x24   : > { %498 = vmatprep.subr.bf16.mxu0 %v895_v1  ;;  %811 = vmatprep.subr.bf16.mxu1 %v895_v1 }
  0x27   : > { %499 = vmatpush1.bf16.msra.mxu0 %v838_v11  ;;  %820 = vmatpush1.bf16.msra.mxu1 %v838_v11 }
  0x2a   : > { %515 = vmatmul.mubr.bf16.vlgmr.msra.gmra.mrb[0].mxu0 %v839_v12  ;;  %579 = vmatmul.mubr.bf16.vlgmr.msra.gmra.mrb[0].mxu1 %v842_v13 }
  0x2b   : > { %785 = vmatprep.mubr.msk.bf16.mxu0 %vm433_vm0, %v845_v14  ;;  %793 = vmatprep.mubr.msk.bf16.mxu1 %vm433_vm0, %v847_v15 }
  0x32   : > { %523 = vmatmul.mubr.bf16.gmra.mrb[4].mxu0 %v849_v16  ;;  %587 = vmatmul.mubr.bf16.gmra.mrb[4].mxu1 %v850_v17 }
  0x33   : > { %786 = vmatprep.mubr.msk.bf16.mxu0 %vm433_vm0, %v851_v18  ;;  %794 = vmatprep.mubr.msk.bf16.mxu1 %vm433_vm0, %v853_v19 }
  0x3a   : > { %531 = vmatmul.mubr.bf16.gmra.mrb[8].mxu0 %v855_v20  ;;  %595 = vmatmul.mubr.bf16.gmra.mrb[8].mxu1 %v856_v21 }
  0x3b   : > { %787 = vmatprep.mubr.msk.bf16.mxu0 %vm433_vm0, %v857_v22  ;;  %795 = vmatprep.mubr.msk.bf16.mxu1 %vm433_vm0, %v859_v23 }
  0x42   : > { %539 = vmatmul.mubr.bf16.gmra.mrb[12].mxu0 %v861_v24  ;;  %603 = vmatmul.mubr.bf16.gmra.mrb[12].mxu1 %v862_v25 }
  0x43   : > { %788 = vmatprep.mubr.msk.bf16.mxu0 %vm433_vm0, %v863_v26  ;;  %796 = vmatprep.mubr.msk.bf16.mxu1 %vm433_vm0, %v865_v27 }
  0x4a   : > { %547 = vmatmul.mubr.bf16.gmra.mrb[16].mxu0 %v867_v28  ;;  %611 = vmatmul.mubr.bf16.gmra.mrb[16].mxu1 %v868_v29 }
  0x4b   : > { %789 = vmatprep.mubr.msk.bf16.mxu0 %vm433_vm0, %v869_v30  ;;  %797 = vmatprep.mubr.msk.bf16.mxu1 %vm433_vm0, %v871_v31 }
  0x52   : > { %555 = vmatmul.mubr.bf16.gmra.mrb[20].mxu0 %v873_v32  ;;  %619 = vmatmul.mubr.bf16.gmra.mrb[20].mxu1 %v874_v33 }
  0x53   : > { %790 = vmatprep.mubr.msk.bf16.mxu0 %vm433_vm0, %v875_v34  ;;  %798 = vmatprep.mubr.msk.bf16.mxu1 %vm433_vm0, %v877_v35 }
  0x5a   : > { %563 = vmatmul.mubr.bf16.gmra.mrb[24].mxu0 %v879_v36  ;;  %627 = vmatmul.mubr.bf16.gmra.mrb[24].mxu1 %v880_v37 }
  0x5b   : > { %791 = vmatprep.mubr.msk.bf16.mxu0 %vm433_vm0, %v881_v38  ;;  %799 = vmatprep.mubr.msk.bf16.mxu1 %vm433_vm0, %v883_v39 }
  0x62   : > { %571 = vmatmul.mubr.bf16.gmra.mrb[28].mxu0 %v885_v40  ;;  %635 = vmatmul.mubr.bf16.gmra.mrb[28].mxu1 %v886_v41 }
  0xfd   : > { %v516_v43 = vpop.f32.mrb[0].mxu0  ;;  %v580_v44 = vpop.f32.mrb[0].mxu1 }
  0xfe   : > { %v517_v45 = vadd.f32 %v1012_v42, %v516_v43  ;;  %v581_v46 = vadd.f32 %v1012_v42, %v580_v44  ;;  %v518_v47 = vpop.f32.mrb[1].mxu0  ;;  %v582_v48 = vpop.f32.mrb[1].mxu1 }
  0xff   : > { %v519_v49 = vpop.f32.mrb[2].mxu0  ;;  %v583_v50 = vpop.f32.mrb[2].mxu1 }
 0x100   : > { %644 = vst.msk [vmem:[%s1019_s15] sm:$0xff] %vm643_vm1, %v517_v45  ;;  %660 = vst.msk [vmem:[%s1019_s15 + $0x80] sm:$0xff] %vm643_vm1, %v581_v46  ;;  %v520_v51 = vadd.f32 %v1012_v42, %v519_v49  ;;  %v584_v52 = vadd.f32 %v1012_v42, %v583_v50  ;;  %v521_v53 = vpop.f32.mrb[3].mxu0  ;;  %v585_v54 = vpop.f32.mrb[3].mxu1 }
 0x102   : > { %645 = vst.msk [vmem:[%s1019_s15 + $0x8] sm:$0xff] %vm643_vm1, %v520_v51  ;;  %661 = vst.msk [vmem:[%s1019_s15 + $0x88] sm:$0xff] %vm643_vm1, %v584_v52 }
 0x105   : > { %v524_v55 = vpop.f32.mrb[4].mxu0  ;;  %v588_v56 = vpop.f32.mrb[4].mxu1 }
 0x106   : > { %v525_v57 = vadd.f32 %v1012_v42, %v524_v55  ;;  %v589_v58 = vadd.f32 %v1012_v42, %v588_v56  ;;  %v526_v59 = vpop.f32.mrb[5].mxu0  ;;  %v590_v60 = vpop.f32.mrb[5].mxu1 }
 0x107   : > { %v527_v61 = vpop.f32.mrb[6].mxu0  ;;  %v591_v62 = vpop.f32.mrb[6].mxu1 }
 0x108   : > { %646 = vst.msk [vmem:[%s1019_s15 + $0x10] sm:$0xff] %vm643_vm1, %v525_v57  ;;  %662 = vst.msk [vmem:[%s1019_s15 + $0x90] sm:$0xff] %vm643_vm1, %v589_v58  ;;  %v528_v63 = vadd.f32 %v1012_v42, %v527_v61  ;;  %v592_v0 = vadd.f32 %v1012_v42, %v591_v62  ;;  %v529_v1 = vpop.f32.mrb[7].mxu0  ;;  %v593_v2 = vpop.f32.mrb[7].mxu1 }
 0x10a   : > { %647 = vst.msk [vmem:[%s1019_s15 + $0x18] sm:$0xff] %vm643_vm1, %v528_v63  ;;  %663 = vst.msk [vmem:[%s1019_s15 + $0x98] sm:$0xff] %vm643_vm1, %v592_v0 }
 0x10d   : > { %v532_v3 = vpop.f32.mrb[8].mxu0  ;;  %v596_v4 = vpop.f32.mrb[8].mxu1 }
 0x10e   : > { %v533_v5 = vadd.f32 %v1012_v42, %v532_v3  ;;  %v597_v6 = vadd.f32 %v1012_v42, %v596_v4  ;;  %v534_v7 = vpop.f32.mrb[9].mxu0  ;;  %v598_v8 = vpop.f32.mrb[9].mxu1 }
 0x10f   : > { %v535_v9 = vpop.f32.mrb[10].mxu0  ;;  %v599_v10 = vpop.f32.mrb[10].mxu1 }
 0x110   : > { %648 = vst.msk [vmem:[%s1019_s15 + $0x20] sm:$0xff] %vm643_vm1, %v533_v5  ;;  %664 = vst.msk [vmem:[%s1019_s15 + $0xa0] sm:$0xff] %vm643_vm1, %v597_v6  ;;  %v536_v11 = vadd.f32 %v1012_v42, %v535_v9  ;;  %v600_v12 = vadd.f32 %v1012_v42, %v599_v10  ;;  %v537_v13 = vpop.f32.mrb[11].mxu0  ;;  %v601_v14 = vpop.f32.mrb[11].mxu1 }
 0x112   : > { %649 = vst.msk [vmem:[%s1019_s15 + $0x28] sm:$0xff] %vm643_vm1, %v536_v11  ;;  %665 = vst.msk [vmem:[%s1019_s15 + $0xa8] sm:$0xff] %vm643_vm1, %v600_v12 }
 0x115   : > { %v540_v15 = vpop.f32.mrb[12].mxu0  ;;  %v604_v16 = vpop.f32.mrb[12].mxu1 }
 0x116   : > { %v541_v17 = vadd.f32 %v1012_v42, %v540_v15  ;;  %v605_v18 = vadd.f32 %v1012_v42, %v604_v16  ;;  %v542_v19 = vpop.f32.mrb[13].mxu0  ;;  %v606_v20 = vpop.f32.mrb[13].mxu1 }
 0x117   : > { %v543_v21 = vpop.f32.mrb[14].mxu0  ;;  %v607_v22 = vpop.f32.mrb[14].mxu1 }
 0x118   : > { %650 = vst.msk [vmem:[%s1019_s15 + $0x30] sm:$0xff] %vm643_vm1, %v541_v17  ;;  %666 = vst.msk [vmem:[%s1019_s15 + $0xb0] sm:$0xff] %vm643_vm1, %v605_v18  ;;  %v544_v23 = vadd.f32 %v1012_v42, %v543_v21  ;;  %v608_v24 = vadd.f32 %v1012_v42, %v607_v22  ;;  %v545_v25 = vpop.f32.mrb[15].mxu0  ;;  %v609_v26 = vpop.f32.mrb[15].mxu1 }
 0x11a   : > { %651 = vst.msk [vmem:[%s1019_s15 + $0x38] sm:$0xff] %vm643_vm1, %v544_v23  ;;  %667 = vst.msk [vmem:[%s1019_s15 + $0xb8] sm:$0xff] %vm643_vm1, %v608_v24 }
 0x11d   : > { %v548_v27 = vpop.f32.mrb[16].mxu0  ;;  %v612_v28 = vpop.f32.mrb[16].mxu1 }
 0x11e   : > { %v549_v29 = vadd.f32 %v1012_v42, %v548_v27  ;;  %v613_v30 = vadd.f32 %v1012_v42, %v612_v28  ;;  %v550_v31 = vpop.f32.mrb[17].mxu0  ;;  %v614_v32 = vpop.f32.mrb[17].mxu1 }
 0x11f   : > { %v551_v33 = vpop.f32.mrb[18].mxu0  ;;  %v615_v34 = vpop.f32.mrb[18].mxu1 }
 0x120   : > { %652 = vst.msk [vmem:[%s1019_s15 + $0x40] sm:$0xff] %vm643_vm1, %v549_v29  ;;  %668 = vst.msk [vmem:[%s1019_s15 + $0xc0] sm:$0xff] %vm643_vm1, %v613_v30  ;;  %v552_v35 = vadd.f32 %v1012_v42, %v551_v33  ;;  %v616_v36 = vadd.f32 %v1012_v42, %v615_v34  ;;  %v553_v37 = vpop.f32.mrb[19].mxu0  ;;  %v617_v38 = vpop.f32.mrb[19].mxu1 }
 0x122   : > { %653 = vst.msk [vmem:[%s1019_s15 + $0x48] sm:$0xff] %vm643_vm1, %v552_v35  ;;  %669 = vst.msk [vmem:[%s1019_s15 + $0xc8] sm:$0xff] %vm643_vm1, %v616_v36 }
 0x125   : > { %v556_v39 = vpop.f32.mrb[20].mxu0  ;;  %v620_v40 = vpop.f32.mrb[20].mxu1 }
 0x126   : > { %v557_v41 = vadd.f32 %v1012_v42, %v556_v39  ;;  %v621_v43 = vadd.f32 %v1012_v42, %v620_v40  ;;  %v558_v44 = vpop.f32.mrb[21].mxu0  ;;  %v622_v45 = vpop.f32.mrb[21].mxu1 }
 0x127   : > { %v559_v46 = vpop.f32.mrb[22].mxu0  ;;  %v623_v47 = vpop.f32.mrb[22].mxu1 }
 0x128   : > { %654 = vst.msk [vmem:[%s1019_s15 + $0x50] sm:$0xff] %vm643_vm1, %v557_v41  ;;  %670 = vst.msk [vmem:[%s1019_s15 + $0xd0] sm:$0xff] %vm643_vm1, %v621_v43  ;;  %v560_v48 = vadd.f32 %v1012_v42, %v559_v46  ;;  %v624_v49 = vadd.f32 %v1012_v42, %v623_v47  ;;  %v561_v50 = vpop.f32.mrb[23].mxu0  ;;  %v625_v51 = vpop.f32.mrb[23].mxu1 }
 0x12a   : > { %655 = vst.msk [vmem:[%s1019_s15 + $0x58] sm:$0xff] %vm643_vm1, %v560_v48  ;;  %671 = vst.msk [vmem:[%s1019_s15 + $0xd8] sm:$0xff] %vm643_vm1, %v624_v49 }
 0x12d   : > { %v564_v52 = vpop.f32.mrb[24].mxu0  ;;  %v628_v53 = vpop.f32.mrb[24].mxu1 }
 0x12e   : > { %v565_v54 = vadd.f32 %v1012_v42, %v564_v52  ;;  %v629_v55 = vadd.f32 %v1012_v42, %v628_v53  ;;  %v566_v56 = vpop.f32.mrb[25].mxu0  ;;  %v630_v57 = vpop.f32.mrb[25].mxu1 }
 0x12f   : > { %v567_v58 = vpop.f32.mrb[26].mxu0  ;;  %v631_v59 = vpop.f32.mrb[26].mxu1 }
 0x130   : > { %656 = vst.msk [vmem:[%s1019_s15 + $0x60] sm:$0xff] %vm643_vm1, %v565_v54  ;;  %672 = vst.msk [vmem:[%s1019_s15 + $0xe0] sm:$0xff] %vm643_vm1, %v629_v55  ;;  %v568_v60 = vadd.f32 %v1012_v42, %v567_v58  ;;  %v632_v61 = vadd.f32 %v1012_v42, %v631_v59  ;;  %v569_v62 = vpop.f32.mrb[27].mxu0  ;;  %v633_v63 = vpop.f32.mrb[27].mxu1 }
 0x132   : > { %657 = vst.msk [vmem:[%s1019_s15 + $0x68] sm:$0xff] %vm643_vm1, %v568_v60  ;;  %673 = vst.msk [vmem:[%s1019_s15 + $0xe8] sm:$0xff] %vm643_vm1, %v632_v61 }
 0x135   : > { %v572_v0 = vpop.f32.mrb[28].mxu0  ;;  %v636_v1 = vpop.f32.mrb[28].mxu1 }
 0x136   : > { %v573_v2 = vadd.f32 %v1012_v42, %v572_v0  ;;  %v637_v3 = vadd.f32 %v1012_v42, %v636_v1  ;;  %v574_v4 = vpop.f32.mrb[29].mxu0  ;;  %v638_v5 = vpop.f32.mrb[29].mxu1 }
 0x137   : > { %v575_v6 = vpop.f32.mrb[30].mxu0  ;;  %v639_v7 = vpop.f32.mrb[30].mxu1 }
 0x138   : > { %658 = vst.msk [vmem:[%s1019_s15 + $0x70] sm:$0xff] %vm643_vm1, %v573_v2  ;;  %674 = vst.msk [vmem:[%s1019_s15 + $0xf0] sm:$0xff] %vm643_vm1, %v637_v3  ;;  %v576_v8 = vadd.f32 %v1012_v42, %v575_v6  ;;  %v640_v9 = vadd.f32 %v1012_v42, %v639_v7  ;;  %v577_v10 = vpop.f32.mrb[31].mxu0  ;;  %v641_v11 = vpop.f32.mrb[31].mxu1 }
 0x13a   : > { %659 = vst.msk [vmem:[%s1019_s15 + $0x78] sm:$0xff] %vm643_vm1, %v576_v8  ;;  %675 = vst.msk [vmem:[%s1019_s15 + $0xf8] sm:$0xff] %vm643_vm1, %v640_v9 }
 0x13b PF: > { %s13_s12 = sadd.s32 1, %s893_s12  }
 0x13c   : > { %p10_p4 = scmp.ge.s32.totalorder %s13_s12, 4  }
 0x13e   :  { %12 = sbr.rel (!%p10_p4) target bundleno = 1 (0x1), region = 62 }

</bundles_post_ra>
